<compile_context>
chip_gen: v5e
topology: v5e:2x2
jax: 0.10.0
libtpu: 0.0.40
codegen_flags: <defaults>
</compile_context>

<pallas_src>
import functools
import math

import jax
import jax.numpy as jnp
from jax import lax
from jax.experimental import pallas as pl
from jax.experimental.pallas import tpu as pltpu


def _round_up(x, m):
    return (x + m - 1) // m * m


def _lstm_kernel(seq_len, needs_mask,
                 x_ref, w_ref, b_ref, u_ref,        # inputs
                 o_seq_ref, h_out_ref,              # outputs
                 gx_sc, h_sc, c_sc, o_sc):          # scratch
    tb = pl.program_id(1)                           # time-block index (sequential)
    n_tb = pl.num_programs(1)
    t_blk, b_blk, _ = x_ref.shape
    Hp = h_sc.shape[-1]                             # lane-padded hidden size

    @pl.when(tb == 0)
    def _():
        h_sc[...] = jnp.zeros_like(h_sc)
        c_sc[...] = jnp.zeros_like(c_sc)

    # Fused input projection for the whole time block: one big MXU matmul with
    # M = t_blk * b_blk, off the serial h-dependency path.  The (t, b) merge /
    # split reshapes are layout-free because b_blk is a multiple of 8.
    x2d = x_ref[...].reshape(t_blk * b_blk, x_ref.shape[-1])
    gx2d = jnp.dot(x2d, w_ref[...], preferred_element_type=jnp.float32)
    gx2d = gx2d + b_ref[...].astype(jnp.float32)    # bias broadcast (1, 4*Hp)
    gx_sc[...] = gx2d.reshape(t_blk, b_blk, 4 * Hp)

    def step(s, carry):
        gx = gx_sc[s]                               # (b_blk, 4*Hp), f32
        h = h_sc[...]
        c = c_sc[...]
        # Only the recurrent matmul sits on the serial path.
        gates = gx + jnp.dot(h.astype(u_ref.dtype), u_ref[...],
                             preferred_element_type=jnp.float32)

        # Gate packing order is (i, f, o, c): one contiguous sigmoid slab.
        sig = jax.nn.sigmoid(gates[:, :3 * Hp])
        i_t = sig[:, 0 * Hp:1 * Hp]
        f_t = sig[:, 1 * Hp:2 * Hp]
        o_t = sig[:, 2 * Hp:3 * Hp]
        g_t = jnp.tanh(gates[:, 3 * Hp:4 * Hp])

        c_new = f_t * c + i_t * g_t
        h_new = o_t * jnp.tanh(c_new)

        if needs_mask:                              # static Python branch
            valid = (tb * t_blk + s) < seq_len      # padded tail steps are no-ops
            c_new = jnp.where(valid, c_new, c)
            h_new = jnp.where(valid, h_new, h)

        c_sc[...] = c_new
        h_sc[...] = h_new
        o_sc[s] = o_t.astype(o_sc.dtype)            # lane-dense (b_blk, Hp) store
        return carry

    lax.fori_loop(0, t_blk, step, 0, unroll=True)

    # One (t, b) -> (b, t) transpose per block rides the otherwise-idle XLU and
    # folds into the block writeback DMA: no wrapper-side HBM transpose pass.
    o_seq_ref[...] = pltpu.einshape("tbh->bth", o_sc[...]).astype(o_seq_ref.dtype)

    @pl.when(tb == n_tb - 1)
    def _():
        h_out_ref[...] = h_sc[...].astype(h_out_ref.dtype)


def lstm_layer_pallas(x, Ws, Us, Bs, *, compute_dtype=None, num_batch_shards=None):
    """LSTM forward matching the PyTorch LstmLayer.

    x: (batch, seq, input).  Ws/Us/Bs: per-gate tuples in order (i, f, c, o)
    with shapes (input, H) / (H, H) / (H,).
    Returns (output_sq (batch, seq, H) — per-step o_t, h_t (batch, H)).
    """
    bs, seq, in_sz = x.shape
    H = Us[0].shape[0]
    H_pad = _round_up(H, 128)            # lane alignment for gate slices / stores
    bs_pad = _round_up(bs, 8)            # sublane alignment
    out_dtype = x.dtype
    cdt = jnp.dtype(compute_dtype) if compute_dtype is not None else jnp.dtype(x.dtype)

    def nbytes(dt):
        return jnp.dtype(dt).itemsize

    # --- Batch shards: only worth it on chips with >1 TensorCore (v7x / v5p).
    # On single-TC v5e/v6e a "parallel" axis is just a serial loop + overhead.
    if num_batch_shards is None:
        n_b = 1
        try:
            kind = str(getattr(jax.devices()[0], "device_kind", "")).lower()
            if any(tag in kind for tag in ("v7", "v5p", "v4")):
                n_b = 2
        except Exception:
            n_b = 1
    else:
        n_b = int(num_batch_shards)
    if n_b < 1 or bs_pad % (8 * n_b) != 0:
        n_b = 1
    b_blk = bs_pad // n_b

    # --- VMEM budget -> time-block size (amortizes ~0.35us/grid-step overhead).
    try:
        vmem_cap = int(pltpu.get_tpu_info().vmem_capacity_bytes)
    except Exception:
        vmem_cap = 64 * 1024 * 1024
    u_bytes = H_pad * 4 * H_pad * nbytes(cdt)
    single_buffer_u = u_bytes > (4 << 20)            # second buffer = pure waste
    fixed = (1 if single_buffer_u else 2) * u_bytes              # U buffers
    fixed += 2 * in_sz * 4 * H_pad * nbytes(cdt)                 # W buffers
    fixed += 2 * 4 * H_pad * 4                                   # bias buffers
    fixed += 2 * b_blk * H_pad * 4                               # h, c carries
    per_t = (2 * b_blk * in_sz * nbytes(cdt)                     # x block (x2 buffers)
             + b_blk * 4 * H_pad * 4                             # gx scratch (f32)
             + 3 * b_blk * H_pad * nbytes(out_dtype))            # o block (x2) + o scratch
    budget = int(0.4 * vmem_cap)
    t_cap = int(max(1, min(32, (budget - fixed) // max(per_t, 1))))
    if seq <= t_cap:
        t_blk, seq_pad = seq, seq                    # single block; block == full dim
    else:
        t_blk = max(8, (t_cap // 8) * 8)             # (8,128) rule on the output block
        seq_pad = _round_up(seq, t_blk)
    n_t = seq_pad // t_blk
    needs_mask = seq_pad != seq

    need = fixed + t_blk * per_t
    vmem_limit = max(2 * need + (8 << 20), 32 << 20)
    vmem_limit = int(min(vmem_limit, int(0.9 * vmem_cap)))

    # --- Pack gates along the last axis in order (i, f, o, c); pad H -> H_pad.
    # Padded h/gate columns provably stay 0 through the recurrence.
    W_i, W_f, W_c, W_o = Ws
    U_i, U_f, U_c, U_o = Us
    b_i, b_f, b_c, b_o = Bs

    def pack_cols(mats, rows, rows_pad, dtype):
        padded = [jnp.pad(m, ((0, rows_pad - rows), (0, H_pad - H))) for m in mats]
        return jnp.concatenate(padded, axis=-1).astype(dtype)

    W_pack = pack_cols((W_i, W_f, W_o, W_c), in_sz, in_sz, cdt)   # (in_sz, 4*H_pad)
    U_pack = pack_cols((U_i, U_f, U_o, U_c), H, H_pad, cdt)       # (H_pad, 4*H_pad)
    b_pack = jnp.concatenate(
        [jnp.pad(b, (0, H_pad - H)) for b in (b_i, b_f, b_o, b_c)]
    ).reshape(1, 4 * H_pad).astype(jnp.float32)

    # x: pad (batch, seq) and present time-major.  No gates tensor in HBM —
    # the x@W projection happens inside the kernel.
    x_p = x
    if bs_pad != bs or seq_pad != seq:
        x_p = jnp.pad(x, ((0, bs_pad - bs), (0, seq_pad - seq), (0, 0)))
    x_tm = jnp.transpose(x_p, (1, 0, 2)).astype(cdt)              # (seq_pad, bs_pad, in)

    if single_buffer_u:
        u_spec = pl.BlockSpec((H_pad, 4 * H_pad), lambda b, t: (0, 0),
                              pipeline_mode=pl.Buffered(1))
    else:
        u_spec = pl.BlockSpec((H_pad, 4 * H_pad), lambda b, t: (0, 0))

    kernel = functools.partial(_lstm_kernel, seq, needs_mask)

    o_seq, h_final = pl.pallas_call(
        kernel,
        out_shape=(
            jax.ShapeDtypeStruct((bs_pad, seq_pad, H_pad), out_dtype),
            jax.ShapeDtypeStruct((bs_pad, H_pad), out_dtype),
        ),
        grid_spec=pltpu.PrefetchScalarGridSpec(
            num_scalar_prefetch=0,
            grid=(n_b, n_t),                               # (batch shards, time blocks)
            in_specs=[
                pl.BlockSpec((t_blk, b_blk, in_sz), lambda b, t: (t, b, 0)),  # x
                pl.BlockSpec((in_sz, 4 * H_pad), lambda b, t: (0, 0)),        # W
                pl.BlockSpec((1, 4 * H_pad), lambda b, t: (0, 0)),            # bias
                u_spec,                                                       # U
            ],
            out_specs=(
                pl.BlockSpec((b_blk, t_blk, H_pad), lambda b, t: (b, t, 0)),  # o_t seq
                pl.BlockSpec((b_blk, H_pad), lambda b, t: (b, 0)),            # final h
            ),
            scratch_shapes=[
                pltpu.VMEM((t_blk, b_blk, 4 * H_pad), jnp.float32),  # fused x@W gates
                pltpu.VMEM((b_blk, H_pad), jnp.float32),             # h carry
                pltpu.VMEM((b_blk, H_pad), jnp.float32),             # c carry
                pltpu.VMEM((t_blk, b_blk, H_pad), out_dtype),        # o_t block buffer
            ],
        ),
        compiler_params=pltpu.CompilerParams(
            dimension_semantics=("parallel", "arbitrary"),
            vmem_limit_bytes=vmem_limit,
        ),
    )(x_tm, W_pack, b_pack, U_pack)

    output_sq = o_seq[:bs, :seq, :H]
    h_t = h_final[:bs, :H]
    return output_sq, h_t


def lstm_layer_ref(x, Ws, Us, Bs):
    """Pure-JAX reference mirroring the PyTorch loop exactly."""
    bs, seq, _ = x.shape
    H = Us[0].shape[0]
    W_i, W_f, W_c, W_o = Ws
    U_i, U_f, U_c, U_o = Us
    b_i, b_f, b_c, b_o = Bs
    h = jnp.zeros((bs, H), x.dtype)
    c = jnp.zeros((bs, H), x.dtype)

    def step(carry, x_t):
        h, c = carry
        i_t = jax.nn.sigmoid(x_t @ W_i + h @ U_i + b_i)
        f_t = jax.nn.sigmoid(x_t @ W_f + h @ U_f + b_f)
        g_t = jnp.tanh(x_t @ W_c + h @ U_c + b_c)
        c_new = f_t * c + i_t * g_t
        o_t = jax.nn.sigmoid(x_t @ W_o + h @ U_o + b_o)
        h_new = o_t * jnp.tanh(c_new)
        return (h_new, c_new), o_t

    (h, c), o_seq = lax.scan(step, (h, c), jnp.transpose(x, (1, 0, 2)))
    return jnp.transpose(o_seq, (1, 0, 2)), h


if __name__ == "__main__":
    batch, seq, input_sz, hidden_sz = 8, 8, 16, 32
    key = jax.random.PRNGKey(0)
    keys = jax.random.split(key, 13)

    stdv = 1.0 / math.sqrt(hidden_sz)

    def uni(k, shape):
        return jax.random.uniform(k, shape, minval=-stdv, maxval=stdv,
                                  dtype=jnp.float32)

    # Per-gate parameters in order (i, f, c, o), mirroring the PyTorch module.
    Ws = tuple(uni(keys[i], (input_sz, hidden_sz)) for i in range(4))
    Us = tuple(uni(keys[4 + i], (hidden_sz, hidden_sz)) for i in range(4))
    Bs = tuple(uni(keys[8 + i], (hidden_sz,)) for i in range(4))
    x = jax.random.normal(keys[12], (batch, seq, input_sz), dtype=jnp.float32)

    run = jax.jit(lstm_layer_pallas)
    out_sq, h_t = run(x, Ws, Us, Bs)
    jax.block_until_ready((out_sq, h_t))

    ref_out, ref_h = lstm_layer_ref(x, Ws, Us, Bs)
    assert out_sq.shape == (batch, seq, hidden_sz)
    assert h_t.shape == (batch, hidden_sz)
    assert jnp.allclose(out_sq, ref_out, atol=1e-5, rtol=1e-5)
    assert jnp.allclose(h_t, ref_h, atol=1e-5, rtol=1e-5)

    print("KERNEL_OK")
</pallas_src>

<mosaic_0001>
module attributes {stable_mosaic.version = 11 : i64} {
  func.func @_lstm_kernel(%arg0: i32, %arg1: i32, %arg2: memref<8x8x16xf32, #tpu.memory_space<vmem>>, %arg3: memref<16x512xf32, #tpu.memory_space<vmem>>, %arg4: memref<1x512xf32, #tpu.memory_space<vmem>>, %arg5: memref<128x512xf32, #tpu.memory_space<vmem>>, %arg6: memref<8x8x128xf32, #tpu.memory_space<vmem>>, %arg7: memref<8x128xf32, #tpu.memory_space<vmem>>, %arg8: memref<8x8x512xf32, #tpu.memory_space<vmem>>, %arg9: memref<8x128xf32, #tpu.memory_space<vmem>>, %arg10: memref<8x128xf32, #tpu.memory_space<vmem>>, %arg11: memref<8x8x128xf32, #tpu.memory_space<vmem>>) attributes {dimension_semantics = [#tpu.dimension_semantics<parallel>, #tpu.dimension_semantics<arbitrary>], iteration_bounds = array<i64: 1, 1>, scalar_prefetch = 0 : i64, scratch_operands = 4 : i64, tpu.core_type = #tpu.core_type<tc>, window_params = [{transform_indices = @transform_0, window_bounds = array<i64: 8, 8, 16>}, {pipeline_mode = #tpu.pipeline_mode<synchronous>, transform_indices = @transform_1, window_bounds = array<i64: 16, 512>}, {pipeline_mode = #tpu.pipeline_mode<synchronous>, transform_indices = @transform_2, window_bounds = array<i64: 1, 512>}, {pipeline_mode = #tpu.pipeline_mode<synchronous>, transform_indices = @transform_3, window_bounds = array<i64: 128, 512>}, {transform_indices = @transform_4, window_bounds = array<i64: 8, 8, 128>}, {transform_indices = @transform_5, window_bounds = array<i64: 8, 128>}]} {
    %c0_i32 = arith.constant 0 : i32
    %0 = arith.cmpi eq, %arg1, %c0_i32 : i32
    %1 = arith.extui %0 : i1 to i32
    %c0_i32_0 = arith.constant 0 : i32
    %2 = arith.cmpi ne, %1, %c0_i32_0 : i32
    scf.if %2 {
      %cst_147 = arith.constant 0.000000e+00 : f32
      %258 = vector.broadcast %cst_147 : f32 to vector<8x128xf32>
      %c0_148 = arith.constant 0 : index
      %c0_149 = arith.constant 0 : index
      %259 = vector.load %arg9[%c0_148, %c0_149] : memref<8x128xf32, #tpu.memory_space<vmem>>, vector<8x128xf32>
      tpu.vector_store %arg9[%c0_148, %c0_149], %258 {strides = array<i32>} : memref<8x128xf32, #tpu.memory_space<vmem>>, vector<8x128xf32>,
      %cst_150 = arith.constant 0.000000e+00 : f32
      %260 = vector.broadcast %cst_150 : f32 to vector<8x128xf32>
      %c0_151 = arith.constant 0 : index
      %c0_152 = arith.constant 0 : index
      %261 = vector.load %arg10[%c0_151, %c0_152] : memref<8x128xf32, #tpu.memory_space<vmem>>, vector<8x128xf32>
      tpu.vector_store %arg10[%c0_151, %c0_152], %260 {strides = array<i32>} : memref<8x128xf32, #tpu.memory_space<vmem>>, vector<8x128xf32>,
    } else {
    }
    %c0 = arith.constant 0 : index
    %c0_1 = arith.constant 0 : index
    %c0_2 = arith.constant 0 : index
    %3 = vector.load %arg2[%c0, %c0_1, %c0_2] : memref<8x8x16xf32, #tpu.memory_space<vmem>>, vector<8x8x16xf32>
    %4 = vector.shape_cast %3 : vector<8x8x16xf32> to vector<64x16xf32>
    %c0_3 = arith.constant 0 : index
    %c0_4 = arith.constant 0 : index
    %5 = vector.load %arg3[%c0_3, %c0_4] : memref<16x512xf32, #tpu.memory_space<vmem>>, vector<16x512xf32>
    %cst = arith.constant dense<0.000000e+00> : vector<64x512xf32>
    %6 = tpu.matmul %4, %5, %cst {dimension_numbers = #tpu.dot_dimension_numbers<[1], [0], [0], [1], [0, 0, 1, 1], [], []>} : vector<64x16xf32>, vector<16x512xf32>, vector<64x512xf32> -> vector<64x512xf32>
    %c0_5 = arith.constant 0 : index
    %c0_6 = arith.constant 0 : index
    %7 = vector.load %arg4[%c0_5, %c0_6] : memref<1x512xf32, #tpu.memory_space<vmem>>, vector<1x512xf32>
    %8 = vector.broadcast %7 : vector<1x512xf32> to vector<64x512xf32>
    %9 = arith.addf %6, %8 : vector<64x512xf32>
    %10 = vector.shape_cast %9 : vector<64x512xf32> to vector<8x8x512xf32>
    %c0_7 = arith.constant 0 : index
    %c0_8 = arith.constant 0 : index
    %c0_9 = arith.constant 0 : index
    %11 = vector.load %arg8[%c0_7, %c0_8, %c0_9] : memref<8x8x512xf32, #tpu.memory_space<vmem>>, vector<8x8x512xf32>
    tpu.vector_store %arg8[%c0_7, %c0_8, %c0_9], %10 {strides = array<i32>} : memref<8x8x512xf32, #tpu.memory_space<vmem>>, vector<8x8x512xf32>,
    %c0_i32_10 = arith.constant 0 : i32
    %12 = arith.index_cast %c0_i32_10 : i32 to index
    %c0_11 = arith.constant 0 : index
    %c0_12 = arith.constant 0 : index
    %13 = vector.load %arg8[%12, %c0_11, %c0_12] : memref<8x8x512xf32, #tpu.memory_space<vmem>>, vector<1x8x512xf32>
    %14 = vector.shape_cast %13 : vector<1x8x512xf32> to vector<8x512xf32>
    %c0_13 = arith.constant 0 : index
    %c0_14 = arith.constant 0 : index
    %15 = vector.load %arg9[%c0_13, %c0_14] : memref<8x128xf32, #tpu.memory_space<vmem>>, vector<8x128xf32>
    %c0_15 = arith.constant 0 : index
    %c0_16 = arith.constant 0 : index
    %16 = vector.load %arg10[%c0_15, %c0_16] : memref<8x128xf32, #tpu.memory_space<vmem>>, vector<8x128xf32>
    %c0_17 = arith.constant 0 : index
    %c0_18 = arith.constant 0 : index
    %17 = vector.load %arg5[%c0_17, %c0_18] : memref<128x512xf32, #tpu.memory_space<vmem>>, vector<128x512xf32>
    %cst_19 = arith.constant dense<0.000000e+00> : vector<8x512xf32>
    %18 = tpu.matmul %15, %17, %cst_19 {dimension_numbers = #tpu.dot_dimension_numbers<[1], [0], [0], [1], [0, 0, 1, 1], [], []>} : vector<8x128xf32>, vector<128x512xf32>, vector<8x512xf32> -> vector<8x512xf32>
    %19 = arith.addf %14, %18 : vector<8x512xf32>
    %20 = vector.extract_strided_slice %19 {offsets = [0, 0], sizes = [8, 384], strides = [1, 1]} : vector<8x512xf32> to vector<8x384xf32>
    %21 = arith.negf %20 : vector<8x384xf32>
    %22 = math.exp %21 : vector<8x384xf32>
    %cst_20 = arith.constant 1.000000e+00 : f32
    %23 = vector.broadcast %cst_20 : f32 to vector<8x384xf32>
    %24 = arith.addf %23, %22 : vector<8x384xf32>
    %25 = arith.divf %23, %24 : vector<8x384xf32>
    %26 = vector.extract_strided_slice %25 {offsets = [0, 0], sizes = [8, 128], strides = [1, 1]} : vector<8x384xf32> to vector<8x128xf32>
    %27 = vector.extract_strided_slice %25 {offsets = [0, 128], sizes = [8, 128], strides = [1, 1]} : vector<8x384xf32> to vector<8x128xf32>
    %28 = vector.extract_strided_slice %25 {offsets = [0, 256], sizes = [8, 128], strides = [1, 1]} : vector<8x384xf32> to vector<8x128xf32>
    %29 = vector.extract_strided_slice %19 {offsets = [0, 384], sizes = [8, 128], strides = [1, 1]} : vector<8x512xf32> to vector<8x128xf32>
    %30 = math.tanh %29 : vector<8x128xf32>
    %31 = arith.mulf %27, %16 : vector<8x128xf32>
    %32 = arith.mulf %26, %30 : vector<8x128xf32>
    %33 = arith.addf %31, %32 : vector<8x128xf32>
    %34 = math.tanh %33 : vector<8x128xf32>
    %35 = arith.mulf %28, %34 : vector<8x128xf32>
    %c0_21 = arith.constant 0 : index
    %c0_22 = arith.constant 0 : index
    %36 = vector.load %arg10[%c0_21, %c0_22] : memref<8x128xf32, #tpu.memory_space<vmem>>, vector<8x128xf32>
    tpu.vector_store %arg10[%c0_21, %c0_22], %33 {strides = array<i32>} : memref<8x128xf32, #tpu.memory_space<vmem>>, vector<8x128xf32>,
    %c0_23 = arith.constant 0 : index
    %c0_24 = arith.constant 0 : index
    %37 = vector.load %arg9[%c0_23, %c0_24] : memref<8x128xf32, #tpu.memory_space<vmem>>, vector<8x128xf32>
    tpu.vector_store %arg9[%c0_23, %c0_24], %35 {strides = array<i32>} : memref<8x128xf32, #tpu.memory_space<vmem>>, vector<8x128xf32>,
    %38 = arith.index_cast %c0_i32_10 : i32 to index
    %c0_25 = arith.constant 0 : index
    %c0_26 = arith.constant 0 : index
    %39 = vector.load %arg11[%38, %c0_25, %c0_26] : memref<8x8x128xf32, #tpu.memory_space<vmem>>, vector<1x8x128xf32>
    %40 = vector.shape_cast %39 : vector<1x8x128xf32> to vector<8x128xf32>
    %41 = vector.shape_cast %28 : vector<8x128xf32> to vector<1x8x128xf32>
    tpu.vector_store %arg11[%38, %c0_25, %c0_26], %41 {strides = array<i32>} : memref<8x8x128xf32, #tpu.memory_space<vmem>>, vector<1x8x128xf32>,
    %c1_i32 = arith.constant 1 : i32
    %42 = arith.index_cast %c1_i32 : i32 to index
    %c0_27 = arith.constant 0 : index
    %c0_28 = arith.constant 0 : index
    %43 = vector.load %arg8[%42, %c0_27, %c0_28] : memref<8x8x512xf32, #tpu.memory_space<vmem>>, vector<1x8x512xf32>
    %44 = vector.shape_cast %43 : vector<1x8x512xf32> to vector<8x512xf32>
    %c0_29 = arith.constant 0 : index
    %c0_30 = arith.constant 0 : index
    %45 = vector.load %arg9[%c0_29, %c0_30] : memref<8x128xf32, #tpu.memory_space<vmem>>, vector<8x128xf32>
    %c0_31 = arith.constant 0 : index
    %c0_32 = arith.constant 0 : index
    %46 = vector.load %arg10[%c0_31, %c0_32] : memref<8x128xf32, #tpu.memory_space<vmem>>, vector<8x128xf32>
    %c0_33 = arith.constant 0 : index
    %c0_34 = arith.constant 0 : index
    %47 = vector.load %arg5[%c0_33, %c0_34] : memref<128x512xf32, #tpu.memory_space<vmem>>, vector<128x512xf32>
    %cst_35 = arith.constant dense<0.000000e+00> : vector<8x512xf32>
    %48 = tpu.matmul %45, %47, %cst_35 {dimension_numbers = #tpu.dot_dimension_numbers<[1], [0], [0], [1], [0, 0, 1, 1], [], []>} : vector<8x128xf32>, vector<128x512xf32>, vector<8x512xf32> -> vector<8x512xf32>
    %49 = arith.addf %44, %48 : vector<8x512xf32>
    %50 = vector.extract_strided_slice %49 {offsets = [0, 0], sizes = [8, 384], strides = [1, 1]} : vector<8x512xf32> to vector<8x384xf32>
    %51 = arith.negf %50 : vector<8x384xf32>
    %52 = math.exp %51 : vector<8x384xf32>
    %cst_36 = arith.constant 1.000000e+00 : f32
    %53 = vector.broadcast %cst_36 : f32 to vector<8x384xf32>
    %54 = arith.addf %53, %52 : vector<8x384xf32>
    %55 = arith.divf %53, %54 : vector<8x384xf32>
    %56 = vector.extract_strided_slice %55 {offsets = [0, 0], sizes = [8, 128], strides = [1, 1]} : vector<8x384xf32> to vector<8x128xf32>
    %57 = vector.extract_strided_slice %55 {offsets = [0, 128], sizes = [8, 128], strides = [1, 1]} : vector<8x384xf32> to vector<8x128xf32>
    %58 = vector.extract_strided_slice %55 {offsets = [0, 256], sizes = [8, 128], strides = [1, 1]} : vector<8x384xf32> to vector<8x128xf32>
    %59 = vector.extract_strided_slice %49 {offsets = [0, 384], sizes = [8, 128], strides = [1, 1]} : vector<8x512xf32> to vector<8x128xf32>
    %60 = math.tanh %59 : vector<8x128xf32>
    %61 = arith.mulf %57, %46 : vector<8x128xf32>
    %62 = arith.mulf %56, %60 : vector<8x128xf32>
    %63 = arith.addf %61, %62 : vector<8x128xf32>
    %64 = math.tanh %63 : vector<8x128xf32>
    %65 = arith.mulf %58, %64 : vector<8x128xf32>
    %c0_37 = arith.constant 0 : index
    %c0_38 = arith.constant 0 : index
    %66 = vector.load %arg10[%c0_37, %c0_38] : memref<8x128xf32, #tpu.memory_space<vmem>>, vector<8x128xf32>
    tpu.vector_store %arg10[%c0_37, %c0_38], %63 {strides = array<i32>} : memref<8x128xf32, #tpu.memory_space<vmem>>, vector<8x128xf32>,
    %c0_39 = arith.constant 0 : index
    %c0_40 = arith.constant 0 : index
    %67 = vector.load %arg9[%c0_39, %c0_40] : memref<8x128xf32, #tpu.memory_space<vmem>>, vector<8x128xf32>
    tpu.vector_store %arg9[%c0_39, %c0_40], %65 {strides = array<i32>} : memref<8x128xf32, #tpu.memory_space<vmem>>, vector<8x128xf32>,
    %68 = arith.index_cast %c1_i32 : i32 to index
    %c0_41 = arith.constant 0 : index
    %c0_42 = arith.constant 0 : index
    %69 = vector.load %arg11[%68, %c0_41, %c0_42] : memref<8x8x128xf32, #tpu.memory_space<vmem>>, vector<1x8x128xf32>
    %70 = vector.shape_cast %69 : vector<1x8x128xf32> to vector<8x128xf32>
    %71 = vector.shape_cast %58 : vector<8x128xf32> to vector<1x8x128xf32>
    tpu.vector_store %arg11[%68, %c0_41, %c0_42], %71 {strides = array<i32>} : memref<8x8x128xf32, #tpu.memory_space<vmem>>, vector<1x8x128xf32>,
    %c2_i32 = arith.constant 2 : i32
    %72 = arith.index_cast %c2_i32 : i32 to index
    %c0_43 = arith.constant 0 : index
    %c0_44 = arith.constant 0 : index
    %73 = vector.load %arg8[%72, %c0_43, %c0_44] : memref<8x8x512xf32, #tpu.memory_space<vmem>>, vector<1x8x512xf32>
    %74 = vector.shape_cast %73 : vector<1x8x512xf32> to vector<8x512xf32>
    %c0_45 = arith.constant 0 : index
    %c0_46 = arith.constant 0 : index
    %75 = vector.load %arg9[%c0_45, %c0_46] : memref<8x128xf32, #tpu.memory_space<vmem>>, vector<8x128xf32>
    %c0_47 = arith.constant 0 : index
    %c0_48 = arith.constant 0 : index
    %76 = vector.load %arg10[%c0_47, %c0_48] : memref<8x128xf32, #tpu.memory_space<vmem>>, vector<8x128xf32>
    %c0_49 = arith.constant 0 : index
    %c0_50 = arith.constant 0 : index
    %77 = vector.load %arg5[%c0_49, %c0_50] : memref<128x512xf32, #tpu.memory_space<vmem>>, vector<128x512xf32>
    %cst_51 = arith.constant dense<0.000000e+00> : vector<8x512xf32>
    %78 = tpu.matmul %75, %77, %cst_51 {dimension_numbers = #tpu.dot_dimension_numbers<[1], [0], [0], [1], [0, 0, 1, 1], [], []>} : vector<8x128xf32>, vector<128x512xf32>, vector<8x512xf32> -> vector<8x512xf32>
    %79 = arith.addf %74, %78 : vector<8x512xf32>
    %80 = vector.extract_strided_slice %79 {offsets = [0, 0], sizes = [8, 384], strides = [1, 1]} : vector<8x512xf32> to vector<8x384xf32>
    %81 = arith.negf %80 : vector<8x384xf32>
    %82 = math.exp %81 : vector<8x384xf32>
    %cst_52 = arith.constant 1.000000e+00 : f32
    %83 = vector.broadcast %cst_52 : f32 to vector<8x384xf32>
    %84 = arith.addf %83, %82 : vector<8x384xf32>
    %85 = arith.divf %83, %84 : vector<8x384xf32>
    %86 = vector.extract_strided_slice %85 {offsets = [0, 0], sizes = [8, 128], strides = [1, 1]} : vector<8x384xf32> to vector<8x128xf32>
    %87 = vector.extract_strided_slice %85 {offsets = [0, 128], sizes = [8, 128], strides = [1, 1]} : vector<8x384xf32> to vector<8x128xf32>
    %88 = vector.extract_strided_slice %85 {offsets = [0, 256], sizes = [8, 128], strides = [1, 1]} : vector<8x384xf32> to vector<8x128xf32>
    %89 = vector.extract_strided_slice %79 {offsets = [0, 384], sizes = [8, 128], strides = [1, 1]} : vector<8x512xf32> to vector<8x128xf32>
    %90 = math.tanh %89 : vector<8x128xf32>
    %91 = arith.mulf %87, %76 : vector<8x128xf32>
    %92 = arith.mulf %86, %90 : vector<8x128xf32>
    %93 = arith.addf %91, %92 : vector<8x128xf32>
    %94 = math.tanh %93 : vector<8x128xf32>
    %95 = arith.mulf %88, %94 : vector<8x128xf32>
    %c0_53 = arith.constant 0 : index
    %c0_54 = arith.constant 0 : index
    %96 = vector.load %arg10[%c0_53, %c0_54] : memref<8x128xf32, #tpu.memory_space<vmem>>, vector<8x128xf32>
    tpu.vector_store %arg10[%c0_53, %c0_54], %93 {strides = array<i32>} : memref<8x128xf32, #tpu.memory_space<vmem>>, vector<8x128xf32>,
    %c0_55 = arith.constant 0 : index
    %c0_56 = arith.constant 0 : index
    %97 = vector.load %arg9[%c0_55, %c0_56] : memref<8x128xf32, #tpu.memory_space<vmem>>, vector<8x128xf32>
    tpu.vector_store %arg9[%c0_55, %c0_56], %95 {strides = array<i32>} : memref<8x128xf32, #tpu.memory_space<vmem>>, vector<8x128xf32>,
    %98 = arith.index_cast %c2_i32 : i32 to index
    %c0_57 = arith.constant 0 : index
    %c0_58 = arith.constant 0 : index
    %99 = vector.load %arg11[%98, %c0_57, %c0_58] : memref<8x8x128xf32, #tpu.memory_space<vmem>>, vector<1x8x128xf32>
    %100 = vector.shape_cast %99 : vector<1x8x128xf32> to vector<8x128xf32>
    %101 = vector.shape_cast %88 : vector<8x128xf32> to vector<1x8x128xf32>
    tpu.vector_store %arg11[%98, %c0_57, %c0_58], %101 {strides = array<i32>} : memref<8x8x128xf32, #tpu.memory_space<vmem>>, vector<1x8x128xf32>,
    %c3_i32 = arith.constant 3 : i32
    %102 = arith.index_cast %c3_i32 : i32 to index
    %c0_59 = arith.constant 0 : index
    %c0_60 = arith.constant 0 : index
    %103 = vector.load %arg8[%102, %c0_59, %c0_60] : memref<8x8x512xf32, #tpu.memory_space<vmem>>, vector<1x8x512xf32>
    %104 = vector.shape_cast %103 : vector<1x8x512xf32> to vector<8x512xf32>
    %c0_61 = arith.constant 0 : index
    %c0_62 = arith.constant 0 : index
    %105 = vector.load %arg9[%c0_61, %c0_62] : memref<8x128xf32, #tpu.memory_space<vmem>>, vector<8x128xf32>
    %c0_63 = arith.constant 0 : index
    %c0_64 = arith.constant 0 : index
    %106 = vector.load %arg10[%c0_63, %c0_64] : memref<8x128xf32, #tpu.memory_space<vmem>>, vector<8x128xf32>
    %c0_65 = arith.constant 0 : index
    %c0_66 = arith.constant 0 : index
    %107 = vector.load %arg5[%c0_65, %c0_66] : memref<128x512xf32, #tpu.memory_space<vmem>>, vector<128x512xf32>
    %cst_67 = arith.constant dense<0.000000e+00> : vector<8x512xf32>
    %108 = tpu.matmul %105, %107, %cst_67 {dimension_numbers = #tpu.dot_dimension_numbers<[1], [0], [0], [1], [0, 0, 1, 1], [], []>} : vector<8x128xf32>, vector<128x512xf32>, vector<8x512xf32> -> vector<8x512xf32>
    %109 = arith.addf %104, %108 : vector<8x512xf32>
    %110 = vector.extract_strided_slice %109 {offsets = [0, 0], sizes = [8, 384], strides = [1, 1]} : vector<8x512xf32> to vector<8x384xf32>
    %111 = arith.negf %110 : vector<8x384xf32>
    %112 = math.exp %111 : vector<8x384xf32>
    %cst_68 = arith.constant 1.000000e+00 : f32
    %113 = vector.broadcast %cst_68 : f32 to vector<8x384xf32>
    %114 = arith.addf %113, %112 : vector<8x384xf32>
    %115 = arith.divf %113, %114 : vector<8x384xf32>
    %116 = vector.extract_strided_slice %115 {offsets = [0, 0], sizes = [8, 128], strides = [1, 1]} : vector<8x384xf32> to vector<8x128xf32>
    %117 = vector.extract_strided_slice %115 {offsets = [0, 128], sizes = [8, 128], strides = [1, 1]} : vector<8x384xf32> to vector<8x128xf32>
    %118 = vector.extract_strided_slice %115 {offsets = [0, 256], sizes = [8, 128], strides = [1, 1]} : vector<8x384xf32> to vector<8x128xf32>
    %119 = vector.extract_strided_slice %109 {offsets = [0, 384], sizes = [8, 128], strides = [1, 1]} : vector<8x512xf32> to vector<8x128xf32>
    %120 = math.tanh %119 : vector<8x128xf32>
    %121 = arith.mulf %117, %106 : vector<8x128xf32>
    %122 = arith.mulf %116, %120 : vector<8x128xf32>
    %123 = arith.addf %121, %122 : vector<8x128xf32>
    %124 = math.tanh %123 : vector<8x128xf32>
    %125 = arith.mulf %118, %124 : vector<8x128xf32>
    %c0_69 = arith.constant 0 : index
    %c0_70 = arith.constant 0 : index
    %126 = vector.load %arg10[%c0_69, %c0_70] : memref<8x128xf32, #tpu.memory_space<vmem>>, vector<8x128xf32>
    tpu.vector_store %arg10[%c0_69, %c0_70], %123 {strides = array<i32>} : memref<8x128xf32, #tpu.memory_space<vmem>>, vector<8x128xf32>,
    %c0_71 = arith.constant 0 : index
    %c0_72 = arith.constant 0 : index
    %127 = vector.load %arg9[%c0_71, %c0_72] : memref<8x128xf32, #tpu.memory_space<vmem>>, vector<8x128xf32>
    tpu.vector_store %arg9[%c0_71, %c0_72], %125 {strides = array<i32>} : memref<8x128xf32, #tpu.memory_space<vmem>>, vector<8x128xf32>,
    %128 = arith.index_cast %c3_i32 : i32 to index
    %c0_73 = arith.constant 0 : index
    %c0_74 = arith.constant 0 : index
    %129 = vector.load %arg11[%128, %c0_73, %c0_74] : memref<8x8x128xf32, #tpu.memory_space<vmem>>, vector<1x8x128xf32>
    %130 = vector.shape_cast %129 : vector<1x8x128xf32> to vector<8x128xf32>
    %131 = vector.shape_cast %118 : vector<8x128xf32> to vector<1x8x128xf32>
    tpu.vector_store %arg11[%128, %c0_73, %c0_74], %131 {strides = array<i32>} : memref<8x8x128xf32, #tpu.memory_space<vmem>>, vector<1x8x128xf32>,
    %c4_i32 = arith.constant 4 : i32
    %132 = arith.index_cast %c4_i32 : i32 to index
    %c0_75 = arith.constant 0 : index
    %c0_76 = arith.constant 0 : index
    %133 = vector.load %arg8[%132, %c0_75, %c0_76] : memref<8x8x512xf32, #tpu.memory_space<vmem>>, vector<1x8x512xf32>
    %134 = vector.shape_cast %133 : vector<1x8x512xf32> to vector<8x512xf32>
    %c0_77 = arith.constant 0 : index
    %c0_78 = arith.constant 0 : index
    %135 = vector.load %arg9[%c0_77, %c0_78] : memref<8x128xf32, #tpu.memory_space<vmem>>, vector<8x128xf32>
    %c0_79 = arith.constant 0 : index
    %c0_80 = arith.constant 0 : index
    %136 = vector.load %arg10[%c0_79, %c0_80] : memref<8x128xf32, #tpu.memory_space<vmem>>, vector<8x128xf32>
    %c0_81 = arith.constant 0 : index
    %c0_82 = arith.constant 0 : index
    %137 = vector.load %arg5[%c0_81, %c0_82] : memref<128x512xf32, #tpu.memory_space<vmem>>, vector<128x512xf32>
    %cst_83 = arith.constant dense<0.000000e+00> : vector<8x512xf32>
    %138 = tpu.matmul %135, %137, %cst_83 {dimension_numbers = #tpu.dot_dimension_numbers<[1], [0], [0], [1], [0, 0, 1, 1], [], []>} : vector<8x128xf32>, vector<128x512xf32>, vector<8x512xf32> -> vector<8x512xf32>
    %139 = arith.addf %134, %138 : vector<8x512xf32>
    %140 = vector.extract_strided_slice %139 {offsets = [0, 0], sizes = [8, 384], strides = [1, 1]} : vector<8x512xf32> to vector<8x384xf32>
    %141 = arith.negf %140 : vector<8x384xf32>
    %142 = math.exp %141 : vector<8x384xf32>
    %cst_84 = arith.constant 1.000000e+00 : f32
    %143 = vector.broadcast %cst_84 : f32 to vector<8x384xf32>
    %144 = arith.addf %143, %142 : vector<8x384xf32>
    %145 = arith.divf %143, %144 : vector<8x384xf32>
    %146 = vector.extract_strided_slice %145 {offsets = [0, 0], sizes = [8, 128], strides = [1, 1]} : vector<8x384xf32> to vector<8x128xf32>
    %147 = vector.extract_strided_slice %145 {offsets = [0, 128], sizes = [8, 128], strides = [1, 1]} : vector<8x384xf32> to vector<8x128xf32>
    %148 = vector.extract_strided_slice %145 {offsets = [0, 256], sizes = [8, 128], strides = [1, 1]} : vector<8x384xf32> to vector<8x128xf32>
    %149 = vector.extract_strided_slice %139 {offsets = [0, 384], sizes = [8, 128], strides = [1, 1]} : vector<8x512xf32> to vector<8x128xf32>
    %150 = math.tanh %149 : vector<8x128xf32>
    %151 = arith.mulf %147, %136 : vector<8x128xf32>
    %152 = arith.mulf %146, %150 : vector<8x128xf32>
    %153 = arith.addf %151, %152 : vector<8x128xf32>
    %154 = math.tanh %153 : vector<8x128xf32>
    %155 = arith.mulf %148, %154 : vector<8x128xf32>
    %c0_85 = arith.constant 0 : index
    %c0_86 = arith.constant 0 : index
    %156 = vector.load %arg10[%c0_85, %c0_86] : memref<8x128xf32, #tpu.memory_space<vmem>>, vector<8x128xf32>
    tpu.vector_store %arg10[%c0_85, %c0_86], %153 {strides = array<i32>} : memref<8x128xf32, #tpu.memory_space<vmem>>, vector<8x128xf32>,
    %c0_87 = arith.constant 0 : index
    %c0_88 = arith.constant 0 : index
    %157 = vector.load %arg9[%c0_87, %c0_88] : memref<8x128xf32, #tpu.memory_space<vmem>>, vector<8x128xf32>
    tpu.vector_store %arg9[%c0_87, %c0_88], %155 {strides = array<i32>} : memref<8x128xf32, #tpu.memory_space<vmem>>, vector<8x128xf32>,
    %158 = arith.index_cast %c4_i32 : i32 to index
    %c0_89 = arith.constant 0 : index
    %c0_90 = arith.constant 0 : index
    %159 = vector.load %arg11[%158, %c0_89, %c0_90] : memref<8x8x128xf32, #tpu.memory_space<vmem>>, vector<1x8x128xf32>
    %160 = vector.shape_cast %159 : vector<1x8x128xf32> to vector<8x128xf32>
    %161 = vector.shape_cast %148 : vector<8x128xf32> to vector<1x8x128xf32>
    tpu.vector_store %arg11[%158, %c0_89, %c0_90], %161 {strides = array<i32>} : memref<8x8x128xf32, #tpu.memory_space<vmem>>, vector<1x8x128xf32>,
    %c5_i32 = arith.constant 5 : i32
    %162 = arith.index_cast %c5_i32 : i32 to index
    %c0_91 = arith.constant 0 : index
    %c0_92 = arith.constant 0 : index
    %163 = vector.load %arg8[%162, %c0_91, %c0_92] : memref<8x8x512xf32, #tpu.memory_space<vmem>>, vector<1x8x512xf32>
    %164 = vector.shape_cast %163 : vector<1x8x512xf32> to vector<8x512xf32>
    %c0_93 = arith.constant 0 : index
    %c0_94 = arith.constant 0 : index
    %165 = vector.load %arg9[%c0_93, %c0_94] : memref<8x128xf32, #tpu.memory_space<vmem>>, vector<8x128xf32>
    %c0_95 = arith.constant 0 : index
    %c0_96 = arith.constant 0 : index
    %166 = vector.load %arg10[%c0_95, %c0_96] : memref<8x128xf32, #tpu.memory_space<vmem>>, vector<8x128xf32>
    %c0_97 = arith.constant 0 : index
    %c0_98 = arith.constant 0 : index
    %167 = vector.load %arg5[%c0_97, %c0_98] : memref<128x512xf32, #tpu.memory_space<vmem>>, vector<128x512xf32>
    %cst_99 = arith.constant dense<0.000000e+00> : vector<8x512xf32>
    %168 = tpu.matmul %165, %167, %cst_99 {dimension_numbers = #tpu.dot_dimension_numbers<[1], [0], [0], [1], [0, 0, 1, 1], [], []>} : vector<8x128xf32>, vector<128x512xf32>, vector<8x512xf32> -> vector<8x512xf32>
    %169 = arith.addf %164, %168 : vector<8x512xf32>
    %170 = vector.extract_strided_slice %169 {offsets = [0, 0], sizes = [8, 384], strides = [1, 1]} : vector<8x512xf32> to vector<8x384xf32>
    %171 = arith.negf %170 : vector<8x384xf32>
    %172 = math.exp %171 : vector<8x384xf32>
    %cst_100 = arith.constant 1.000000e+00 : f32
    %173 = vector.broadcast %cst_100 : f32 to vector<8x384xf32>
    %174 = arith.addf %173, %172 : vector<8x384xf32>
    %175 = arith.divf %173, %174 : vector<8x384xf32>
    %176 = vector.extract_strided_slice %175 {offsets = [0, 0], sizes = [8, 128], strides = [1, 1]} : vector<8x384xf32> to vector<8x128xf32>
    %177 = vector.extract_strided_slice %175 {offsets = [0, 128], sizes = [8, 128], strides = [1, 1]} : vector<8x384xf32> to vector<8x128xf32>
    %178 = vector.extract_strided_slice %175 {offsets = [0, 256], sizes = [8, 128], strides = [1, 1]} : vector<8x384xf32> to vector<8x128xf32>
    %179 = vector.extract_strided_slice %169 {offsets = [0, 384], sizes = [8, 128], strides = [1, 1]} : vector<8x512xf32> to vector<8x128xf32>
    %180 = math.tanh %179 : vector<8x128xf32>
    %181 = arith.mulf %177, %166 : vector<8x128xf32>
    %182 = arith.mulf %176, %180 : vector<8x128xf32>
    %183 = arith.addf %181, %182 : vector<8x128xf32>
    %184 = math.tanh %183 : vector<8x128xf32>
    %185 = arith.mulf %178, %184 : vector<8x128xf32>
    %c0_101 = arith.constant 0 : index
    %c0_102 = arith.constant 0 : index
    %186 = vector.load %arg10[%c0_101, %c0_102] : memref<8x128xf32, #tpu.memory_space<vmem>>, vector<8x128xf32>
    tpu.vector_store %arg10[%c0_101, %c0_102], %183 {strides = array<i32>} : memref<8x128xf32, #tpu.memory_space<vmem>>, vector<8x128xf32>,
    %c0_103 = arith.constant 0 : index
    %c0_104 = arith.constant 0 : index
    %187 = vector.load %arg9[%c0_103, %c0_104] : memref<8x128xf32, #tpu.memory_space<vmem>>, vector<8x128xf32>
    tpu.vector_store %arg9[%c0_103, %c0_104], %185 {strides = array<i32>} : memref<8x128xf32, #tpu.memory_space<vmem>>, vector<8x128xf32>,
    %188 = arith.index_cast %c5_i32 : i32 to index
    %c0_105 = arith.constant 0 : index
    %c0_106 = arith.constant 0 : index
    %189 = vector.load %arg11[%188, %c0_105, %c0_106] : memref<8x8x128xf32, #tpu.memory_space<vmem>>, vector<1x8x128xf32>
    %190 = vector.shape_cast %189 : vector<1x8x128xf32> to vector<8x128xf32>
    %191 = vector.shape_cast %178 : vector<8x128xf32> to vector<1x8x128xf32>
    tpu.vector_store %arg11[%188, %c0_105, %c0_106], %191 {strides = array<i32>} : memref<8x8x128xf32, #tpu.memory_space<vmem>>, vector<1x8x128xf32>,
    %c6_i32 = arith.constant 6 : i32
    %192 = arith.index_cast %c6_i32 : i32 to index
    %c0_107 = arith.constant 0 : index
    %c0_108 = arith.constant 0 : index
    %193 = vector.load %arg8[%192, %c0_107, %c0_108] : memref<8x8x512xf32, #tpu.memory_space<vmem>>, vector<1x8x512xf32>
    %194 = vector.shape_cast %193 : vector<1x8x512xf32> to vector<8x512xf32>
    %c0_109 = arith.constant 0 : index
    %c0_110 = arith.constant 0 : index
    %195 = vector.load %arg9[%c0_109, %c0_110] : memref<8x128xf32, #tpu.memory_space<vmem>>, vector<8x128xf32>
    %c0_111 = arith.constant 0 : index
    %c0_112 = arith.constant 0 : index
    %196 = vector.load %arg10[%c0_111, %c0_112] : memref<8x128xf32, #tpu.memory_space<vmem>>, vector<8x128xf32>
    %c0_113 = arith.constant 0 : index
    %c0_114 = arith.constant 0 : index
    %197 = vector.load %arg5[%c0_113, %c0_114] : memref<128x512xf32, #tpu.memory_space<vmem>>, vector<128x512xf32>
    %cst_115 = arith.constant dense<0.000000e+00> : vector<8x512xf32>
    %198 = tpu.matmul %195, %197, %cst_115 {dimension_numbers = #tpu.dot_dimension_numbers<[1], [0], [0], [1], [0, 0, 1, 1], [], []>} : vector<8x128xf32>, vector<128x512xf32>, vector<8x512xf32> -> vector<8x512xf32>
    %199 = arith.addf %194, %198 : vector<8x512xf32>
    %200 = vector.extract_strided_slice %199 {offsets = [0, 0], sizes = [8, 384], strides = [1, 1]} : vector<8x512xf32> to vector<8x384xf32>
    %201 = arith.negf %200 : vector<8x384xf32>
    %202 = math.exp %201 : vector<8x384xf32>
    %cst_116 = arith.constant 1.000000e+00 : f32
    %203 = vector.broadcast %cst_116 : f32 to vector<8x384xf32>
    %204 = arith.addf %203, %202 : vector<8x384xf32>
    %205 = arith.divf %203, %204 : vector<8x384xf32>
    %206 = vector.extract_strided_slice %205 {offsets = [0, 0], sizes = [8, 128], strides = [1, 1]} : vector<8x384xf32> to vector<8x128xf32>
    %207 = vector.extract_strided_slice %205 {offsets = [0, 128], sizes = [8, 128], strides = [1, 1]} : vector<8x384xf32> to vector<8x128xf32>
    %208 = vector.extract_strided_slice %205 {offsets = [0, 256], sizes = [8, 128], strides = [1, 1]} : vector<8x384xf32> to vector<8x128xf32>
    %209 = vector.extract_strided_slice %199 {offsets = [0, 384], sizes = [8, 128], strides = [1, 1]} : vector<8x512xf32> to vector<8x128xf32>
    %210 = math.tanh %209 : vector<8x128xf32>
    %211 = arith.mulf %207, %196 : vector<8x128xf32>
    %212 = arith.mulf %206, %210 : vector<8x128xf32>
    %213 = arith.addf %211, %212 : vector<8x128xf32>
    %214 = math.tanh %213 : vector<8x128xf32>
    %215 = arith.mulf %208, %214 : vector<8x128xf32>
    %c0_117 = arith.constant 0 : index
    %c0_118 = arith.constant 0 : index
    %216 = vector.load %arg10[%c0_117, %c0_118] : memref<8x128xf32, #tpu.memory_space<vmem>>, vector<8x128xf32>
    tpu.vector_store %arg10[%c0_117, %c0_118], %213 {strides = array<i32>} : memref<8x128xf32, #tpu.memory_space<vmem>>, vector<8x128xf32>,
    %c0_119 = arith.constant 0 : index
    %c0_120 = arith.constant 0 : index
    %217 = vector.load %arg9[%c0_119, %c0_120] : memref<8x128xf32, #tpu.memory_space<vmem>>, vector<8x128xf32>
    tpu.vector_store %arg9[%c0_119, %c0_120], %215 {strides = array<i32>} : memref<8x128xf32, #tpu.memory_space<vmem>>, vector<8x128xf32>,
    %218 = arith.index_cast %c6_i32 : i32 to index
    %c0_121 = arith.constant 0 : index
    %c0_122 = arith.constant 0 : index
    %219 = vector.load %arg11[%218, %c0_121, %c0_122] : memref<8x8x128xf32, #tpu.memory_space<vmem>>, vector<1x8x128xf32>
    %220 = vector.shape_cast %219 : vector<1x8x128xf32> to vector<8x128xf32>
    %221 = vector.shape_cast %208 : vector<8x128xf32> to vector<1x8x128xf32>
    tpu.vector_store %arg11[%218, %c0_121, %c0_122], %221 {strides = array<i32>} : memref<8x8x128xf32, #tpu.memory_space<vmem>>, vector<1x8x128xf32>,
    %c7_i32 = arith.constant 7 : i32
    %222 = arith.index_cast %c7_i32 : i32 to index
    %c0_123 = arith.constant 0 : index
    %c0_124 = arith.constant 0 : index
    %223 = vector.load %arg8[%222, %c0_123, %c0_124] : memref<8x8x512xf32, #tpu.memory_space<vmem>>, vector<1x8x512xf32>
    %224 = vector.shape_cast %223 : vector<1x8x512xf32> to vector<8x512xf32>
    %c0_125 = arith.constant 0 : index
    %c0_126 = arith.constant 0 : index
    %225 = vector.load %arg9[%c0_125, %c0_126] : memref<8x128xf32, #tpu.memory_space<vmem>>, vector<8x128xf32>
    %c0_127 = arith.constant 0 : index
    %c0_128 = arith.constant 0 : index
    %226 = vector.load %arg10[%c0_127, %c0_128] : memref<8x128xf32, #tpu.memory_space<vmem>>, vector<8x128xf32>
    %c0_129 = arith.constant 0 : index
    %c0_130 = arith.constant 0 : index
    %227 = vector.load %arg5[%c0_129, %c0_130] : memref<128x512xf32, #tpu.memory_space<vmem>>, vector<128x512xf32>
    %cst_131 = arith.constant dense<0.000000e+00> : vector<8x512xf32>
    %228 = tpu.matmul %225, %227, %cst_131 {dimension_numbers = #tpu.dot_dimension_numbers<[1], [0], [0], [1], [0, 0, 1, 1], [], []>} : vector<8x128xf32>, vector<128x512xf32>, vector<8x512xf32> -> vector<8x512xf32>
    %229 = arith.addf %224, %228 : vector<8x512xf32>
    %230 = vector.extract_strided_slice %229 {offsets = [0, 0], sizes = [8, 384], strides = [1, 1]} : vector<8x512xf32> to vector<8x384xf32>
    %231 = arith.negf %230 : vector<8x384xf32>
    %232 = math.exp %231 : vector<8x384xf32>
    %cst_132 = arith.constant 1.000000e+00 : f32
    %233 = vector.broadcast %cst_132 : f32 to vector<8x384xf32>
    %234 = arith.addf %233, %232 : vector<8x384xf32>
    %235 = arith.divf %233, %234 : vector<8x384xf32>
    %236 = vector.extract_strided_slice %235 {offsets = [0, 0], sizes = [8, 128], strides = [1, 1]} : vector<8x384xf32> to vector<8x128xf32>
    %237 = vector.extract_strided_slice %235 {offsets = [0, 128], sizes = [8, 128], strides = [1, 1]} : vector<8x384xf32> to vector<8x128xf32>
    %238 = vector.extract_strided_slice %235 {offsets = [0, 256], sizes = [8, 128], strides = [1, 1]} : vector<8x384xf32> to vector<8x128xf32>
    %239 = vector.extract_strided_slice %229 {offsets = [0, 384], sizes = [8, 128], strides = [1, 1]} : vector<8x512xf32> to vector<8x128xf32>
    %240 = math.tanh %239 : vector<8x128xf32>
    %241 = arith.mulf %237, %226 : vector<8x128xf32>
    %242 = arith.mulf %236, %240 : vector<8x128xf32>
    %243 = arith.addf %241, %242 : vector<8x128xf32>
    %244 = math.tanh %243 : vector<8x128xf32>
    %245 = arith.mulf %238, %244 : vector<8x128xf32>
    %c0_133 = arith.constant 0 : index
    %c0_134 = arith.constant 0 : index
    %246 = vector.load %arg10[%c0_133, %c0_134] : memref<8x128xf32, #tpu.memory_space<vmem>>, vector<8x128xf32>
    tpu.vector_store %arg10[%c0_133, %c0_134], %243 {strides = array<i32>} : memref<8x128xf32, #tpu.memory_space<vmem>>, vector<8x128xf32>,
    %c0_135 = arith.constant 0 : index
    %c0_136 = arith.constant 0 : index
    %247 = vector.load %arg9[%c0_135, %c0_136] : memref<8x128xf32, #tpu.memory_space<vmem>>, vector<8x128xf32>
    tpu.vector_store %arg9[%c0_135, %c0_136], %245 {strides = array<i32>} : memref<8x128xf32, #tpu.memory_space<vmem>>, vector<8x128xf32>,
    %248 = arith.index_cast %c7_i32 : i32 to index
    %c0_137 = arith.constant 0 : index
    %c0_138 = arith.constant 0 : index
    %249 = vector.load %arg11[%248, %c0_137, %c0_138] : memref<8x8x128xf32, #tpu.memory_space<vmem>>, vector<1x8x128xf32>
    %250 = vector.shape_cast %249 : vector<1x8x128xf32> to vector<8x128xf32>
    %251 = vector.shape_cast %238 : vector<8x128xf32> to vector<1x8x128xf32>
    tpu.vector_store %arg11[%248, %c0_137, %c0_138], %251 {strides = array<i32>} : memref<8x8x128xf32, #tpu.memory_space<vmem>>, vector<1x8x128xf32>,
    %c8_i32 = arith.constant 8 : i32
    %c0_139 = arith.constant 0 : index
    %c0_140 = arith.constant 0 : index
    %c0_141 = arith.constant 0 : index
    %252 = vector.load %arg11[%c0_139, %c0_140, %c0_141] : memref<8x8x128xf32, #tpu.memory_space<vmem>>, vector<8x8x128xf32>
    %253 = tpu.transpose %252, [1, 0, 2] : vector<8x8x128xf32> -> vector<8x8x128xf32>
    %c0_142 = arith.constant 0 : index
    %c0_143 = arith.constant 0 : index
    %c0_144 = arith.constant 0 : index
    %254 = vector.load %arg6[%c0_142, %c0_143, %c0_144] : memref<8x8x128xf32, #tpu.memory_space<vmem>>, vector<8x8x128xf32>
    tpu.vector_store %arg6[%c0_142, %c0_143, %c0_144], %253 {strides = array<i32>} : memref<8x8x128xf32, #tpu.memory_space<vmem>>, vector<8x8x128xf32>,
    %c0_i32_145 = arith.constant 0 : i32
    %255 = arith.cmpi eq, %arg1, %c0_i32_145 : i32
    %256 = arith.extui %255 : i1 to i32
    %c0_i32_146 = arith.constant 0 : i32
    %257 = arith.cmpi ne, %256, %c0_i32_146 : i32
    scf.if %257 {
      %c0_147 = arith.constant 0 : index
      %c0_148 = arith.constant 0 : index
      %258 = vector.load %arg9[%c0_147, %c0_148] : memref<8x128xf32, #tpu.memory_space<vmem>>, vector<8x128xf32>
      %c0_149 = arith.constant 0 : index
      %c0_150 = arith.constant 0 : index
      %259 = vector.load %arg7[%c0_149, %c0_150] : memref<8x128xf32, #tpu.memory_space<vmem>>, vector<8x128xf32>
      tpu.vector_store %arg7[%c0_149, %c0_150], %258 {strides = array<i32>} : memref<8x128xf32, #tpu.memory_space<vmem>>, vector<8x128xf32>,
    } else {
    }
    return
  }
  func.func @transform_0(%arg0: i32, %arg1: i32) -> (i32, i32, i32) {
    %c0_i32 = arith.constant 0 : i32
    %c0_i32_0 = arith.constant 0 : i32
    return %arg1, %arg0, %c0_i32 : i32, i32, i32
  }
  func.func @transform_1(%arg0: i32, %arg1: i32) -> (i32, i32) {
    %c0_i32 = arith.constant 0 : i32
    %c0_i32_0 = arith.constant 0 : i32
    %c0_i32_1 = arith.constant 0 : i32
    return %c0_i32, %c0_i32_0 : i32, i32
  }
  func.func @transform_2(%arg0: i32, %arg1: i32) -> (i32, i32) {
    %c0_i32 = arith.constant 0 : i32
    %c0_i32_0 = arith.constant 0 : i32
    %c0_i32_1 = arith.constant 0 : i32
    return %c0_i32, %c0_i32_0 : i32, i32
  }
  func.func @transform_3(%arg0: i32, %arg1: i32) -> (i32, i32) {
    %c0_i32 = arith.constant 0 : i32
    %c0_i32_0 = arith.constant 0 : i32
    %c0_i32_1 = arith.constant 0 : i32
    return %c0_i32, %c0_i32_0 : i32, i32
  }
  func.func @transform_4(%arg0: i32, %arg1: i32) -> (i32, i32, i32) {
    %c0_i32 = arith.constant 0 : i32
    %c0_i32_0 = arith.constant 0 : i32
    return %arg0, %arg1, %c0_i32 : i32, i32, i32
  }
  func.func @transform_5(%arg0: i32, %arg1: i32) -> (i32, i32) {
    %c0_i32 = arith.constant 0 : i32
    %c0_i32_0 = arith.constant 0 : i32
    return %arg0, %c0_i32 : i32, i32
  }
}

</mosaic_0001>

<bundles_post_ra>
// kernel: lstm_layer_pallas.1
= control target key start
LH: loop header
LB: loop body
LE: loop exit
PB: predicated region body
PF: predicated region fallthrough
CT: control target
= control target key end

     0   :  { %11 = vsyncpa [#allocation7], 0  ;;  %vm53_vm0 = vcmask 130048   ;;  %s4334_s0 = inlined_call_operand.vmem [shape: f32[8,8,16], index: 0, kind: input, shape index: {}]   ;;  %s4335_s1 = inlined_call_operand.vmem [shape: f32[16,512], index: 1, kind: input, shape index: {}]   ;;  %s4336_s2 = inlined_call_operand.vmem [shape: f32[1,512], index: 2, kind: input, shape index: {}]   ;;  %s4337_s3 = inlined_call_operand.vmem [shape: f32[128,512], index: 3, kind: input, shape index: {}]   ;;  %s4338_s4 = inlined_call_operand.hbm [shape: f32[8,8,128], index: 4, kind: output, shape index: {0}]   ;;  %s4339_s5 = inlined_call_operand.hbm [shape: f32[8,128], index: 5, kind: output, shape index: {1}]  }
   0x1   :  { %v39_v0 = vld [vmem:[%s4335_s1 + $0x20] sm:$0xff]  ;;  %v40_v1 = vld [vmem:[%s4335_s1 + $0x28] sm:$0xff]  ;;  %v41_v2 = vld [vmem:[%s4335_s1 + $0x30] sm:$0xff] }
   0x2   :  { %92 = vmatpush.msra.mxu0 %v39_v0  ;;  %133 = vmatpush.msra.mxu1 %v40_v1  ;;  %v42_v3 = vld [vmem:[%s4335_s1 + $0x38] sm:$0xff]  ;;  %v35_v4 = vld [vmem:[%s4335_s1] sm:$0xff]  ;;  %v36_v5 = vld [vmem:[%s4335_s1 + $0x8] sm:$0xff] }
   0x3   :  { %174 = vmatpush.msra.mxu2 %v41_v2  ;;  %215 = vmatpush.msra.mxu3 %v42_v3  ;;  %v37_v6 = vld [vmem:[%s4335_s1 + $0x10] sm:$0xff]  ;;  %v38_v7 = vld [vmem:[%s4335_s1 + $0x18] sm:$0xff]  ;;  %v27_v8 = vld [vmem:[%s4334_s0] sm:$0xff] }
   0x4   :  { %93 = vmatpush.msra.mxu0 %v35_v4  ;;  %134 = vmatpush.msra.mxu1 %v36_v5  ;;  %v2526_v9 = vld [vmem:[%s4337_s3 + $0x1e0] sm:$0xff]  ;;  %v2531_v10 = vld [vmem:[%s4337_s3 + $0x1e8] sm:$0xff]  ;;  %v2538_v11 = vld [vmem:[%s4337_s3 + $0x1f0] sm:$0xff] }
   0x5   :  { %175 = vmatpush.msra.mxu2 %v37_v6  ;;  %216 = vmatpush.msra.mxu3 %v38_v7  ;;  %v2545_v12 = vld [vmem:[%s4337_s3 + $0x1c0] sm:$0xff]  ;;  %v2550_v13 = vld [vmem:[%s4337_s3 + $0x1c8] sm:$0xff]  ;;  %v2557_v14 = vld [vmem:[%s4337_s3 + $0x1d0] sm:$0xff] }
   0x6   :  { %2216 = vmatmul.msk.f32.vlgmr.msra.gmra.mxu0 %vm53_vm0, %v27_v8  ;;  %2224 = vmatmul.msk.f32.vlgmr.msra.gmra.mxu1 %vm53_vm0, %v27_v8  ;;  %v2562_v15 = vld [vmem:[%s4337_s3 + $0x1f8] sm:$0xff]  ;;  %v2568_v16 = vld [vmem:[%s4337_s3 + $0x1a0] sm:$0xff]  ;;  %v2573_v17 = vld [vmem:[%s4337_s3 + $0x1a8] sm:$0xff] }
   0x7   :  { %2232 = vmatmul.msk.f32.vlgmr.msra.gmra.mxu2 %vm53_vm0, %v27_v8  ;;  %2240 = vmatmul.msk.f32.vlgmr.msra.gmra.mxu3 %vm53_vm0, %v27_v8  ;;  %v2579_v18 = vld [vmem:[%s4337_s3 + $0x1d8] sm:$0xff]  ;;  %v2586_v19 = vld [vmem:[%s4337_s3 + $0x1b0] sm:$0xff]  ;;  %v28_v20 = vld [vmem:[%s4334_s0 + $0x8] sm:$0xff] }
   0x8   :  { %344 = vmatpush.msrb.mxu0 %v2526_v9  ;;  %364 = vmatpush.msrb.mxu1 %v2531_v10  ;;  %v2596_v21 = vld [vmem:[%s4337_s3 + $0x1b8] sm:$0xff]  ;;  %v2603_v22 = vld [vmem:[%s4337_s3 + $0x180] sm:$0xff]  ;;  %v2608_v23 = vld [vmem:[%s4337_s3 + $0x188] sm:$0xff] }
   0x9   :  { %384 = vmatpush.msrb.mxu2 %v2538_v11  ;;  %404 = vmatpush.msrb.mxu3 %v2562_v15  ;;  %v2617_v24 = vld [vmem:[%s4337_s3 + $0x190] sm:$0xff]  ;;  %v2622_v25 = vld [vmem:[%s4337_s3 + $0x198] sm:$0xff]  ;;  %v2629_v26 = vld [vmem:[%s4337_s3 + $0x160] sm:$0xff] }
   0xa   :  { %345 = vmatpush.msrb.mxu0 %v2545_v12  ;;  %365 = vmatpush.msrb.mxu1 %v2550_v13  ;;  %v2634_v27 = vld [vmem:[%s4337_s3 + $0x168] sm:$0xff]  ;;  %v2641_v28 = vld [vmem:[%s4337_s3 + $0x170] sm:$0xff]  ;;  %v2646_v29 = vld [vmem:[%s4337_s3 + $0x178] sm:$0xff] }
   0xb   :  { %385 = vmatpush.msrb.mxu2 %v2557_v14  ;;  %405 = vmatpush.msrb.mxu3 %v2579_v18  ;;  %v2652_v30 = vld [vmem:[%s4337_s3 + $0x140] sm:$0xff]  ;;  %v2657_v31 = vld [vmem:[%s4337_s3 + $0x148] sm:$0xff]  ;;  %v2665_v32 = vld [vmem:[%s4337_s3 + $0x150] sm:$0xff] }
   0xc   :  { %346 = vmatpush.msrb.mxu0 %v2568_v16  ;;  %366 = vmatpush.msrb.mxu1 %v2573_v17  ;;  %v2670_v33 = vld [vmem:[%s4337_s3 + $0x158] sm:$0xff]  ;;  %v29_v34 = vld [vmem:[%s4334_s0 + $0x10] sm:$0xff] }
   0xd   :  { %386 = vmatpush.msrb.mxu2 %v2586_v19  ;;  %406 = vmatpush.msrb.mxu3 %v2596_v21 }
   0xe   :  { %2217 = vmatmul.msk.f32.gmra.mxu0 %vm53_vm0, %v28_v20  ;;  %2225 = vmatmul.msk.f32.gmra.mxu1 %vm53_vm0, %v28_v20 }
   0xf   :  { %2233 = vmatmul.msk.f32.gmra.mxu2 %vm53_vm0, %v28_v20  ;;  %2241 = vmatmul.msk.f32.gmra.mxu3 %vm53_vm0, %v28_v20 }
  0x10   :  { %347 = vmatpush.msrb.mxu0 %v2603_v22  ;;  %367 = vmatpush.msrb.mxu1 %v2608_v23 }
  0x11   :  { %387 = vmatpush.msrb.mxu2 %v2617_v24  ;;  %407 = vmatpush.msrb.mxu3 %v2622_v25 }
  0x12   :  { %348 = vmatpush.msrb.mxu0 %v2629_v26  ;;  %368 = vmatpush.msrb.mxu1 %v2634_v27 }
  0x13   :  { %388 = vmatpush.msrb.mxu2 %v2641_v28  ;;  %408 = vmatpush.msrb.mxu3 %v2646_v29 }
  0x14   :  { %349 = vmatpush.msrb.mxu0 %v2652_v30  ;;  %369 = vmatpush.msrb.mxu1 %v2657_v31 }
  0x15   :  { %12 = vsyncpa [#allocation9], 0  ;;  %v2682_v35 = vld [vmem:[%s4337_s3 + $0x120] sm:$0xff]  ;;  %v2687_v36 = vld [vmem:[%s4337_s3 + $0x128] sm:$0xff]  ;;  %389 = vmatpush.msrb.mxu2 %v2665_v32  ;;  %409 = vmatpush.msrb.mxu3 %v2670_v33  ;;  %s2202_s29 = sshll.u32 %s4339_s5, 4  ;;  %s2463_s5 = smov [#allocation6]   ;;  %s2203_s29 = int_to_ptr.hbm [resolvable:$true] %s2202_s29 }
  0x16   :  { %2218 = vmatmul.msk.f32.gmra.mxu0 %vm53_vm0, %v29_v34  ;;  %2226 = vmatmul.msk.f32.gmra.mxu1 %vm53_vm0, %v29_v34  ;;  %v2696_v37 = vld [vmem:[%s4337_s3 + $0x130] sm:$0xff]  ;;  %v2701_v38 = vld [vmem:[%s4337_s3 + $0x138] sm:$0xff]  ;;  %v2708_v39 = vld [vmem:[%s4337_s3 + $0x100] sm:$0xff]  ;;  %s2186_s30 = sshll.u32 %s2463_s5, 4  ;;  %s2188_s8 = sshll.u32 %s4338_s4, 4  ;;  %s2187_s30 = int_to_ptr.vmem [resolvable:$true] %s2186_s30  ;;  %s2189_s8 = int_to_ptr.hbm [resolvable:$true] %s2188_s8 }
  0x17   :  { %2234 = vmatmul.msk.f32.gmra.mxu2 %vm53_vm0, %v29_v34  ;;  %2242 = vmatmul.msk.f32.gmra.mxu3 %vm53_vm0, %v29_v34  ;;  %v2713_v40 = vld [vmem:[%s4337_s3 + $0x108] sm:$0xff]  ;;  %v2720_v41 = vld [vmem:[%s4337_s3 + $0x110] sm:$0xff]  ;;  %v2725_v42 = vld [vmem:[%s4337_s3 + $0x118] sm:$0xff]  ;;  %s2464_s4 = smov 128   ;;  %s2465_s9 = smov 8  }
  0x18   :  { %350 = vmatpush.msrb.mxu0 %v2682_v35  ;;  %370 = vmatpush.msrb.mxu1 %v2687_v36  ;;  %v2731_v43 = vld [vmem:[%s4337_s3 + $0xe0] sm:$0xff]  ;;  %v2736_v44 = vld [vmem:[%s4337_s3 + $0xe8] sm:$0xff]  ;;  %v2744_v45 = vld [vmem:[%s4337_s3 + $0xf0] sm:$0xff] }
  0x19   :  { %390 = vmatpush.msrb.mxu2 %v2696_v37  ;;  %410 = vmatpush.msrb.mxu3 %v2701_v38  ;;  %v2749_v46 = vld [vmem:[%s4337_s3 + $0xf8] sm:$0xff]  ;;  %v2761_v48 = vld [vmem:[%s4337_s3 + $0xc0] sm:$0xff]  ;;  %v2766_v49 = vld [vmem:[%s4337_s3 + $0xc8] sm:$0xff] }
  0x1a   :  { %351 = vmatpush.msrb.mxu0 %v2708_v39  ;;  %371 = vmatpush.msrb.mxu1 %v2713_v40  ;;  %v30_v47 = vld [vmem:[%s4334_s0 + $0x18] sm:$0xff]  ;;  %v2775_v50 = vld [vmem:[%s4337_s3 + $0xd0] sm:$0xff]  ;;  %v2787_v52 = vld [vmem:[%s4337_s3 + $0xa0] sm:$0xff] }
  0x1b   :  { %391 = vmatpush.msrb.mxu2 %v2720_v41  ;;  %411 = vmatpush.msrb.mxu3 %v2725_v42  ;;  %v2780_v51 = vld [vmem:[%s4337_s3 + $0xd8] sm:$0xff]  ;;  %v2792_v53 = vld [vmem:[%s4337_s3 + $0xa8] sm:$0xff]  ;;  %v2799_v54 = vld [vmem:[%s4337_s3 + $0xb0] sm:$0xff] }
  0x1c   :  { %352 = vmatpush.msrb.mxu0 %v2731_v43  ;;  %372 = vmatpush.msrb.mxu1 %v2736_v44  ;;  %v2804_v55 = vld [vmem:[%s4337_s3 + $0xb8] sm:$0xff]  ;;  %v2810_v56 = vld [vmem:[%s4337_s3 + $0x80] sm:$0xff]  ;;  %v2815_v57 = vld [vmem:[%s4337_s3 + $0x88] sm:$0xff] }
  0x1d   :  { %392 = vmatpush.msrb.mxu2 %v2744_v45  ;;  %412 = vmatpush.msrb.mxu3 %v2749_v46  ;;  %v2823_v58 = vld [vmem:[%s4337_s3 + $0x90] sm:$0xff]  ;;  %v2828_v59 = vld [vmem:[%s4337_s3 + $0x98] sm:$0xff]  ;;  %v31_v60 = vld [vmem:[%s4334_s0 + $0x20] sm:$0xff] }
  0x1e   :  { %2219 = vmatmul.msk.f32.gmra.mxu0 %vm53_vm0, %v30_v47  ;;  %2227 = vmatmul.msk.f32.gmra.mxu1 %vm53_vm0, %v30_v47  ;;  %v2840_v61 = vld [vmem:[%s4337_s3 + $0x60] sm:$0xff]  ;;  %v2845_v62 = vld [vmem:[%s4337_s3 + $0x68] sm:$0xff]  ;;  %v2854_v63 = vld [vmem:[%s4337_s3 + $0x70] sm:$0xff] }
  0x1f   :  { %2235 = vmatmul.msk.f32.gmra.mxu2 %vm53_vm0, %v30_v47  ;;  %2243 = vmatmul.msk.f32.gmra.mxu3 %vm53_vm0, %v30_v47  ;;  %v2859_v0 = vld [vmem:[%s4337_s3 + $0x78] sm:$0xff]  ;;  %v2866_v1 = vld [vmem:[%s4337_s3 + $0x40] sm:$0xff]  ;;  %v2871_v2 = vld [vmem:[%s4337_s3 + $0x48] sm:$0xff] }
  0x20   :  { %353 = vmatpush.msrb.mxu0 %v2761_v48  ;;  %373 = vmatpush.msrb.mxu1 %v2766_v49  ;;  %v2878_v3 = vld [vmem:[%s4337_s3 + $0x50] sm:$0xff]  ;;  %v2883_v4 = vld [vmem:[%s4337_s3 + $0x58] sm:$0xff]  ;;  %v2889_v5 = vld [vmem:[%s4337_s3 + $0x20] sm:$0xff] }
  0x21   :  { %393 = vmatpush.msrb.mxu2 %v2775_v50  ;;  %413 = vmatpush.msrb.mxu3 %v2780_v51  ;;  %v2894_v6 = vld [vmem:[%s4337_s3 + $0x28] sm:$0xff]  ;;  %v2902_v7 = vld [vmem:[%s4337_s3 + $0x30] sm:$0xff]  ;;  %v2907_v8 = vld [vmem:[%s4337_s3 + $0x38] sm:$0xff] }
  0x22   :  { %354 = vmatpush.msrb.mxu0 %v2787_v52  ;;  %374 = vmatpush.msrb.mxu1 %v2792_v53  ;;  %4385 = vst [vmem:[#allocation12_spill] sm:$0xff] %v2894_v6  ;;  %v32_v20 = vld [vmem:[%s4334_s0 + $0x28] sm:$0xff]  ;;  %v2919_v34 = vld [vmem:[%s4337_s3] sm:$0xff] }
  0x23   :  { %394 = vmatpush.msrb.mxu2 %v2799_v54  ;;  %414 = vmatpush.msrb.mxu3 %v2804_v55  ;;  %4386 = vst [vmem:[#allocation13_spill] sm:$0xff] %v2907_v8  ;;  %v2924_v47 = vld [vmem:[%s4337_s3 + $0x8] sm:$0xff] }
  0x24   :  { %355 = vmatpush.msrb.mxu0 %v2810_v56  ;;  %375 = vmatpush.msrb.mxu1 %v2815_v57 }
  0x25   :  { %395 = vmatpush.msrb.mxu2 %v2823_v58  ;;  %415 = vmatpush.msrb.mxu3 %v2828_v59 }
  0x26   :  { %2220 = vmatmul.msk.f32.gmra.mxu0 %vm53_vm0, %v31_v60  ;;  %2228 = vmatmul.msk.f32.gmra.mxu1 %vm53_vm0, %v31_v60 }
  0x27   :  { %2236 = vmatmul.msk.f32.gmra.mxu2 %vm53_vm0, %v31_v60  ;;  %2244 = vmatmul.msk.f32.gmra.mxu3 %vm53_vm0, %v31_v60  ;;  %v2933_v60 = vld [vmem:[%s4337_s3 + $0x10] sm:$0xff] }
  0x28   :  { %356 = vmatpush.msrb.mxu0 %v2840_v61  ;;  %376 = vmatpush.msrb.mxu1 %v2845_v62 }
  0x29   :  { %396 = vmatpush.msrb.mxu2 %v2854_v63  ;;  %416 = vmatpush.msrb.mxu3 %v2859_v0 }
  0x2a   :  { %357 = vmatpush.msrb.mxu0 %v2866_v1  ;;  %377 = vmatpush.msrb.mxu1 %v2871_v2 }
  0x2b   :  { %397 = vmatpush.msrb.mxu2 %v2878_v3  ;;  %417 = vmatpush.msrb.mxu3 %v2883_v4 }
  0x2c   :  { %358 = vmatpush.msrb.mxu0 %v2889_v5  ;;  %378 = vmatpush.msrb.mxu1 %v2894_v6  ;;  %v2938_v6 = vld [vmem:[%s4337_s3 + $0x18] sm:$0xff] }
  0x2d   :  { %398 = vmatpush.msrb.mxu2 %v2902_v7  ;;  %418 = vmatpush.msrb.mxu3 %v2907_v8  ;;  %v33_v8 = vld [vmem:[%s4334_s0 + $0x30] sm:$0xff] }
  0x2e   :  { %2221 = vmatmul.msk.f32.gmra.mxu0 %vm53_vm0, %v32_v20  ;;  %2229 = vmatmul.msk.f32.gmra.mxu1 %vm53_vm0, %v32_v20 }
  0x2f   :  { %2237 = vmatmul.msk.f32.gmra.mxu2 %vm53_vm0, %v32_v20  ;;  %2245 = vmatmul.msk.f32.gmra.mxu3 %vm53_vm0, %v32_v20  ;;  %v34_v20 = vld [vmem:[%s4334_s0 + $0x38] sm:$0xff] }
  0x30   :  { %359 = vmatpush.msrb.mxu0 %v2919_v34  ;;  %379 = vmatpush.msrb.mxu1 %v2924_v47 }
  0x31   :  { %399 = vmatpush.msrb.mxu2 %v2933_v60  ;;  %419 = vmatpush.msrb.mxu3 %v2938_v6 }
  0x32   :  { %565 = vmatpush.msra.mxu0 %v2526_v9  ;;  %585 = vmatpush.msra.mxu1 %v2531_v10 }
  0x33   :  { %605 = vmatpush.msra.mxu2 %v2538_v11  ;;  %625 = vmatpush.msra.mxu3 %v2562_v15 }
  0x34   :  { %566 = vmatpush.msra.mxu0 %v2545_v12  ;;  %586 = vmatpush.msra.mxu1 %v2550_v13 }
  0x35   :  { %606 = vmatpush.msra.mxu2 %v2557_v14  ;;  %626 = vmatpush.msra.mxu3 %v2579_v18 }
  0x36   :  { %2222 = vmatmul.msk.f32.gmra.mxu0 %vm53_vm0, %v33_v8  ;;  %2230 = vmatmul.msk.f32.gmra.mxu1 %vm53_vm0, %v33_v8 }
  0x37   :  { %2238 = vmatmul.msk.f32.gmra.mxu2 %vm53_vm0, %v33_v8  ;;  %2246 = vmatmul.msk.f32.gmra.mxu3 %vm53_vm0, %v33_v8  ;;  %v2459_v8 = vmov 0.0  }
  0x38   :  { %567 = vmatpush.msra.mxu0 %v2568_v16  ;;  %587 = vmatpush.msra.mxu1 %v2573_v17 }
  0x39   :  { %607 = vmatpush.msra.mxu2 %v2586_v19  ;;  %627 = vmatpush.msra.mxu3 %v2596_v21 }
  0x3a   :  { %568 = vmatpush.msra.mxu0 %v2603_v22  ;;  %588 = vmatpush.msra.mxu1 %v2608_v23 }
  0x3b   :  { %608 = vmatpush.msra.mxu2 %v2617_v24  ;;  %628 = vmatpush.msra.mxu3 %v2622_v25 }
  0x3c   :  { %569 = vmatpush.msra.mxu0 %v2629_v26  ;;  %589 = vmatpush.msra.mxu1 %v2634_v27 }
  0x3d   :  { %609 = vmatpush.msra.mxu2 %v2641_v28  ;;  %629 = vmatpush.msra.mxu3 %v2646_v29 }
  0x3e   :  { %2223 = vmatmul.msk.f32.gmra.mxu0 %vm53_vm0, %v34_v20  ;;  %2231 = vmatmul.msk.f32.gmra.mxu1 %vm53_vm0, %v34_v20 }
  0x3f   :  { %2239 = vmatmul.msk.f32.gmra.mxu2 %vm53_vm0, %v34_v20  ;;  %2247 = vmatmul.msk.f32.gmra.mxu3 %vm53_vm0, %v34_v20  ;;  %v4387_v20 = vld [vmem:[#allocation12_spill] sm:$0xff] }
  0x40   :  { %570 = vmatpush.msra.mxu0 %v2652_v30  ;;  %590 = vmatpush.msra.mxu1 %v2657_v31 }
  0x41   :  { %610 = vmatpush.msra.mxu2 %v2665_v32  ;;  %630 = vmatpush.msra.mxu3 %v2670_v33 }
  0x42   :  { %571 = vmatpush.msra.mxu0 %v2682_v35  ;;  %591 = vmatpush.msra.mxu1 %v2687_v36 }
  0x43   :  { %611 = vmatpush.msra.mxu2 %v2696_v37  ;;  %631 = vmatpush.msra.mxu3 %v2701_v38 }
  0x44   :  { %572 = vmatpush.msra.mxu0 %v2708_v39  ;;  %592 = vmatpush.msra.mxu1 %v2713_v40 }
  0x45   :  { %612 = vmatpush.msra.mxu2 %v2720_v41  ;;  %632 = vmatpush.msra.mxu3 %v2725_v42 }
  0x46   :  { %360 = vmatmul.f32.vlgmr.msrb.gmra.mxu0 %v2459_v8  ;;  %380 = vmatmul.f32.vlgmr.msrb.gmra.mxu1 %v2459_v8 }
  0x47   :  { %400 = vmatmul.f32.vlgmr.msrb.gmra.mxu2 %v2459_v8  ;;  %420 = vmatmul.f32.vlgmr.msrb.gmra.mxu3 %v2459_v8  ;;  %v4388_v8 = vld [vmem:[#allocation13_spill] sm:$0xff] }
  0x48   :  { %573 = vmatpush.msra.mxu0 %v2731_v43  ;;  %593 = vmatpush.msra.mxu1 %v2736_v44 }
  0x49   :  { %613 = vmatpush.msra.mxu2 %v2744_v45  ;;  %633 = vmatpush.msra.mxu3 %v2749_v46 }
  0x4a   :  { %574 = vmatpush.msra.mxu0 %v2761_v48  ;;  %594 = vmatpush.msra.mxu1 %v2766_v49 }
  0x4b   :  { %614 = vmatpush.msra.mxu2 %v2775_v50  ;;  %634 = vmatpush.msra.mxu3 %v2780_v51 }
  0x4c   :  { %575 = vmatpush.msra.mxu0 %v2787_v52  ;;  %595 = vmatpush.msra.mxu1 %v2792_v53 }
  0x4d   :  { %615 = vmatpush.msra.mxu2 %v2799_v54  ;;  %635 = vmatpush.msra.mxu3 %v2804_v55 }
  0x4e   :  { %576 = vmatpush.msra.mxu0 %v2810_v56  ;;  %596 = vmatpush.msra.mxu1 %v2815_v57 }
  0x4f   :  { %616 = vmatpush.msra.mxu2 %v2823_v58  ;;  %636 = vmatpush.msra.mxu3 %v2828_v59 }
  0x50   :  { %577 = vmatpush.msra.mxu0 %v2840_v61  ;;  %597 = vmatpush.msra.mxu1 %v2845_v62 }
  0x51   :  { %617 = vmatpush.msra.mxu2 %v2854_v63  ;;  %637 = vmatpush.msra.mxu3 %v2859_v0 }
  0x52   :  { %578 = vmatpush.msra.mxu0 %v2866_v1  ;;  %598 = vmatpush.msra.mxu1 %v2871_v2 }
  0x53   :  { %618 = vmatpush.msra.mxu2 %v2878_v3  ;;  %638 = vmatpush.msra.mxu3 %v2883_v4 }
  0x54   :  { %579 = vmatpush.msra.mxu0 %v2889_v5  ;;  %599 = vmatpush.msra.mxu1 %v4387_v20 }
  0x55   :  { %619 = vmatpush.msra.mxu2 %v2902_v7  ;;  %639 = vmatpush.msra.mxu3 %v4388_v8 }
  0x56   :  { %580 = vmatpush.msra.mxu0 %v2919_v34  ;;  %600 = vmatpush.msra.mxu1 %v2924_v47 }
  0x57   :  { %620 = vmatpush.msra.mxu2 %v2933_v60  ;;  %640 = vmatpush.msra.mxu3 %v2938_v6 }
  0x58   :  { %787 = vmatpush.msrb.mxu0 %v2526_v9  ;;  %807 = vmatpush.msrb.mxu1 %v2531_v10 }
  0x59   :  { %827 = vmatpush.msrb.mxu2 %v2538_v11  ;;  %847 = vmatpush.msrb.mxu3 %v2562_v15  ;;  %v43_v11 = vld [vmem:[%s4336_s2] sm:$0xf] }
  0x5a   :  { %788 = vmatpush.msrb.mxu0 %v2545_v12  ;;  %808 = vmatpush.msrb.mxu1 %v2550_v13  ;;  %v45_v12 = vperm.slane %v43_v11, 0  ;;  %v46_v13 = vperm.slane %v43_v11, 1 }
  0x5b   :  { %828 = vmatpush.msrb.mxu2 %v2557_v14  ;;  %848 = vmatpush.msrb.mxu3 %v2579_v18 }
  0x5c   :  { %789 = vmatpush.msrb.mxu0 %v2568_v16  ;;  %809 = vmatpush.msrb.mxu1 %v2573_v17 }
  0x5d   :  { %829 = vmatpush.msrb.mxu2 %v2586_v19  ;;  %849 = vmatpush.msrb.mxu3 %v2596_v21  ;;  %v3099_v21 = vperm.slane %v43_v11, 2 }
  0x5e   :  { %790 = vmatpush.msrb.mxu0 %v2603_v22  ;;  %810 = vmatpush.msrb.mxu1 %v2608_v23  ;;  %v3101_v22 = vperm.slane %v43_v11, 3 }
  0x5f   :  { %830 = vmatpush.msrb.mxu2 %v2617_v24  ;;  %850 = vmatpush.msrb.mxu3 %v2622_v25 }
  0x60   :  { %791 = vmatpush.msrb.mxu0 %v2629_v26  ;;  %811 = vmatpush.msrb.mxu1 %v2634_v27 }
  0x61   :  { %831 = vmatpush.msrb.mxu2 %v2641_v28  ;;  %851 = vmatpush.msrb.mxu3 %v2646_v29 }
  0x62   :  { %792 = vmatpush.msrb.mxu0 %v2652_v30  ;;  %812 = vmatpush.msrb.mxu1 %v2657_v31 }
  0x63   :  { %832 = vmatpush.msrb.mxu2 %v2665_v32  ;;  %852 = vmatpush.msrb.mxu3 %v2670_v33 }
  0x64   :  { %793 = vmatpush.msrb.mxu0 %v2682_v35  ;;  %813 = vmatpush.msrb.mxu1 %v2687_v36 }
  0x65   :  { %833 = vmatpush.msrb.mxu2 %v2696_v37  ;;  %853 = vmatpush.msrb.mxu3 %v2701_v38 }
  0x66   :  { %794 = vmatpush.msrb.mxu0 %v2708_v39  ;;  %814 = vmatpush.msrb.mxu1 %v2713_v40 }
  0x67   :  { %834 = vmatpush.msrb.mxu2 %v2720_v41  ;;  %854 = vmatpush.msrb.mxu3 %v2725_v42 }
  0x68   :  { %795 = vmatpush.msrb.mxu0 %v2731_v43  ;;  %815 = vmatpush.msrb.mxu1 %v2736_v44 }
  0x69   :  { %835 = vmatpush.msrb.mxu2 %v2744_v45  ;;  %855 = vmatpush.msrb.mxu3 %v2749_v46 }
  0x6a   :  { %796 = vmatpush.msrb.mxu0 %v2761_v48  ;;  %816 = vmatpush.msrb.mxu1 %v2766_v49 }
  0x6b   :  { %836 = vmatpush.msrb.mxu2 %v2775_v50  ;;  %856 = vmatpush.msrb.mxu3 %v2780_v51 }
  0x6c   :  { %797 = vmatpush.msrb.mxu0 %v2787_v52  ;;  %817 = vmatpush.msrb.mxu1 %v2792_v53 }
  0x6d   :  { %837 = vmatpush.msrb.mxu2 %v2799_v54  ;;  %857 = vmatpush.msrb.mxu3 %v2804_v55 }
  0x6e   :  { %798 = vmatpush.msrb.mxu0 %v2810_v56  ;;  %818 = vmatpush.msrb.mxu1 %v2815_v57 }
  0x6f   :  { %838 = vmatpush.msrb.mxu2 %v2823_v58  ;;  %858 = vmatpush.msrb.mxu3 %v2828_v59 }
  0x70   :  { %799 = vmatpush.msrb.mxu0 %v2840_v61  ;;  %819 = vmatpush.msrb.mxu1 %v2845_v62 }
  0x71   :  { %839 = vmatpush.msrb.mxu2 %v2854_v63  ;;  %859 = vmatpush.msrb.mxu3 %v2859_v0 }
  0x72   :  { %800 = vmatpush.msrb.mxu0 %v2866_v1  ;;  %820 = vmatpush.msrb.mxu1 %v2871_v2 }
  0x73   :  { %840 = vmatpush.msrb.mxu2 %v2878_v3  ;;  %860 = vmatpush.msrb.mxu3 %v2883_v4 }
  0x74   :  { %801 = vmatpush.msrb.mxu0 %v2889_v5  ;;  %821 = vmatpush.msrb.mxu1 %v4387_v20 }
  0x75   :  { %841 = vmatpush.msrb.mxu2 %v2902_v7  ;;  %861 = vmatpush.msrb.mxu3 %v4388_v8 }
  0x76   :  { %802 = vmatpush.msrb.mxu0 %v2919_v34  ;;  %822 = vmatpush.msrb.mxu1 %v2924_v47 }
  0x77   :  { %842 = vmatpush.msrb.mxu2 %v2933_v60  ;;  %862 = vmatpush.msrb.mxu3 %v2938_v6 }
  0x83   :  { %v95_v9 = vpop.f32.mrf.mxu0  ;;  %v136_v10 = vpop.f32.mrf.mxu1 }
  0x84   :  { %v96_v60 = vadd.f32 %v95_v9, %v45_v12  ;;  %v137_v20 = vadd.f32 %v136_v10, %v46_v13 }
  0x8a   :  { %v3091_v14 = vpop.f32.mrf.mxu2  ;;  %v3093_v15 = vpop.f32.mrf.mxu3 }
  0x8b   :  { %v98_v16 = vpop.f32.mrf.mxu0  ;;  %v139_v17 = vpop.f32.mrf.mxu1 }
  0x8c   :  { %v3095_v18 = vadd.f32 %v98_v16, %v45_v12  ;;  %v3097_v19 = vadd.f32 %v139_v17, %v46_v13 }
  0x92   :  { %v180_v23 = vpop.f32.mrf.mxu2  ;;  %v221_v24 = vpop.f32.mrf.mxu3 }
  0x93   :  { %v3104_v25 = vadd.f32 %v180_v23, %v3099_v21  ;;  %v3107_v26 = vadd.f32 %v221_v24, %v3101_v22  ;;  %v101_v27 = vpop.f32.mrf.mxu0  ;;  %v142_v28 = vpop.f32.mrf.mxu1 }
  0x94   :  { %v3109_v29 = vadd.f32 %v101_v27, %v45_v12  ;;  %v3111_v30 = vadd.f32 %v142_v28, %v46_v13 }
  0x9a   :  { %v183_v31 = vpop.f32.mrf.mxu2  ;;  %v224_v32 = vpop.f32.mrf.mxu3 }
  0x9b   :  { %v3114_v33 = vadd.f32 %v183_v31, %v3099_v21  ;;  %v3117_v35 = vadd.f32 %v224_v32, %v3101_v22  ;;  %v104_v36 = vpop.f32.mrf.mxu0  ;;  %v145_v37 = vpop.f32.mrf.mxu1 }
  0x9c   :  { %v3119_v38 = vadd.f32 %v104_v36, %v45_v12  ;;  %v3121_v39 = vadd.f32 %v145_v37, %v46_v13  ;;  %v178_v36 = vadd.f32 %v3091_v14, %v3099_v21 }
  0x9e   :  { %4389 = vst [vmem:[#allocation12_spill] sm:$0xff] %v3119_v38  ;;  %v3540_v38 = vld [vmem:[%s4337_s3 + $0x30] sm:$0xff] }
  0x9f   :  { %4390 = vst [vmem:[#allocation13_spill] sm:$0xff] %v3121_v39 }
  0xa2   :  { %v186_v40 = vpop.f32.mrf.mxu2  ;;  %v227_v41 = vpop.f32.mrf.mxu3 }
  0xa3   :  { %v3124_v42 = vadd.f32 %v186_v40, %v3099_v21  ;;  %v3127_v43 = vadd.f32 %v227_v41, %v3101_v22  ;;  %v107_v44 = vpop.f32.mrf.mxu0  ;;  %v148_v45 = vpop.f32.mrf.mxu1 }
  0xa4   :  { %v3129_v46 = vadd.f32 %v107_v44, %v45_v12  ;;  %v3131_v48 = vadd.f32 %v148_v45, %v46_v13 }
  0xa5   :  { %4391 = vst [vmem:[#allocation14_spill] sm:$0xff] %v3124_v42  ;;  %v3532_v42 = vld [vmem:[%s4337_s3 + $0x28] sm:$0xff] }
  0xa6   :  { %4392 = vst [vmem:[#allocation15_spill] sm:$0xff] %v3127_v43  ;;  %v3527_v43 = vld [vmem:[%s4337_s3 + $0x20] sm:$0xff] }
  0xa7   :  { %4393 = vst [vmem:[#allocation16_spill] sm:$0xff] %v3129_v46  ;;  %v3510_v46 = vld [vmem:[%s4337_s3 + $0x48] sm:$0xff] }
  0xa8   :  { %4394 = vst [vmem:[#allocation17_spill] sm:$0xff] %v3131_v48  ;;  %v3498_v48 = vld [vmem:[%s4337_s3 + $0x78] sm:$0xff] }
  0xa9   :  { %4425 = vst [vmem:[#allocation48_spill] sm:$0xff] %v3498_v48 }
  0xaa   :  { %v189_v49 = vpop.f32.mrf.mxu2  ;;  %v230_v50 = vpop.f32.mrf.mxu3  ;;  %4427 = vst [vmem:[#allocation50_spill] sm:$0xff] %v3510_v46 }
  0xab   :  { %v3134_v51 = vadd.f32 %v189_v49, %v3099_v21  ;;  %v3137_v52 = vadd.f32 %v230_v50, %v3101_v22  ;;  %v110_v53 = vpop.f32.mrf.mxu0  ;;  %v151_v54 = vpop.f32.mrf.mxu1  ;;  %v219_v49 = vadd.f32 %v3093_v15, %v3101_v22  ;;  %4430 = vst [vmem:[#allocation53_spill] sm:$0xff] %v3532_v42 }
  0xac   :  { %v3139_v55 = vadd.f32 %v110_v53, %v45_v12  ;;  %v3141_v56 = vadd.f32 %v151_v54, %v46_v13 }
  0xad   :  { %4395 = vst [vmem:[#allocation18_spill] sm:$0xff] %v3134_v51  ;;  %v3493_v51 = vld [vmem:[%s4337_s3 + $0x70] sm:$0xff] }
  0xae   :  { %4396 = vst [vmem:[#allocation19_spill] sm:$0xff] %v3137_v52  ;;  %v3488_v52 = vld [vmem:[%s4337_s3 + $0x68] sm:$0xff] }
  0xaf   :  { %4397 = vst [vmem:[#allocation20_spill] sm:$0xff] %v3139_v55  ;;  %v3481_v55 = vld [vmem:[%s4337_s3 + $0x60] sm:$0xff] }
  0xb0   :  { %4398 = vst [vmem:[#allocation21_spill] sm:$0xff] %v3141_v56  ;;  %v3464_v56 = vld [vmem:[%s4337_s3 + $0x88] sm:$0xff] }
  0xb1   :  { %4424 = vst [vmem:[#allocation47_spill] sm:$0xff] %v3493_v51 }
  0xb2   :  { %v192_v57 = vpop.f32.mrf.mxu2  ;;  %v233_v58 = vpop.f32.mrf.mxu3 }
  0xb3   :  { %v3144_v59 = vadd.f32 %v192_v57, %v3099_v21  ;;  %v3147_v61 = vadd.f32 %v233_v58, %v3101_v22  ;;  %v113_v62 = vpop.f32.mrf.mxu0  ;;  %v154_v63 = vpop.f32.mrf.mxu1 }
  0xb4   :  { %v3149_v0 = vadd.f32 %v113_v62, %v45_v12  ;;  %v3151_v1 = vadd.f32 %v154_v63, %v46_v13 }
  0xb5   :  { %4399 = vst [vmem:[#allocation22_spill] sm:$0xff] %v3144_v59  ;;  %v3459_v59 = vld [vmem:[%s4337_s3 + $0x80] sm:$0xff] }
  0xb6   :  { %4400 = vst [vmem:[#allocation23_spill] sm:$0xff] %v3147_v61  ;;  %v3440_v61 = vld [vmem:[%s4337_s3 + $0xa8] sm:$0xff] }
  0xb7   :  { %4401 = vst [vmem:[#allocation24_spill] sm:$0xff] %v3149_v0  ;;  %v3435_v0 = vld [vmem:[%s4337_s3 + $0xa0] sm:$0xff] }
  0xb8   :  { %4402 = vst [vmem:[#allocation25_spill] sm:$0xff] %v3151_v1 }
  0xba   :  { %v195_v2 = vpop.f32.mrf.mxu2  ;;  %v236_v3 = vpop.f32.mrf.mxu3 }
  0xbb   :  { %v3154_v4 = vadd.f32 %v195_v2, %v3099_v21  ;;  %v3157_v5 = vadd.f32 %v236_v3, %v3101_v22  ;;  %v116_v6 = vpop.f32.mrf.mxu0  ;;  %v157_v7 = vpop.f32.mrf.mxu1 }
  0xbc   :  { %v3159_v34 = vadd.f32 %v116_v6, %v45_v12  ;;  %v3161_v47 = vadd.f32 %v157_v7, %v46_v13 }
  0xbd   :  { %4403 = vst [vmem:[#allocation26_spill] sm:$0xff] %v3154_v4 }
  0xbe   :  { %4404 = vst [vmem:[#allocation27_spill] sm:$0xff] %v3157_v5  ;;  %v3426_v5 = vld [vmem:[%s4337_s3 + $0xd8] sm:$0xff] }
  0xbf   :  { %4405 = vst [vmem:[#allocation28_spill] sm:$0xff] %v3159_v34 }
  0xc0   :  { %4406 = vst [vmem:[#allocation29_spill] sm:$0xff] %v3161_v47 }
  0xc2   :  { %v198_v8 = vpop.f32.mrf.mxu2  ;;  %v239_v11 = vpop.f32.mrf.mxu3 }
  0xc3   :  { %v3164_v16 = vadd.f32 %v198_v8, %v3099_v21  ;;  %v3167_v17 = vadd.f32 %v239_v11, %v3101_v22  ;;  %v361_v23 = vpop.f32.mrf.mxu0  ;;  %v381_v24 = vpop.f32.mrf.mxu1 }
  0xc4   :  { %v424_v27 = vadd.f32 %v361_v23, %v96_v60  ;;  %v425_v28 = vadd.f32 %v381_v24, %v137_v20 }
  0xc5   :  { %4407 = vst [vmem:[#allocation30_spill] sm:$0xff] %v3164_v16  ;;  %v3419_v16 = vld [vmem:[%s4337_s3 + $0xd0] sm:$0xff] }
  0xc6   :  { %4408 = vst [vmem:[#allocation31_spill] sm:$0xff] %v3167_v17  ;;  %v2248_v31 = vmul.f32 -1.442695, %v424_v27  ;;  %v2249_v32 = vmul.f32 -1.442695, %v425_v28  ;;  %v3414_v17 = vld [vmem:[%s4337_s3 + $0xc8] sm:$0xff] }
  0xc8   :  { %2279 = vpow2.f32 %v2248_v31 }
  0xc9   :  { %2281 = vpow2.f32 %v2249_v32 }
  0xca   :  { %v401_v9 = vpop.f32.mrf.mxu2  ;;  %v421_v44 = vpop.f32.mrf.mxu3 }
  0xcb   :  { %v426_v10 = vadd.f32 %v401_v9, %v178_v36  ;;  %v427_v54 = vadd.f32 %v421_v44, %v219_v49 }
  0xcd   :  { %v2250_v12 = vmul.f32 -1.442695, %v426_v10 }
  0xce   :  { %v2280_v13 = vpop.eup %2279 }
  0xcf   :  { %v2282_v37 = vpop.eup %2281  ;;  %v437_v40 = vadd.f32 1.0, %v2280_v13  ;;  %2283 = vpow2.f32 %v2250_v12 }
  0xd0   :  { %v438_v41 = vadd.f32 1.0, %v2282_v37 }
  0xd1   :  { %2285 = vrcp.f32 %v437_v40  ;;  %v451_v63 = vand.u32 2147483648, %v437_v40  ;;  %v449_v6 = vand.u32 2147483647, %v437_v40  ;;  %vm445_vm3 = vweird.f32 %v437_v40 }
  0xd2   :  { %2287 = vrcp.f32 %v438_v41  ;;  %v466_v2 = vand.u32 2147483648, %v438_v41  ;;  %v464_v60 = vand.u32 2147483647, %v438_v41  ;;  %vm460_vm4 = vweird.f32 %v438_v41 }
  0xd3   :  { %v452_v8 = vor.u32 1.1754944e-38, %v451_v63  ;;  %vm450_vm6 = vcmp.eq.f32.partialorder %v449_v6, 8.507059e+37 }
  0xd4   :  { %v467_v23 = vor.u32 1.1754944e-38, %v466_v2  ;;  %vm465_vm8 = vcmp.eq.f32.partialorder %v464_v60, 8.507059e+37 }
  0xd5   :  { %v2284_v45 = vpop.eup %2283 }
  0xd6   :  { %v439_v50 = vadd.f32 1.0, %v2284_v45 }
  0xd7   :  { %v2286_v53 = vpop.eup %2285 }
  0xd8   :  { %v2288_v14 = vpop.eup %2287  ;;  %v441_v21 = vmul.f32 %v2286_v53, %v437_v40  ;;  %2289 = vrcp.f32 %v439_v50  ;;  %vm446_vm1 = vweird.f32 %v2286_v53  ;;  %v481_v40 = vand.u32 2147483648, %v439_v50 }
  0xd9   :  { %v456_v57 = vmul.f32 %v2288_v14, %v438_v41  ;;  %2291 = vtanh.f32 %v427_v54  ;;  %vm461_vm2 = vweird.f32 %v2288_v14  ;;  %vm447_vm5 = vmor %vm445_vm3, %vm446_vm1  ;;  %vm475_vm10 = vweird.f32 %v439_v50 }
  0xda   :  { %v442_v58 = vsub.f32 1.0, %v441_v21  ;;  %vm462_vm7 = vmor %vm460_vm4, %vm461_vm2  ;;  %v479_v41 = vand.u32 2147483647, %v439_v50  ;;  %v482_v45 = vor.u32 1.1754944e-38, %v481_v40 }
  0xdb   :  { %v457_v62 = vsub.f32 1.0, %v456_v57 }
  0xdc   :  { %v443_v3 = vmul.f32 %v2286_v53, %v442_v58  ;;  %vm480_vm12 = vcmp.eq.f32.partialorder %v479_v41, 8.507059e+37 }
  0xdd   :  { %v458_v7 = vmul.f32 %v2288_v14, %v457_v62 }
  0xde   :  { %v2290_v20 = vpop.eup %2289  ;;  %v444_v15 = vadd.f32 %v2286_v53, %v443_v3 }
  0xdf   :  { %v471_v22 = vmul.f32 %v2290_v20, %v439_v50  ;;  %v459_v11 = vadd.f32 %v2288_v14, %v458_v7  ;;  %v2292_v27 = vpop.eup %2291  ;;  %vm476_vm9 = vweird.f32 %v2290_v20 }
  0xe0   :  { %v448_v24 = vsel %vm447_vm5, %v2286_v53, %v444_v15  ;;  %vm477_vm11 = vmor %vm475_vm10, %vm476_vm9 }
  0xe1   :  { %v472_v28 = vsub.f32 1.0, %v471_v22  ;;  %v453_v31 = vsel %vm450_vm6, %v452_v8, %v448_v24  ;;  %v463_v32 = vsel %vm462_vm7, %v2288_v14, %v459_v11 }
  0xe2   :  { %v468_v36 = vsel %vm465_vm8, %v467_v23, %v463_v32  ;;  %v487_v9 = vmul.f32 %v2292_v27, %v453_v31 }
  0xe3   :  { %v473_v10 = vmul.f32 %v2290_v20, %v472_v28  ;;  %v486_v12 = vmul.f32 0.0, %v468_v36 }
  0xe5   :  { %v3173_v13 = vadd.f32 %v487_v9, %v486_v12  ;;  %v474_v37 = vadd.f32 %v2290_v20, %v473_v10 }
  0xe7   :  { %2293 = vtanh.f32 %v3173_v13  ;;  %v478_v44 = vsel %vm477_vm11, %v2290_v20, %v474_v37 }
  0xe8   :  { %v3176_v53 = vsel %vm480_vm12, %v482_v45, %v478_v44 }
  0xe9   :  { %4409 = vst [vmem:[#allocation32_spill] sm:$0xff] %v3176_v53 }
  0xed   :  { %v2294_v49 = vpop.eup %2293 }
  0xee   :  { %v490_v54 = vmul.f32 %v2294_v49, %v3176_v53  ;;  %v3522_v53 = vld [vmem:[%s4337_s3 + $0x58] sm:$0xff] }
  0xef   :  { %4429 = vst [vmem:[#allocation52_spill] sm:$0xff] %v3522_v53 }
  0xf0   :  { %581 = vmatmul.f32.vlgmr.msra.gmra.mxu0 %v490_v54  ;;  %601 = vmatmul.f32.vlgmr.msra.gmra.mxu1 %v490_v54 }
  0xf1   :  { %621 = vmatmul.f32.vlgmr.msra.gmra.mxu2 %v490_v54  ;;  %641 = vmatmul.f32.vlgmr.msra.gmra.mxu3 %v490_v54 }
 0x16d   :  { %v582_v14 = vpop.f32.mrf.mxu0  ;;  %v602_v21 = vpop.f32.mrf.mxu1 }
 0x16e   :  { %v645_v57 = vadd.f32 %v582_v14, %v3095_v18  ;;  %v646_v58 = vadd.f32 %v602_v21, %v3097_v19 }
 0x170   :  { %v2251_v50 = vmul.f32 -1.442695, %v645_v57  ;;  %v2252_v62 = vmul.f32 -1.442695, %v646_v58 }
 0x172   :  { %2295 = vpow2.f32 %v2251_v50 }
 0x173   :  { %2297 = vpow2.f32 %v2252_v62 }
 0x174   :  { %v622_v63 = vpop.f32.mrf.mxu2  ;;  %v642_v15 = vpop.f32.mrf.mxu3 }
 0x175   :  { %v647_v2 = vadd.f32 %v622_v63, %v3104_v25  ;;  %v648_v19 = vadd.f32 %v642_v15, %v3107_v26 }
 0x177   :  { %v2253_v3 = vmul.f32 -1.442695, %v647_v2 }
 0x178   :  { %v2296_v6 = vpop.eup %2295 }
 0x179   :  { %v2298_v7 = vpop.eup %2297  ;;  %v658_v60 = vadd.f32 1.0, %v2296_v6  ;;  %2299 = vpow2.f32 %v2253_v3 }
 0x17a   :  { %v659_v20 = vadd.f32 1.0, %v2298_v7 }
 0x17b   :  { %2301 = vrcp.f32 %v658_v60  ;;  %v672_v28 = vand.u32 2147483648, %v658_v60  ;;  %v670_v36 = vand.u32 2147483647, %v658_v60  ;;  %vm666_vm15 = vweird.f32 %v658_v60 }
 0x17c   :  { %2303 = vrcp.f32 %v659_v20  ;;  %v687_v31 = vand.u32 2147483648, %v659_v20  ;;  %v685_v10 = vand.u32 2147483647, %v659_v20  ;;  %vm681_vm0 = vweird.f32 %v659_v20 }
 0x17d   :  { %v673_v40 = vor.u32 1.1754944e-38, %v672_v28  ;;  %vm671_vm3 = vcmp.eq.f32.partialorder %v670_v36, 8.507059e+37  ;;  %v3246_v28 = vld [vmem:[%s4337_s3 + $0x1a8] sm:$0xff]  ;;  %v3265_v36 = vld [vmem:[%s4337_s3 + $0x180] sm:$0xff] }
 0x17e   :  { %v688_v44 = vor.u32 1.1754944e-38, %v687_v31  ;;  %vm686_vm4 = vcmp.eq.f32.partialorder %v685_v10, 8.507059e+37  ;;  %v3251_v31 = vld [vmem:[%s4337_s3 + $0x1b0] sm:$0xff] }
 0x17f   :  { %v2300_v22 = vpop.eup %2299  ;;  %v3275_v10 = vld [vmem:[%s4337_s3 + $0x190] sm:$0xff] }
 0x180   :  { %v660_v18 = vadd.f32 1.0, %v2300_v22  ;;  %4416 = vst [vmem:[#allocation39_spill] sm:$0xff] %v3275_v10 }
 0x181   :  { %v2302_v8 = vpop.eup %2301 }
 0x182   :  { %v2304_v11 = vpop.eup %2303  ;;  %v662_v23 = vmul.f32 %v2302_v8, %v658_v60  ;;  %2305 = vrcp.f32 %v660_v18  ;;  %vm667_vm13 = vweird.f32 %v2302_v8  ;;  %v702_v3 = vand.u32 2147483648, %v660_v18 }
 0x183   :  { %v677_v24 = vmul.f32 %v2304_v11, %v659_v20  ;;  %2307 = vtanh.f32 %v648_v19  ;;  %vm682_vm14 = vweird.f32 %v2304_v11  ;;  %vm668_vm1 = vmor %vm666_vm15, %vm667_vm13  ;;  %vm696_vm6 = vweird.f32 %v660_v18  ;;  %v3210_v19 = vld [vmem:[%s4337_s3 + $0x1f8] sm:$0xff] }
 0x184   :  { %v663_v27 = vsub.f32 1.0, %v662_v23  ;;  %vm683_vm2 = vmor %vm681_vm0, %vm682_vm14  ;;  %v700_v6 = vand.u32 2147483647, %v660_v18  ;;  %v703_v60 = vor.u32 1.1754944e-38, %v702_v3  ;;  %4411 = vst [vmem:[#allocation34_spill] sm:$0xff] %v3210_v19  ;;  %1069 = vmatpush.msra.mxu3 %v3210_v19  ;;  %v3222_v23 = vld [vmem:[%s4337_s3 + $0x1c8] sm:$0xff] }
 0x185   :  { %v678_v25 = vsub.f32 1.0, %v677_v24  ;;  %v3227_v24 = vld [vmem:[%s4337_s3 + $0x1d0] sm:$0xff]  ;;  %v3378_v3 = vld [vmem:[%s4337_s3 + $0x118] sm:$0xff] }
 0x186   :  { %v664_v32 = vmul.f32 %v2302_v8, %v663_v27  ;;  %vm701_vm8 = vcmp.eq.f32.partialorder %v700_v6, 8.507059e+37  ;;  %4413 = vst [vmem:[#allocation36_spill] sm:$0xff] %v3227_v24  ;;  %v3234_v27 = vld [vmem:[%s4337_s3 + $0x1d8] sm:$0xff]  ;;  %v3385_v6 = vld [vmem:[%s4337_s3 + $0xe0] sm:$0xff] }
 0x187   :  { %v679_v9 = vmul.f32 %v2304_v11, %v678_v25  ;;  %4414 = vst [vmem:[#allocation37_spill] sm:$0xff] %v3234_v27  ;;  %1070 = vmatpush.msra.mxu3 %v3234_v27  ;;  %v3241_v25 = vld [vmem:[%s4337_s3 + $0x1a0] sm:$0xff] }
 0x188   :  { %v2306_v12 = vpop.eup %2305  ;;  %v665_v37 = vadd.f32 %v2302_v8, %v664_v32  ;;  %v3258_v32 = vld [vmem:[%s4337_s3 + $0x1b8] sm:$0xff] }
 0x189   :  { %v692_v26 = vmul.f32 %v2306_v12, %v660_v18  ;;  %v680_v41 = vadd.f32 %v2304_v11, %v679_v9  ;;  %v2308_v49 = vpop.eup %2307  ;;  %vm697_vm5 = vweird.f32 %v2306_v12  ;;  %v3198_v18 = vld [vmem:[%s4337_s3 + $0x1e8] sm:$0xff]  ;;  %1071 = vmatpush.msra.mxu3 %v3258_v32 }
 0x18a   :  { %v669_v45 = vsel %vm668_vm1, %v2302_v8, %v665_v37  ;;  %vm698_vm7 = vmor %vm696_vm6, %vm697_vm5  ;;  %v3203_v8 = vld [vmem:[%s4337_s3 + $0x1f0] sm:$0xff]  ;;  %1029 = vmatpush.msra.mxu1 %v3198_v18  ;;  %v3270_v9 = vld [vmem:[%s4337_s3 + $0x188] sm:$0xff] }
 0x18b   :  { %v693_v54 = vsub.f32 1.0, %v692_v26  ;;  %v674_v14 = vsel %vm671_vm3, %v673_v40, %v669_v45  ;;  %v684_v21 = vsel %vm683_vm2, %v2304_v11, %v680_v41  ;;  %1049 = vmatpush.msra.mxu2 %v3203_v8  ;;  %v3217_v11 = vld [vmem:[%s4337_s3 + $0x1c0] sm:$0xff]  ;;  %4415 = vst [vmem:[#allocation38_spill] sm:$0xff] %v3270_v9  ;;  %v3294_v26 = vld [vmem:[%s4337_s3 + $0x168] sm:$0xff]  ;;  %v3299_v40 = vld [vmem:[%s4337_s3 + $0x170] sm:$0xff] }
 0x18c   :  { %v689_v57 = vsel %vm686_vm4, %v688_v44, %v684_v21  ;;  %v708_v58 = vmul.f32 %v2308_v49, %v674_v14  ;;  %4412 = vst [vmem:[#allocation35_spill] sm:$0xff] %v3217_v11  ;;  %1030 = vmatpush.msra.mxu1 %v3222_v23  ;;  %v3289_v37 = vld [vmem:[%s4337_s3 + $0x160] sm:$0xff]  ;;  %v3306_v41 = vld [vmem:[%s4337_s3 + $0x178] sm:$0xff]  ;;  %v3318_v45 = vld [vmem:[%s4337_s3 + $0x148] sm:$0xff] }
 0x18d   :  { %v694_v50 = vmul.f32 %v2306_v12, %v693_v54  ;;  %v707_v62 = vmul.f32 %v689_v57, %v3173_v13  ;;  %v3193_v13 = vld [vmem:[%s4337_s3 + $0x1e0] sm:$0xff]  ;;  %1050 = vmatpush.msra.mxu2 %v3227_v24  ;;  %4418 = vst [vmem:[#allocation41_spill] sm:$0xff] %v3289_v37  ;;  %v3323_v49 = vld [vmem:[%s4337_s3 + $0x150] sm:$0xff]  ;;  %v3330_v54 = vld [vmem:[%s4337_s3 + $0x158] sm:$0xff] }
 0x18e   :  { %1009 = vmatpush.msra.mxu0 %v3193_v13  ;;  %1031 = vmatpush.msra.mxu1 %v3246_v28  ;;  %v3313_v44 = vld [vmem:[%s4337_s3 + $0x140] sm:$0xff]  ;;  %4419 = vst [vmem:[#allocation42_spill] sm:$0xff] %v3318_v45  ;;  %v3342_v21 = vld [vmem:[%s4337_s3 + $0x128] sm:$0xff]  ;;  %v3347_v57 = vld [vmem:[%s4337_s3 + $0x130] sm:$0xff] }
 0x18f   :  { %v3184_v63 = vadd.f32 %v708_v58, %v707_v62  ;;  %v695_v2 = vadd.f32 %v2306_v12, %v694_v50  ;;  %1051 = vmatpush.msra.mxu2 %v3251_v31  ;;  %v3337_v14 = vld [vmem:[%s4337_s3 + $0x120] sm:$0xff]  ;;  %4421 = vst [vmem:[#allocation44_spill] sm:$0xff] %v3342_v21  ;;  %v3354_v58 = vld [vmem:[%s4337_s3 + $0x138] sm:$0xff]  ;;  %v3366_v62 = vld [vmem:[%s4337_s3 + $0x108] sm:$0xff] }
 0x190   :  { %1010 = vmatpush.msra.mxu0 %v3217_v11  ;;  %1032 = vmatpush.msra.mxu1 %v3270_v9  ;;  %4420 = vst [vmem:[#allocation43_spill] sm:$0xff] %v3337_v14  ;;  %v3361_v50 = vld [vmem:[%s4337_s3 + $0x100] sm:$0xff] }
 0x191   :  { %2309 = vtanh.f32 %v3184_v63  ;;  %v699_v7 = vsel %vm698_vm7, %v2306_v12, %v695_v2  ;;  %v3282_v12 = vld [vmem:[%s4337_s3 + $0x198] sm:$0xff]  ;;  %1052 = vmatpush.msra.mxu2 %v3275_v10  ;;  %4422 = vst [vmem:[#allocation45_spill] sm:$0xff] %v3347_v57  ;;  %v3371_v2 = vld [vmem:[%s4337_s3 + $0x110] sm:$0xff]  ;;  %vm2057_vm7 = vcmask 1047556  }
 0x192   :  { %v3187_v15 = vsel %vm701_vm8, %v703_v60, %v699_v7  ;;  %1011 = vmatpush.msra.mxu0 %v3241_v25  ;;  %4417 = vst [vmem:[#allocation40_spill] sm:$0xff] %v3282_v12  ;;  %1072 = vmatpush.msra.mxu3 %v3282_v12  ;;  %v3390_v7 = vld [vmem:[%s4337_s3 + $0xe8] sm:$0xff]  ;;  %v3395_v60 = vld [vmem:[%s4337_s3 + $0xf0] sm:$0xff] }
 0x193   :  { %4410 = vst [vmem:[#allocation33_spill] sm:$0xff] %v3187_v15  ;;  %1033 = vmatpush.msra.mxu1 %v3294_v26  ;;  %1053 = vmatpush.msra.mxu2 %v3299_v40 }
 0x194   :  { %1012 = vmatpush.msra.mxu0 %v3265_v36  ;;  %1073 = vmatpush.msra.mxu3 %v3306_v41  ;;  %4423 = vst [vmem:[#allocation46_spill] sm:$0xff] %v3354_v58 }
 0x195   :  { %1034 = vmatpush.msra.mxu1 %v3318_v45  ;;  %1054 = vmatpush.msra.mxu2 %v3323_v49 }
 0x196   :  { %1013 = vmatpush.msra.mxu0 %v3289_v37  ;;  %1074 = vmatpush.msra.mxu3 %v3330_v54 }
 0x197   :  { %v2310_v20 = vpop.eup %2309  ;;  %1035 = vmatpush.msra.mxu1 %v3342_v21  ;;  %1055 = vmatpush.msra.mxu2 %v3347_v57 }
 0x198   :  { %v711_v22 = vmul.f32 %v2310_v20, %v3187_v15  ;;  %1014 = vmatpush.msra.mxu0 %v3313_v44  ;;  %1075 = vmatpush.msra.mxu3 %v3354_v58  ;;  %v3402_v20 = vld [vmem:[%s4337_s3 + $0xf8] sm:$0xff]  ;;  %v3515_v15 = vld [vmem:[%s4337_s3 + $0x50] sm:$0xff] }
 0x199   :  { %1036 = vmatpush.msra.mxu1 %v3366_v62  ;;  %1056 = vmatpush.msra.mxu2 %v3371_v2  ;;  %4428 = vst [vmem:[#allocation51_spill] sm:$0xff] %v3515_v15 }
 0x19a   :  { %803 = vmatmul.f32.vlgmr.msrb.gmra.mxu0 %v711_v22  ;;  %823 = vmatmul.f32.vlgmr.msrb.gmra.mxu1 %v711_v22 }
 0x19b   :  { %843 = vmatmul.f32.vlgmr.msrb.gmra.mxu2 %v711_v22  ;;  %863 = vmatmul.f32.vlgmr.msrb.gmra.mxu3 %v711_v22  ;;  %v3409_v22 = vld [vmem:[%s4337_s3 + $0xc0] sm:$0xff] }
 0x19c   :  { %1015 = vmatpush.msra.mxu0 %v3337_v14  ;;  %1076 = vmatpush.msra.mxu3 %v3378_v3 }
 0x19d   :  { %1037 = vmatpush.msra.mxu1 %v3390_v7  ;;  %1057 = vmatpush.msra.mxu2 %v3395_v60 }
 0x19e   :  { %1016 = vmatpush.msra.mxu0 %v3361_v50  ;;  %1077 = vmatpush.msra.mxu3 %v3402_v20 }
 0x19f   :  { %1038 = vmatpush.msra.mxu1 %v3414_v17  ;;  %1058 = vmatpush.msra.mxu2 %v3419_v16 }
 0x1a0   :  { %1017 = vmatpush.msra.mxu0 %v3385_v6  ;;  %1078 = vmatpush.msra.mxu3 %v3426_v5 }
 0x1a1   :  { %1039 = vmatpush.msra.mxu1 %v3440_v61 }
 0x1a2   :  { %1018 = vmatpush.msra.mxu0 %v3409_v22 }
 0x1a3   :  { %1040 = vmatpush.msra.mxu1 %v3464_v56 }
 0x1a4   :  { %1019 = vmatpush.msra.mxu0 %v3435_v0 }
 0x1a5   :  { %1041 = vmatpush.msra.mxu1 %v3488_v52 }
 0x1a6   :  { %1020 = vmatpush.msra.mxu0 %v3459_v59 }
 0x1a7   :  { %1042 = vmatpush.msra.mxu1 %v3510_v46 }
 0x1a8   :  { %1021 = vmatpush.msra.mxu0 %v3481_v55 }
 0x1a9   :  { %1043 = vmatpush.msra.mxu1 %v3532_v42 }
 0x217   :  { %v804_v47 = vpop.f32.mrf.mxu0  ;;  %v824_v34 = vpop.f32.mrf.mxu1 }
 0x218   :  { %v867_v4 = vadd.f32 %v804_v47, %v3109_v29  ;;  %v868_v1 = vadd.f32 %v824_v34, %v3111_v30  ;;  %v3445_v29 = vld [vmem:[%s4337_s3 + $0xb0] sm:$0xff]  ;;  %v3452_v30 = vld [vmem:[%s4337_s3 + $0xb8] sm:$0xff] }
 0x219   :  { %1059 = vmatpush.msra.mxu2 %v3445_v29  ;;  %1079 = vmatpush.msra.mxu3 %v3452_v30 }
 0x21a   :  { %v2254_v34 = vmul.f32 -1.442695, %v867_v4  ;;  %v2255_v47 = vmul.f32 -1.442695, %v868_v1  ;;  %v3471_v1 = vld [vmem:[%s4337_s3 + $0x90] sm:$0xff]  ;;  %v3476_v4 = vld [vmem:[%s4337_s3 + $0x98] sm:$0xff] }
 0x21b   :  { %1060 = vmatpush.msra.mxu2 %v3471_v1  ;;  %1080 = vmatpush.msra.mxu3 %v3476_v4 }
 0x21c   :  { %2311 = vpow2.f32 %v2254_v34  ;;  %v3505_v34 = vld [vmem:[%s4337_s3 + $0x40] sm:$0xff] }
 0x21d   :  { %2313 = vpow2.f32 %v2255_v47  ;;  %4426 = vst [vmem:[#allocation49_spill] sm:$0xff] %v3505_v34  ;;  %1061 = vmatpush.msra.mxu2 %v3493_v51  ;;  %1081 = vmatpush.msra.mxu3 %v3498_v48  ;;  %v3545_v48 = vld [vmem:[%s4337_s3 + $0x38] sm:$0xff] }
 0x21e   :  { %v844_v47 = vpop.f32.mrf.mxu2  ;;  %1022 = vmatpush.msra.mxu0 %v3505_v34 }
 0x21f   :  { %v869_v39 = vadd.f32 %v844_v47, %v3114_v33  ;;  %1062 = vmatpush.msra.mxu2 %v3515_v15  ;;  %1082 = vmatpush.msra.mxu3 %v3522_v53  ;;  %v3552_v33 = vld [vmem:[%s4337_s3] sm:$0xff]  ;;  %v3557_v47 = vld [vmem:[%s4337_s3 + $0x8] sm:$0xff]  ;;  %v3564_v15 = vld [vmem:[%s4337_s3 + $0x10] sm:$0xff] }
 0x220   :  { %1023 = vmatpush.msra.mxu0 %v3527_v43  ;;  %v3569_v53 = vld [vmem:[%s4337_s3 + $0x18] sm:$0xff]  ;;  %1044 = vmatpush.msra.mxu1 %v3557_v47 }
 0x221   :  { %v2256_v46 = vmul.f32 -1.442695, %v869_v39  ;;  %1063 = vmatpush.msra.mxu2 %v3540_v38  ;;  %1083 = vmatpush.msra.mxu3 %v3545_v48 }
 0x222   :  { %v2312_v34 = vpop.eup %2311  ;;  %1024 = vmatpush.msra.mxu0 %v3552_v33  ;;  %1251 = vmatpush.msrb.mxu1 %v3198_v18 }
 0x223   :  { %v2314_v39 = vpop.eup %2313  ;;  %v3573_v51 = vadd.f32 1.0, %v2312_v34  ;;  %2315 = vpow2.f32 %v2256_v46  ;;  %1064 = vmatpush.msra.mxu2 %v3564_v15  ;;  %1084 = vmatpush.msra.mxu3 %v3569_v53  ;;  %v864_v46 = vpop.f32.mrf.mxu3 }
 0x224   :  { %v3577_v42 = vadd.f32 1.0, %v2314_v39  ;;  %1231 = vmatpush.msrb.mxu0 %v3193_v13  ;;  %1252 = vmatpush.msrb.mxu1 %v3222_v23 }
 0x225   :  { %2317 = vrcp.f32 %v3573_v51  ;;  %1271 = vmatpush.msrb.mxu2 %v3203_v8  ;;  %1291 = vmatpush.msrb.mxu3 %v3210_v19  ;;  %vm888_vm11 = vweird.f32 %v3573_v51 }
 0x226   :  { %2319 = vrcp.f32 %v3577_v42  ;;  %1232 = vmatpush.msrb.mxu0 %v3217_v11  ;;  %1253 = vmatpush.msrb.mxu1 %v3246_v28  ;;  %v870_v11 = vadd.f32 %v864_v46, %v3117_v35  ;;  %vm903_vm12 = vweird.f32 %v3577_v42 }
 0x227   :  { %1272 = vmatpush.msrb.mxu2 %v3227_v24  ;;  %1292 = vmatpush.msrb.mxu3 %v3234_v27 }
 0x228   :  { %1233 = vmatpush.msrb.mxu0 %v3241_v25  ;;  %1254 = vmatpush.msrb.mxu1 %v3270_v9  ;;  %v894_v9 = vand.u32 2147483648, %v3573_v51 }
 0x229   :  { %v2316_v34 = vpop.eup %2315  ;;  %1273 = vmatpush.msrb.mxu2 %v3251_v31  ;;  %1293 = vmatpush.msrb.mxu3 %v3258_v32 }
 0x22a   :  { %v3593_v39 = vadd.f32 1.0, %v2316_v34  ;;  %1234 = vmatpush.msrb.mxu0 %v3265_v36  ;;  %1255 = vmatpush.msrb.mxu1 %v3294_v26 }
 0x22b   :  { %v2318_v19 = vpop.eup %2317  ;;  %1274 = vmatpush.msrb.mxu2 %v3275_v10  ;;  %1294 = vmatpush.msrb.mxu3 %v3282_v12  ;;  %v909_v12 = vand.u32 2147483648, %v3577_v42 }
 0x22c   :  { %v2320_v24 = vpop.eup %2319  ;;  %v884_v27 = vmul.f32 %v2318_v19, %v3573_v51  ;;  %2321 = vrcp.f32 %v3593_v39  ;;  %1235 = vmatpush.msrb.mxu0 %v3289_v37  ;;  %1256 = vmatpush.msrb.mxu1 %v3318_v45  ;;  %vm889_vm9 = vweird.f32 %v2318_v19  ;;  %v892_v37 = vand.u32 2147483647, %v3573_v51 }
 0x22d   :  { %v899_v34 = vmul.f32 %v2320_v24, %v3577_v42  ;;  %1275 = vmatpush.msrb.mxu2 %v3299_v40  ;;  %1295 = vmatpush.msrb.mxu3 %v3306_v41  ;;  %2323 = vtanh.f32 %v870_v11  ;;  %vm904_vm10 = vweird.f32 %v2320_v24  ;;  %vm890_vm13 = vmor %vm888_vm11, %vm889_vm9  ;;  %v910_v51 = vor.u32 1.1754944e-38, %v909_v12 }
 0x22e   :  { %v885_v35 = vsub.f32 1.0, %v884_v27  ;;  %1236 = vmatpush.msrb.mxu0 %v3313_v44  ;;  %1257 = vmatpush.msrb.mxu1 %v3342_v21  ;;  %vm905_vm14 = vmor %vm903_vm12, %vm904_vm10  ;;  %vm893_vm15 = vcmp.eq.f32.partialorder %v892_v37, 8.507059e+37  ;;  %vm918_vm2 = vweird.f32 %v3593_v39 }
 0x22f   :  { %v900_v46 = vsub.f32 1.0, %v899_v34  ;;  %1276 = vmatpush.msrb.mxu2 %v3323_v49  ;;  %1296 = vmatpush.msrb.mxu3 %v3330_v54  ;;  %v907_v34 = vand.u32 2147483647, %v3577_v42 }
 0x230   :  { %v886_v10 = vmul.f32 %v2318_v19, %v885_v35  ;;  %1237 = vmatpush.msrb.mxu0 %v3337_v14  ;;  %1258 = vmatpush.msrb.mxu1 %v3366_v62 }
 0x231   :  { %v901_v27 = vmul.f32 %v2320_v24, %v900_v46  ;;  %1277 = vmatpush.msrb.mxu2 %v3347_v57  ;;  %1297 = vmatpush.msrb.mxu3 %v3354_v58  ;;  %v895_v46 = vor.u32 1.1754944e-38, %v894_v9  ;;  %vm908_vm0 = vcmp.eq.f32.partialorder %v907_v34, 8.507059e+37  ;;  %v4433_v34 = vld [vmem:[#allocation49_spill] sm:$0xff] }
 0x232   :  { %v3619_v11 = vpop.eup %2321  ;;  %v887_v45 = vadd.f32 %v2318_v19, %v886_v10  ;;  %1238 = vmatpush.msrb.mxu0 %v3361_v50  ;;  %1259 = vmatpush.msrb.mxu1 %v3390_v7 }
 0x233   :  { %v914_v35 = vmul.f32 %v3619_v11, %v3593_v39  ;;  %v902_v14 = vadd.f32 %v2320_v24, %v901_v27  ;;  %1278 = vmatpush.msrb.mxu2 %v3371_v2  ;;  %1298 = vmatpush.msrb.mxu3 %v3378_v3  ;;  %v2324_v42 = vpop.eup %2323  ;;  %vm919_vm1 = vweird.f32 %v3619_v11 }
 0x234   :  { %v891_v10 = vsel %vm890_vm13, %v2318_v19, %v887_v45  ;;  %1239 = vmatpush.msrb.mxu0 %v3385_v6  ;;  %1260 = vmatpush.msrb.mxu1 %v3414_v17  ;;  %v922_v45 = vand.u32 2147483647, %v3593_v39  ;;  %vm920_vm3 = vmor %vm918_vm2, %vm919_vm1 }
 0x235   :  { %v915_v58 = vsub.f32 1.0, %v914_v35  ;;  %v896_v57 = vsel %vm893_vm15, %v895_v46, %v891_v10  ;;  %v906_v21 = vsel %vm905_vm14, %v2320_v24, %v902_v14  ;;  %1279 = vmatpush.msrb.mxu2 %v3395_v60  ;;  %1299 = vmatpush.msrb.mxu3 %v3402_v20  ;;  %v4434_v35 = vld [vmem:[#allocation50_spill] sm:$0xff]  ;;  %v4436_v46 = vld [vmem:[#allocation52_spill] sm:$0xff] }
 0x236   :  { %v911_v9 = vsel %vm908_vm0, %v910_v51, %v906_v21  ;;  %v930_v27 = vmul.f32 %v2324_v42, %v896_v57  ;;  %1240 = vmatpush.msrb.mxu0 %v3409_v22  ;;  %1261 = vmatpush.msrb.mxu1 %v3440_v61  ;;  %v4431_v21 = vld [vmem:[#allocation47_spill] sm:$0xff]  ;;  %v4432_v57 = vld [vmem:[#allocation48_spill] sm:$0xff]  ;;  %vm923_vm4 = vcmp.eq.f32.partialorder %v922_v45, 8.507059e+37 }
 0x237   :  { %v916_v19 = vmul.f32 %v3619_v11, %v915_v58  ;;  %v929_v12 = vmul.f32 %v911_v9, %v3184_v63  ;;  %1280 = vmatpush.msrb.mxu2 %v3419_v16  ;;  %1300 = vmatpush.msrb.mxu3 %v3426_v5  ;;  %v924_v63 = vand.u32 2147483648, %v3593_v39  ;;  %v4435_v39 = vld [vmem:[#allocation51_spill] sm:$0xff]  ;;  %v4438_v9 = vld [vmem:[#allocation34_spill] sm:$0xff] }
 0x238   :  { %1241 = vmatpush.msrb.mxu0 %v3435_v0  ;;  %1262 = vmatpush.msrb.mxu1 %v3464_v56 }
 0x239   :  { %v3643_v24 = vadd.f32 %v930_v27, %v929_v12  ;;  %v917_v37 = vadd.f32 %v3619_v11, %v916_v19  ;;  %1281 = vmatpush.msrb.mxu2 %v3445_v29  ;;  %1301 = vmatpush.msrb.mxu3 %v3452_v30  ;;  %v925_v58 = vor.u32 1.1754944e-38, %v924_v63  ;;  %v4439_v27 = vld [vmem:[#allocation35_spill] sm:$0xff]  ;;  %v4440_v19 = vld [vmem:[#allocation36_spill] sm:$0xff]  ;;  %v4441_v12 = vld [vmem:[#allocation37_spill] sm:$0xff] }
 0x23a   :  { %1242 = vmatpush.msrb.mxu0 %v3459_v59  ;;  %1263 = vmatpush.msrb.mxu1 %v3488_v52 }
 0x23b   :  { %2325 = vtanh.f32 %v3643_v24  ;;  %1282 = vmatpush.msrb.mxu2 %v3471_v1  ;;  %1302 = vmatpush.msrb.mxu3 %v3476_v4  ;;  %v921_v14 = vsel %vm920_vm3, %v3619_v11, %v917_v37  ;;  %v4437_v11 = vld [vmem:[#allocation53_spill] sm:$0xff] }
 0x23c   :  { %1243 = vmatpush.msrb.mxu0 %v3481_v55  ;;  %1264 = vmatpush.msrb.mxu1 %v4434_v35  ;;  %v3668_v10 = vsel %vm923_vm4, %v925_v58, %v921_v14 }
 0x23d   :  { %1283 = vmatpush.msrb.mxu2 %v4431_v21  ;;  %1303 = vmatpush.msrb.mxu3 %v4432_v57 }
 0x23e   :  { %1244 = vmatpush.msrb.mxu0 %v4433_v34  ;;  %1265 = vmatpush.msrb.mxu1 %v4437_v11 }
 0x23f   :  { %1284 = vmatpush.msrb.mxu2 %v4435_v39  ;;  %1304 = vmatpush.msrb.mxu3 %v4436_v46 }
 0x240   :  { %1245 = vmatpush.msrb.mxu0 %v3527_v43  ;;  %1266 = vmatpush.msrb.mxu1 %v3557_v47 }
 0x241   :  { %v2326_v51 = vpop.eup %2325  ;;  %1285 = vmatpush.msrb.mxu2 %v3540_v38  ;;  %1305 = vmatpush.msrb.mxu3 %v3545_v48 }
 0x242   :  { %v933_v42 = vmul.f32 %v2326_v51, %v3668_v10  ;;  %1246 = vmatpush.msrb.mxu0 %v3552_v33 }
 0x243   :  { %1286 = vmatpush.msrb.mxu2 %v3564_v15  ;;  %1306 = vmatpush.msrb.mxu3 %v3569_v53 }
 0x244   :  { %1025 = vmatmul.f32.vlgmr.msra.gmra.mxu0 %v933_v42  ;;  %1045 = vmatmul.f32.vlgmr.msra.gmra.mxu1 %v933_v42 }
 0x245   :  { %1065 = vmatmul.f32.vlgmr.msra.gmra.mxu2 %v933_v42  ;;  %1085 = vmatmul.f32.vlgmr.msra.gmra.mxu3 %v933_v42 }
 0x246   :  { %1453 = vmatpush.msra.mxu0 %v3193_v13  ;;  %1473 = vmatpush.msra.mxu1 %v3198_v18  ;;  %v4442_v13 = vld [vmem:[#allocation38_spill] sm:$0xff]  ;;  %v4443_v18 = vld [vmem:[#allocation39_spill] sm:$0xff] }
 0x247   :  { %1493 = vmatpush.msra.mxu2 %v3203_v8  ;;  %1513 = vmatpush.msra.mxu3 %v4438_v9  ;;  %v4444_v8 = vld [vmem:[#allocation40_spill] sm:$0xff] }
 0x248   :  { %1454 = vmatpush.msra.mxu0 %v4439_v27  ;;  %1474 = vmatpush.msra.mxu1 %v3222_v23  ;;  %v4445_v23 = vld [vmem:[#allocation41_spill] sm:$0xff] }
 0x249   :  { %1494 = vmatpush.msra.mxu2 %v4440_v19  ;;  %1514 = vmatpush.msra.mxu3 %v4441_v12 }
 0x24a   :  { %1455 = vmatpush.msra.mxu0 %v3241_v25  ;;  %1475 = vmatpush.msra.mxu1 %v3246_v28  ;;  %v4446_v25 = vld [vmem:[#allocation42_spill] sm:$0xff]  ;;  %v4447_v28 = vld [vmem:[#allocation43_spill] sm:$0xff] }
 0x24b   :  { %1495 = vmatpush.msra.mxu2 %v3251_v31  ;;  %1515 = vmatpush.msra.mxu3 %v3258_v32  ;;  %v4448_v31 = vld [vmem:[#allocation44_spill] sm:$0xff]  ;;  %v4449_v32 = vld [vmem:[#allocation45_spill] sm:$0xff] }
 0x24c   :  { %1456 = vmatpush.msra.mxu0 %v3265_v36  ;;  %1476 = vmatpush.msra.mxu1 %v4442_v13  ;;  %v4450_v36 = vld [vmem:[#allocation46_spill] sm:$0xff] }
 0x24d   :  { %1496 = vmatpush.msra.mxu2 %v4443_v18  ;;  %1516 = vmatpush.msra.mxu3 %v4444_v8 }
 0x24e   :  { %1457 = vmatpush.msra.mxu0 %v4445_v23  ;;  %1477 = vmatpush.msra.mxu1 %v3294_v26 }
 0x24f   :  { %1497 = vmatpush.msra.mxu2 %v3299_v40  ;;  %1517 = vmatpush.msra.mxu3 %v3306_v41 }
 0x250   :  { %1458 = vmatpush.msra.mxu0 %v3313_v44  ;;  %1478 = vmatpush.msra.mxu1 %v4446_v25 }
 0x251   :  { %1498 = vmatpush.msra.mxu2 %v3323_v49  ;;  %1518 = vmatpush.msra.mxu3 %v3330_v54 }
 0x252   :  { %1459 = vmatpush.msra.mxu0 %v4447_v28  ;;  %1479 = vmatpush.msra.mxu1 %v4448_v31 }
 0x253   :  { %1499 = vmatpush.msra.mxu2 %v4449_v32  ;;  %1519 = vmatpush.msra.mxu3 %v4450_v36 }
 0x254   :  { %1460 = vmatpush.msra.mxu0 %v3361_v50  ;;  %1480 = vmatpush.msra.mxu1 %v3366_v62  ;;  %v4454_v50 = vld [vmem:[#allocation15_spill] sm:$0xff] }
 0x255   :  { %1500 = vmatpush.msra.mxu2 %v3371_v2  ;;  %1520 = vmatpush.msra.mxu3 %v3378_v3 }
 0x256   :  { %1461 = vmatpush.msra.mxu0 %v3385_v6  ;;  %1481 = vmatpush.msra.mxu1 %v3390_v7  ;;  %v2460_v7 = vmov 1983009808  }
 0x257   :  { %1501 = vmatpush.msra.mxu2 %v3395_v60  ;;  %1521 = vmatpush.msra.mxu3 %v3402_v20  ;;  %v2062_v60 = vunpack.c.l.s4 %v2460_v7 }
 0x258   :  { %1462 = vmatpush.msra.mxu0 %v3409_v22  ;;  %1482 = vmatpush.msra.mxu1 %v3414_v17 }
 0x259   :  { %1502 = vmatpush.msra.mxu2 %v3419_v16  ;;  %1522 = vmatpush.msra.mxu3 %v3426_v5  ;;  %v3748_v14 = vunpack.c.0.s8 %v2062_v60 }
 0x25a   :  { %1463 = vmatpush.msra.mxu0 %v3435_v0  ;;  %1483 = vmatpush.msra.mxu1 %v3440_v61  ;;  %v4452_v61 = vld [vmem:[#allocation13_spill] sm:$0xff] }
 0x25b   :  { %1503 = vmatpush.msra.mxu2 %v3445_v29  ;;  %1523 = vmatpush.msra.mxu3 %v3452_v30  ;;  %4456 = vst [vmem:[#allocation47_spill] sm:$0xff] %v3748_v14 }
 0x25c   :  { %1464 = vmatpush.msra.mxu0 %v3459_v59  ;;  %1484 = vmatpush.msra.mxu1 %v3464_v56  ;;  %v4451_v56 = vld [vmem:[#allocation12_spill] sm:$0xff] }
 0x25d   :  { %1504 = vmatpush.msra.mxu2 %v3471_v1  ;;  %1524 = vmatpush.msra.mxu3 %v3476_v4 }
 0x25e   :  { %1465 = vmatpush.msra.mxu0 %v3481_v55  ;;  %1485 = vmatpush.msra.mxu1 %v3488_v52 }
 0x25f   :  { %1505 = vmatpush.msra.mxu2 %v4431_v21  ;;  %1525 = vmatpush.msra.mxu3 %v4432_v57 }
 0x260   :  { %1466 = vmatpush.msra.mxu0 %v4433_v34  ;;  %1486 = vmatpush.msra.mxu1 %v4434_v35  ;;  %v2056_v35 = vrot.slane %v3668_v10, 4 }
 0x261   :  { %1506 = vmatpush.msra.mxu2 %v4435_v39  ;;  %1526 = vmatpush.msra.mxu3 %v4436_v46 }
 0x262   :  { %1467 = vmatpush.msra.mxu0 %v3527_v43  ;;  %1487 = vmatpush.msra.mxu1 %v4437_v11 }
 0x263   :  { %1507 = vmatpush.msra.mxu2 %v3540_v38  ;;  %1527 = vmatpush.msra.mxu3 %v3545_v48  ;;  %v4453_v48 = vld [vmem:[#allocation14_spill] sm:$0xff] }
 0x264   :  { %1468 = vmatpush.msra.mxu0 %v3552_v33  ;;  %1488 = vmatpush.msra.mxu1 %v3557_v47  ;;  %v4455_v33 = vld [vmem:[#allocation32_spill] sm:$0xff] }
 0x265   :  { %1508 = vmatpush.msra.mxu2 %v3564_v15  ;;  %1528 = vmatpush.msra.mxu3 %v3569_v53  ;;  %v2059_v47 = vrot.slane %v4455_v33, 4  ;;  %v2058_v25 = vsel %vm2057_vm7, %v2056_v35, %v4455_v33 }
 0x267   :  { %v2060_v27 = vsel %vm2057_vm7, %v3668_v10, %v2059_v47  ;;  %v4457_v10 = vld [vmem:[#allocation33_spill] sm:$0xff] }
 0x268   :  { %v2068_v32 = vperm.slane %v2060_v27, %v3748_v14 }
 0x2c1   :  { %v1026_v52 = vpop.f32.mrf.mxu0  ;;  %v1046_v55 = vpop.f32.mrf.mxu1 }
 0x2c2   :  { %v1089_v59 = vadd.f32 %v1026_v52, %v4451_v56  ;;  %v1090_v43 = vadd.f32 %v1046_v55, %v4452_v61  ;;  %v2071_v52 = vrot.slane %v4457_v10, 4 }
 0x2c4   :  { %v2257_v0 = vmul.f32 -1.442695, %v1089_v59  ;;  %v2258_v5 = vmul.f32 -1.442695, %v1090_v43  ;;  %v2119_v43 = vrot.slane %v2068_v32, 4 }
 0x2c6   :  { %2327 = vpow2.f32 %v2257_v0 }
 0x2c7   :  { %2329 = vpow2.f32 %v2258_v5 }
 0x2c8   :  { %v1066_v38 = vpop.f32.mrf.mxu2  ;;  %v1086_v53 = vpop.f32.mrf.mxu3 }
 0x2c9   :  { %v1091_v16 = vadd.f32 %v1066_v38, %v4453_v48  ;;  %v1092_v62 = vadd.f32 %v1086_v53, %v4454_v50  ;;  %v4462_v50 = vld [vmem:[#allocation16_spill] sm:$0xff] }
 0x2cb   :  { %v2259_v17 = vmul.f32 -1.442695, %v1091_v16 }
 0x2cc   :  { %v2328_v26 = vpop.eup %2327 }
 0x2cd   :  { %v2330_v40 = vpop.eup %2329  ;;  %v1102_v41 = vadd.f32 1.0, %v2328_v26  ;;  %2331 = vpow2.f32 %v2259_v17 }
 0x2ce   :  { %v1103_v15 = vadd.f32 1.0, %v2330_v40 }
 0x2cf   :  { %2333 = vrcp.f32 %v1102_v41  ;;  %v1116_v29 = vand.u32 2147483648, %v1102_v41  ;;  %v1114_v4 = vand.u32 2147483647, %v1102_v41  ;;  %vm1110_vm8 = vweird.f32 %v1102_v41 }
 0x2d0   :  { %2335 = vrcp.f32 %v1103_v15  ;;  %v1131_v30 = vand.u32 2147483648, %v1103_v15  ;;  %v1129_v63 = vand.u32 2147483647, %v1103_v15  ;;  %vm1125_vm9 = vweird.f32 %v1103_v15 }
 0x2d1   :  { %v1117_v58 = vor.u32 1.1754944e-38, %v1116_v29  ;;  %vm1115_vm12 = vcmp.eq.f32.partialorder %v1114_v4, 8.507059e+37 }
 0x2d2   :  { %v1132_v39 = vor.u32 1.1754944e-38, %v1131_v30  ;;  %vm1130_vm13 = vcmp.eq.f32.partialorder %v1129_v63, 8.507059e+37 }
 0x2d3   :  { %v2332_v44 = vpop.eup %2331 }
 0x2d4   :  { %v1104_v49 = vadd.f32 1.0, %v2332_v44 }
 0x2d5   :  { %v2334_v54 = vpop.eup %2333 }
 0x2d6   :  { %v2336_v2 = vpop.eup %2335  ;;  %v1106_v3 = vmul.f32 %v2334_v54, %v1102_v41  ;;  %2337 = vrcp.f32 %v1104_v49  ;;  %vm1111_vm5 = vweird.f32 %v2334_v54  ;;  %v1146_v13 = vand.u32 2147483648, %v1104_v49 }
 0x2d7   :  { %v1121_v6 = vmul.f32 %v2336_v2, %v1103_v15  ;;  %2339 = vtanh.f32 %v1092_v62  ;;  %vm1126_vm6 = vweird.f32 %v2336_v2  ;;  %vm1112_vm10 = vmor %vm1110_vm8, %vm1111_vm5  ;;  %v1144_v23 = vand.u32 2147483647, %v1104_v49 }
 0x2d8   :  { %v1107_v20 = vsub.f32 1.0, %v1106_v3  ;;  %vm1127_vm11 = vmor %vm1125_vm9, %vm1126_vm6  ;;  %vm1140_vm15 = vweird.f32 %v1104_v49  ;;  %v1147_v36 = vor.u32 1.1754944e-38, %v1146_v13 }
 0x2d9   :  { %v1122_v22 = vsub.f32 1.0, %v1121_v6  ;;  %vm1145_vm1 = vcmp.eq.f32.partialorder %v1144_v23, 8.507059e+37 }
 0x2da   :  { %v1108_v1 = vmul.f32 %v2334_v54, %v1107_v20  ;;  %v4464_v20 = vld [vmem:[#allocation18_spill] sm:$0xff] }
 0x2db   :  { %v1123_v37 = vmul.f32 %v2336_v2, %v1122_v22 }
 0x2dc   :  { %v2338_v45 = vpop.eup %2337  ;;  %v1109_v21 = vadd.f32 %v2334_v54, %v1108_v1 }
 0x2dd   :  { %v1136_v57 = vmul.f32 %v2338_v45, %v1104_v49  ;;  %v1124_v34 = vadd.f32 %v2336_v2, %v1123_v37  ;;  %v2340_v51 = vpop.eup %2339  ;;  %vm1141_vm14 = vweird.f32 %v2338_v45 }
 0x2de   :  { %v1113_v46 = vsel %vm1112_vm10, %v2334_v54, %v1109_v21  ;;  %vm1142_vm0 = vmor %vm1140_vm15, %vm1141_vm14  ;;  %v4465_v21 = vld [vmem:[#allocation19_spill] sm:$0xff] }
 0x2df   :  { %v1137_v11 = vsub.f32 1.0, %v1136_v57  ;;  %v1118_v42 = vsel %vm1115_vm12, %v1117_v58, %v1113_v46  ;;  %v1128_v9 = vsel %vm1127_vm11, %v2336_v2, %v1124_v34  ;;  %v4463_v2 = vld [vmem:[#allocation17_spill] sm:$0xff] }
 0x2e0   :  { %v1133_v19 = vsel %vm1130_vm13, %v1132_v39, %v1128_v9  ;;  %v1152_v12 = vmul.f32 %v2340_v51, %v1118_v42 }
 0x2e1   :  { %v1138_v18 = vmul.f32 %v2338_v45, %v1137_v11  ;;  %v1151_v8 = vmul.f32 %v1133_v19, %v3643_v24  ;;  %v2064_v24 = vperm.slane %v2058_v25, %v3748_v14 }
 0x2e3   :  { %v3756_v28 = vadd.f32 %v1152_v12, %v1151_v8  ;;  %v1139_v31 = vadd.f32 %v2338_v45, %v1138_v18  ;;  %v2107_v38 = vrot.slane %v2064_v24, 4 }
 0x2e5   :  { %2341 = vtanh.f32 %v3756_v28  ;;  %v1143_v55 = vsel %vm1142_vm0, %v2338_v45, %v1139_v31 }
 0x2e6   :  { %v1148_v56 = vsel %vm1145_vm1, %v1147_v36, %v1143_v55 }
 0x2e7   :  { %v2069_v59 = vrot.slane %v1148_v56, 4  ;;  %v2072_v61 = vsel %vm2057_vm7, %v1148_v56, %v2071_v52 }
 0x2e8   :  { %v2080_v0 = vperm.slane %v2072_v61, %v3748_v14 }
 0x2e9   :  { %v2070_v5 = vsel %vm2057_vm7, %v2069_v59, %v4457_v10 }
 0x2ea   :  { %v2076_v48 = vperm.slane %v2070_v5, %v3748_v14  ;;  %v2117_v16 = vrot.slane %v2080_v0, 4  ;;  %v3768_v17 = vsel %vm2057_vm7, %v2080_v0, %v2119_v43  ;;  %v4140_v14 = vld [vmem:[%s4337_s3 + $0x30] sm:$0xff] }
 0x2eb   :  { %4458 = vst [vmem:[#allocation48_spill] sm:$0xff] %v3768_v17  ;;  %v2342_v26 = vpop.eup %2341  ;;  %v4475_v17 = vld [vmem:[#allocation22_spill] sm:$0xff] }
 0x2ec   :  { %v1155_v40 = vmul.f32 %v2342_v26, %v1148_v56  ;;  %v2105_v41 = vrot.slane %v2076_v48, 4  ;;  %v3771_v15 = vsel %vm2057_vm7, %v2076_v48, %v2107_v38  ;;  %v3774_v53 = vsel %vm2057_vm7, %v2117_v16, %v2068_v32 }
 0x2ed   :  { %4459 = vst [vmem:[#allocation49_spill] sm:$0xff] %v3771_v15  ;;  %v4127_v15 = vld [vmem:[%s4337_s3 + $0x20] sm:$0xff] }
 0x2ee   :  { %4460 = vst [vmem:[#allocation50_spill] sm:$0xff] %v3774_v53  ;;  %1247 = vmatmul.f32.vlgmr.msrb.gmra.mxu0 %v1155_v40  ;;  %v3777_v44 = vsel %vm2057_vm7, %v2105_v41, %v2064_v24  ;;  %1267 = vmatmul.f32.vlgmr.msrb.gmra.mxu1 %v1155_v40  ;;  %v3798_v41 = vld [vmem:[%s4337_s3 + $0x1e8] sm:$0xff] }
 0x2ef   :  { %4461 = vst [vmem:[#allocation51_spill] sm:$0xff] %v3777_v44  ;;  %1287 = vmatmul.f32.vlgmr.msrb.gmra.mxu2 %v1155_v40  ;;  %1307 = vmatmul.f32.vlgmr.msrb.gmra.mxu3 %v1155_v40  ;;  %v4132_v44 = vld [vmem:[%s4337_s3 + $0x28] sm:$0xff] }
 0x2f0   :  { %1695 = vmatpush.msrb.mxu1 %v3798_v41  ;;  %4474 = vst [vmem:[#allocation38_spill] sm:$0xff] %v4132_v44 }
 0x36b   :  { %v1248_v49 = vpop.f32.mrf.mxu0  ;;  %v1268_v54 = vpop.f32.mrf.mxu1 }
 0x36c   :  { %v1311_v62 = vadd.f32 %v1248_v49, %v4462_v50  ;;  %v1312_v3 = vadd.f32 %v1268_v54, %v4463_v2  ;;  %v3803_v49 = vld [vmem:[%s4337_s3 + $0x1f0] sm:$0xff]  ;;  %v3810_v54 = vld [vmem:[%s4337_s3 + $0x1f8] sm:$0xff]  ;;  %v3817_v50 = vld [vmem:[%s4337_s3 + $0x1c0] sm:$0xff] }
 0x36d   :  { %1715 = vmatpush.msrb.mxu2 %v3803_v49  ;;  %1735 = vmatpush.msrb.mxu3 %v3810_v54  ;;  %v3827_v2 = vld [vmem:[%s4337_s3 + $0x1d0] sm:$0xff] }
 0x36e   :  { %v2260_v6 = vmul.f32 -1.442695, %v1311_v62  ;;  %v2261_v7 = vmul.f32 -1.442695, %v1312_v3  ;;  %v3822_v62 = vld [vmem:[%s4337_s3 + $0x1c8] sm:$0xff]  ;;  %v3834_v3 = vld [vmem:[%s4337_s3 + $0x1d8] sm:$0xff] }
 0x36f   :  { %1696 = vmatpush.msrb.mxu1 %v3822_v62  ;;  %1716 = vmatpush.msrb.mxu2 %v3827_v2 }
 0x370   :  { %2343 = vpow2.f32 %v2260_v6  ;;  %1736 = vmatpush.msrb.mxu3 %v3834_v3  ;;  %v3841_v6 = vld [vmem:[%s4337_s3 + $0x1a0] sm:$0xff] }
 0x371   :  { %2345 = vpow2.f32 %v2261_v7  ;;  %v3846_v7 = vld [vmem:[%s4337_s3 + $0x1a8] sm:$0xff] }
 0x372   :  { %v1288_v60 = vpop.f32.mrf.mxu2  ;;  %v1308_v47 = vpop.f32.mrf.mxu3  ;;  %1697 = vmatpush.msrb.mxu1 %v3846_v7 }
 0x373   :  { %v1313_v22 = vadd.f32 %v1288_v60, %v4464_v20  ;;  %v1314_v57 = vadd.f32 %v1308_v47, %v4465_v21  ;;  %v3851_v60 = vld [vmem:[%s4337_s3 + $0x1b0] sm:$0xff]  ;;  %v3858_v20 = vld [vmem:[%s4337_s3 + $0x1b8] sm:$0xff] }
 0x374   :  { %1717 = vmatpush.msrb.mxu2 %v3851_v60  ;;  %1737 = vmatpush.msrb.mxu3 %v3858_v20  ;;  %v3899_v47 = vld [vmem:[%s4337_s3 + $0x170] sm:$0xff] }
 0x375   :  { %v2262_v29 = vmul.f32 -1.442695, %v1313_v22  ;;  %v3865_v22 = vld [vmem:[%s4337_s3 + $0x180] sm:$0xff]  ;;  %v3923_v21 = vld [vmem:[%s4337_s3 + $0x150] sm:$0xff] }
 0x376   :  { %v2344_v30 = vpop.eup %2343 }
 0x377   :  { %v2346_v1 = vpop.eup %2345  ;;  %v1324_v4 = vadd.f32 1.0, %v2344_v30  ;;  %2347 = vpow2.f32 %v2262_v29  ;;  %v3870_v29 = vld [vmem:[%s4337_s3 + $0x188] sm:$0xff]  ;;  %v3875_v30 = vld [vmem:[%s4337_s3 + $0x190] sm:$0xff] }
 0x378   :  { %v1325_v33 = vadd.f32 1.0, %v2346_v1  ;;  %1698 = vmatpush.msrb.mxu1 %v3870_v29  ;;  %v3882_v1 = vld [vmem:[%s4337_s3 + $0x198] sm:$0xff]  ;;  %1718 = vmatpush.msrb.mxu2 %v3875_v30 }
 0x379   :  { %2349 = vrcp.f32 %v1324_v4  ;;  %v1338_v51 = vand.u32 2147483648, %v1324_v4  ;;  %v1336_v9 = vand.u32 2147483647, %v1324_v4  ;;  %vm1332_vm4 = vweird.f32 %v1324_v4  ;;  %1738 = vmatpush.msrb.mxu3 %v3882_v1 }
 0x37a   :  { %2351 = vrcp.f32 %v1325_v33  ;;  %v1353_v11 = vand.u32 2147483648, %v1325_v33  ;;  %v1351_v19 = vand.u32 2147483647, %v1325_v33  ;;  %vm1347_vm5 = vweird.f32 %v1325_v33  ;;  %1719 = vmatpush.msrb.mxu2 %v3899_v47 }
 0x37b   :  { %v1339_v8 = vor.u32 1.1754944e-38, %v1338_v51  ;;  %vm1337_vm9 = vcmp.eq.f32.partialorder %v1336_v9, 8.507059e+37  ;;  %v3966_v51 = vld [vmem:[%s4337_s3 + $0x108] sm:$0xff]  ;;  %v3985_v9 = vld [vmem:[%s4337_s3 + $0xe0] sm:$0xff] }
 0x37c   :  { %v1354_v25 = vor.u32 1.1754944e-38, %v1353_v11  ;;  %vm1352_vm10 = vcmp.eq.f32.partialorder %v1351_v19, 8.507059e+37  ;;  %1720 = vmatpush.msrb.mxu2 %v3923_v21  ;;  %v3971_v11 = vld [vmem:[%s4337_s3 + $0x110] sm:$0xff] }
 0x37d   :  { %v2348_v37 = vpop.eup %2347  ;;  %v3995_v19 = vld [vmem:[%s4337_s3 + $0xf0] sm:$0xff] }
 0x37e   :  { %v1326_v63 = vadd.f32 1.0, %v2348_v37  ;;  %v3906_v37 = vld [vmem:[%s4337_s3 + $0x178] sm:$0xff] }
 0x37f   :  { %v2350_v45 = vpop.eup %2349  ;;  %1739 = vmatpush.msrb.mxu3 %v3906_v37 }
 0x380   :  { %v2352_v58 = vpop.eup %2351  ;;  %v1328_v34 = vmul.f32 %v2350_v45, %v1324_v4  ;;  %2353 = vrcp.f32 %v1326_v63  ;;  %vm1333_vm2 = vweird.f32 %v2350_v45  ;;  %v1368_v0 = vand.u32 2147483648, %v1326_v63  ;;  %v3889_v4 = vld [vmem:[%s4337_s3 + $0x160] sm:$0xff] }
 0x381   :  { %v1343_v35 = vmul.f32 %v2352_v58, %v1325_v33  ;;  %2355 = vtanh.f32 %v1314_v57  ;;  %vm1348_vm3 = vweird.f32 %v2352_v58  ;;  %vm1334_vm6 = vmor %vm1332_vm4, %vm1333_vm2  ;;  %vm1362_vm12 = vweird.f32 %v1326_v63  ;;  %v3894_v33 = vld [vmem:[%s4337_s3 + $0x168] sm:$0xff]  ;;  %v3930_v57 = vld [vmem:[%s4337_s3 + $0x158] sm:$0xff] }
 0x382   :  { %v1329_v39 = vsub.f32 1.0, %v1328_v34  ;;  %vm1349_vm8 = vmor %vm1347_vm5, %vm1348_vm3  ;;  %v1366_v5 = vand.u32 2147483647, %v1326_v63  ;;  %v1369_v48 = vor.u32 1.1754944e-38, %v1368_v0  ;;  %1699 = vmatpush.msrb.mxu1 %v3894_v33  ;;  %1740 = vmatpush.msrb.mxu3 %v3930_v57  ;;  %v3942_v34 = vld [vmem:[%s4337_s3 + $0x128] sm:$0xff] }
 0x383   :  { %v1344_v46 = vsub.f32 1.0, %v1343_v35  ;;  %v3947_v35 = vld [vmem:[%s4337_s3 + $0x130] sm:$0xff] }
 0x384   :  { %v1330_v42 = vmul.f32 %v2350_v45, %v1329_v39  ;;  %vm1367_vm14 = vcmp.eq.f32.partialorder %v1366_v5, 8.507059e+37  ;;  %v3954_v39 = vld [vmem:[%s4337_s3 + $0x138] sm:$0xff]  ;;  %1721 = vmatpush.msrb.mxu2 %v3947_v35  ;;  %v4059_v5 = vld [vmem:[%s4337_s3 + $0x80] sm:$0xff] }
 0x385   :  { %v1345_v27 = vmul.f32 %v2352_v58, %v1344_v46  ;;  %1741 = vmatpush.msrb.mxu3 %v3954_v39  ;;  %v3961_v46 = vld [vmem:[%s4337_s3 + $0x100] sm:$0xff] }
 0x386   :  { %v2354_v12 = vpop.eup %2353  ;;  %v1331_v13 = vadd.f32 %v2350_v45, %v1330_v42  ;;  %v3978_v42 = vld [vmem:[%s4337_s3 + $0x118] sm:$0xff]  ;;  %1722 = vmatpush.msrb.mxu2 %v3971_v11 }
 0x387   :  { %v1358_v18 = vmul.f32 %v2354_v12, %v1326_v63  ;;  %v1346_v23 = vadd.f32 %v2352_v58, %v1345_v27  ;;  %v2356_v32 = vpop.eup %2355  ;;  %vm1363_vm11 = vweird.f32 %v2354_v12  ;;  %v3913_v63 = vld [vmem:[%s4337_s3 + $0x140] sm:$0xff]  ;;  %1742 = vmatpush.msrb.mxu3 %v3978_v42  ;;  %v3990_v27 = vld [vmem:[%s4337_s3 + $0xe8] sm:$0xff] }
 0x388   :  { %v1335_v31 = vsel %vm1334_vm6, %v2350_v45, %v1331_v13  ;;  %vm1364_vm13 = vmor %vm1362_vm12, %vm1363_vm11  ;;  %v3918_v45 = vld [vmem:[%s4337_s3 + $0x148] sm:$0xff]  ;;  %1723 = vmatpush.msrb.mxu2 %v3995_v19  ;;  %v4009_v13 = vld [vmem:[%s4337_s3 + $0xc0] sm:$0xff] }
 0x389   :  { %v1359_v36 = vsub.f32 1.0, %v1358_v18  ;;  %v1340_v10 = vsel %vm1337_vm9, %v1339_v8, %v1335_v31  ;;  %v1350_v52 = vsel %vm1349_vm8, %v2352_v58, %v1346_v23  ;;  %1700 = vmatpush.msrb.mxu1 %v3918_v45  ;;  %v3937_v58 = vld [vmem:[%s4337_s3 + $0x120] sm:$0xff]  ;;  %v4014_v18 = vld [vmem:[%s4337_s3 + $0xc8] sm:$0xff]  ;;  %v4019_v8 = vld [vmem:[%s4337_s3 + $0xd0] sm:$0xff] }
 0x38a   :  { %v1355_v55 = vsel %vm1352_vm10, %v1354_v25, %v1350_v52  ;;  %v1374_v24 = vmul.f32 %v2356_v32, %v1340_v10  ;;  %v4026_v31 = vld [vmem:[%s4337_s3 + $0xd8] sm:$0xff]  ;;  %v4467_v32 = vld [vmem:[#allocation20_spill] sm:$0xff]  ;;  %v4468_v10 = vld [vmem:[#allocation21_spill] sm:$0xff]  ;;  %1724 = vmatpush.msrb.mxu2 %v4019_v8 }
 0x38b   :  { %v1360_v56 = vmul.f32 %v2354_v12, %v1359_v36  ;;  %v1373_v59 = vmul.f32 %v1355_v55, %v3756_v28  ;;  %v3793_v28 = vld [vmem:[%s4337_s3 + $0x1e0] sm:$0xff]  ;;  %1701 = vmatpush.msrb.mxu1 %v3942_v34 }
 0x38c   :  { %1675 = vmatpush.msrb.mxu0 %v3793_v28  ;;  %v4035_v55 = vld [vmem:[%s4337_s3 + $0xa0] sm:$0xff] }
 0x38d   :  { %v3784_v61 = vadd.f32 %v1374_v24, %v1373_v59  ;;  %v1361_v43 = vadd.f32 %v2354_v12, %v1360_v56  ;;  %1702 = vmatpush.msrb.mxu1 %v3966_v51  ;;  %v4040_v24 = vld [vmem:[%s4337_s3 + $0xa8] sm:$0xff]  ;;  %v4045_v56 = vld [vmem:[%s4337_s3 + $0xb0] sm:$0xff]  ;;  %v4052_v59 = vld [vmem:[%s4337_s3 + $0xb8] sm:$0xff] }
 0x38e   :  { %1676 = vmatpush.msrb.mxu0 %v3817_v50  ;;  %1725 = vmatpush.msrb.mxu2 %v4045_v56 }
 0x38f   :  { %2357 = vtanh.f32 %v3784_v61  ;;  %v1365_v38 = vsel %vm1364_vm13, %v2354_v12, %v1361_v43  ;;  %1703 = vmatpush.msrb.mxu1 %v3990_v27  ;;  %v4002_v12 = vld [vmem:[%s4337_s3 + $0xf8] sm:$0xff] }
 0x390   :  { %v3787_v26 = vsel %vm1367_vm14, %v1369_v48, %v1365_v38  ;;  %1677 = vmatpush.msrb.mxu0 %v3841_v6  ;;  %1743 = vmatpush.msrb.mxu3 %v4002_v12  ;;  %v4064_v38 = vld [vmem:[%s4337_s3 + $0x88] sm:$0xff]  ;;  %v4071_v48 = vld [vmem:[%s4337_s3 + $0x90] sm:$0xff] }
 0x391   :  { %4466 = vst [vmem:[#allocation52_spill] sm:$0xff] %v3787_v26  ;;  %1704 = vmatpush.msrb.mxu1 %v4014_v18  ;;  %1726 = vmatpush.msrb.mxu2 %v4071_v48 }
 0x392   :  { %1678 = vmatpush.msrb.mxu0 %v3865_v22  ;;  %1744 = vmatpush.msrb.mxu3 %v4026_v31 }
 0x393   :  { %1705 = vmatpush.msrb.mxu1 %v4040_v24 }
 0x394   :  { %1679 = vmatpush.msrb.mxu0 %v3889_v4  ;;  %1745 = vmatpush.msrb.mxu3 %v4052_v59 }
 0x395   :  { %v2358_v16 = vpop.eup %2357  ;;  %1706 = vmatpush.msrb.mxu1 %v4064_v38 }
 0x396   :  { %v1377_v40 = vmul.f32 %v2358_v16, %v3787_v26  ;;  %1680 = vmatpush.msrb.mxu0 %v3913_v63  ;;  %v4076_v16 = vld [vmem:[%s4337_s3 + $0x98] sm:$0xff] }
 0x397   :  { %1746 = vmatpush.msrb.mxu3 %v4076_v16  ;;  %v4145_v26 = vld [vmem:[%s4337_s3 + $0x38] sm:$0xff] }
 0x398   :  { %1469 = vmatmul.f32.vlgmr.msra.gmra.mxu0 %v1377_v40  ;;  %1489 = vmatmul.f32.vlgmr.msra.gmra.mxu1 %v1377_v40 }
 0x399   :  { %1509 = vmatmul.f32.vlgmr.msra.gmra.mxu2 %v1377_v40  ;;  %1529 = vmatmul.f32.vlgmr.msra.gmra.mxu3 %v1377_v40  ;;  %v4081_v40 = vld [vmem:[%s4337_s3 + $0x60] sm:$0xff] }
 0x39a   :  { %1681 = vmatpush.msrb.mxu0 %v3937_v58 }
 0x39c   :  { %1682 = vmatpush.msrb.mxu0 %v3961_v46 }
 0x39e   :  { %1683 = vmatpush.msrb.mxu0 %v3985_v9 }
 0x3a0   :  { %1684 = vmatpush.msrb.mxu0 %v4009_v13 }
 0x3a2   :  { %1685 = vmatpush.msrb.mxu0 %v4035_v55 }
 0x3a4   :  { %1686 = vmatpush.msrb.mxu0 %v4059_v5 }
 0x3a6   :  { %1687 = vmatpush.msrb.mxu0 %v4081_v40 }
 0x415   :  { %v1470_v23 = vpop.f32.mrf.mxu0  ;;  %v1490_v25 = vpop.f32.mrf.mxu1 }
 0x416   :  { %v1533_v36 = vadd.f32 %v1470_v23, %v4467_v32  ;;  %v1534_v52 = vadd.f32 %v1490_v25, %v4468_v10  ;;  %v4088_v23 = vld [vmem:[%s4337_s3 + $0x68] sm:$0xff]  ;;  %v4093_v25 = vld [vmem:[%s4337_s3 + $0x70] sm:$0xff]  ;;  %v4098_v32 = vld [vmem:[%s4337_s3 + $0x78] sm:$0xff] }
 0x417   :  { %4469 = vst [vmem:[#allocation53_spill] sm:$0xff] %v4098_v32  ;;  %1707 = vmatpush.msrb.mxu1 %v4088_v23  ;;  %v4110_v10 = vld [vmem:[%s4337_s3 + $0x48] sm:$0xff]  ;;  %1727 = vmatpush.msrb.mxu2 %v4093_v25 }
 0x418   :  { %v2263_v43 = vmul.f32 -1.442695, %v1533_v36  ;;  %v2264_v0 = vmul.f32 -1.442695, %v1534_v52  ;;  %v4105_v36 = vld [vmem:[%s4337_s3 + $0x40] sm:$0xff]  ;;  %4471 = vst [vmem:[#allocation35_spill] sm:$0xff] %v4110_v10  ;;  %1747 = vmatpush.msrb.mxu3 %v4098_v32 }
 0x419   :  { %4470 = vst [vmem:[#allocation34_spill] sm:$0xff] %v4105_v36  ;;  %v4115_v52 = vld [vmem:[%s4337_s3 + $0x50] sm:$0xff]  ;;  %1688 = vmatpush.msrb.mxu0 %v4105_v36  ;;  %1708 = vmatpush.msrb.mxu1 %v4110_v10 }
 0x41a   :  { %2359 = vpow2.f32 %v2263_v43  ;;  %4472 = vst [vmem:[#allocation36_spill] sm:$0xff] %v4115_v52  ;;  %1728 = vmatpush.msrb.mxu2 %v4115_v52  ;;  %v4164_v52 = vld [vmem:[%s4337_s3 + $0x10] sm:$0xff] }
 0x41b   :  { %2361 = vpow2.f32 %v2264_v0  ;;  %v4122_v0 = vld [vmem:[%s4337_s3 + $0x58] sm:$0xff]  ;;  %1689 = vmatpush.msrb.mxu0 %v4127_v15  ;;  %1709 = vmatpush.msrb.mxu1 %v4132_v44 }
 0x41c   :  { %v1510_v43 = vpop.f32.mrf.mxu2  ;;  %4473 = vst [vmem:[#allocation37_spill] sm:$0xff] %v4122_v0  ;;  %1748 = vmatpush.msrb.mxu3 %v4122_v0  ;;  %v4169_v0 = vld [vmem:[%s4337_s3 + $0x18] sm:$0xff]  ;;  %1729 = vmatpush.msrb.mxu2 %v4140_v14 }
 0x41d   :  { %v1535_v53 = vadd.f32 %v1510_v43, %v4475_v17  ;;  %v4152_v17 = vld [vmem:[%s4337_s3] sm:$0xff]  ;;  %v4157_v43 = vld [vmem:[%s4337_s3 + $0x8] sm:$0xff]  ;;  %s2462_s3 = smov [#allocation8]  }
 0x41e   :  { %1749 = vmatpush.msrb.mxu3 %v4145_v26  ;;  %1690 = vmatpush.msrb.mxu0 %v4152_v17  ;;  %s4314_s26 = sshll.u32 %s2462_s3, 4  ;;  %s2201_s26 = int_to_ptr.vmem [resolvable:$true] %s4314_s26 }
 0x41f   :  { %v2265_v10 = vmul.f32 -1.442695, %v1535_v53  ;;  %1710 = vmatpush.msrb.mxu1 %v4157_v43  ;;  %1730 = vmatpush.msrb.mxu2 %v4164_v52 }
 0x420   :  { %v2360_v36 = vpop.eup %2359  ;;  %1750 = vmatpush.msrb.mxu3 %v4169_v0  ;;  %1897 = vmatpush.msra.mxu0 %v3793_v28 }
 0x421   :  { %v2362_v53 = vpop.eup %2361  ;;  %v4173_v32 = vadd.f32 1.0, %v2360_v36  ;;  %2363 = vpow2.f32 %v2265_v10  ;;  %1917 = vmatpush.msra.mxu1 %v3798_v41  ;;  %1937 = vmatpush.msra.mxu2 %v3803_v49  ;;  %v1530_v36 = vpop.f32.mrf.mxu3  ;;  %v4476_v49 = vld [vmem:[#allocation23_spill] sm:$0xff] }
 0x422   :  { %v4177_v44 = vadd.f32 1.0, %v2362_v53  ;;  %1957 = vmatpush.msra.mxu3 %v3810_v54  ;;  %1898 = vmatpush.msra.mxu0 %v3817_v50  ;;  %v1536_v54 = vadd.f32 %v1530_v36, %v4476_v49 }
 0x423   :  { %2365 = vrcp.f32 %v4173_v32  ;;  %1918 = vmatpush.msra.mxu1 %v3822_v62  ;;  %1938 = vmatpush.msra.mxu2 %v3827_v2  ;;  %vm1554_vm1 = vweird.f32 %v4173_v32 }
 0x424   :  { %2367 = vrcp.f32 %v4177_v44  ;;  %1958 = vmatpush.msra.mxu3 %v3834_v3  ;;  %1899 = vmatpush.msra.mxu0 %v3841_v6  ;;  %vm1569_vm2 = vweird.f32 %v4177_v44 }
 0x425   :  { %1919 = vmatpush.msra.mxu1 %v3846_v7  ;;  %1939 = vmatpush.msra.mxu2 %v3851_v60  ;;  %v1560_v7 = vand.u32 2147483648, %v4173_v32  ;;  %v1575_v60 = vand.u32 2147483648, %v4177_v44 }
 0x426   :  { %1959 = vmatpush.msra.mxu3 %v3858_v20  ;;  %1900 = vmatpush.msra.mxu0 %v3865_v22  ;;  %v1558_v22 = vand.u32 2147483647, %v4173_v32 }
 0x427   :  { %v2364_v10 = vpop.eup %2363  ;;  %1920 = vmatpush.msra.mxu1 %v3870_v29  ;;  %1940 = vmatpush.msra.mxu2 %v3875_v30  ;;  %v1573_v30 = vand.u32 2147483647, %v4177_v44 }
 0x428   :  { %v4193_v28 = vadd.f32 1.0, %v2364_v10  ;;  %1960 = vmatpush.msra.mxu3 %v3882_v1  ;;  %1901 = vmatpush.msra.mxu0 %v3889_v4  ;;  %vm1559_vm5 = vcmp.eq.f32.partialorder %v1558_v22, 8.507059e+37 }
 0x429   :  { %v2366_v41 = vpop.eup %2365  ;;  %1921 = vmatpush.msra.mxu1 %v3894_v33  ;;  %1941 = vmatpush.msra.mxu2 %v3899_v47  ;;  %v1561_v47 = vor.u32 1.1754944e-38, %v1560_v7  ;;  %vm1574_vm6 = vcmp.eq.f32.partialorder %v1573_v30, 8.507059e+37 }
 0x42a   :  { %v2368_v50 = vpop.eup %2367  ;;  %v1550_v62 = vmul.f32 %v2366_v41, %v4173_v32  ;;  %2369 = vrcp.f32 %v4193_v28  ;;  %1961 = vmatpush.msra.mxu3 %v3906_v37  ;;  %1902 = vmatpush.msra.mxu0 %v3913_v63  ;;  %vm1555_vm15 = vweird.f32 %v2366_v41  ;;  %v1576_v63 = vor.u32 1.1754944e-38, %v1575_v60 }
 0x42b   :  { %v1565_v2 = vmul.f32 %v2368_v50, %v4177_v44  ;;  %2371 = vtanh.f32 %v1536_v54  ;;  %1922 = vmatpush.msra.mxu1 %v3918_v45  ;;  %1942 = vmatpush.msra.mxu2 %v3923_v21  ;;  %vm1570_vm0 = vweird.f32 %v2368_v50  ;;  %vm1556_vm3 = vmor %vm1554_vm1, %vm1555_vm15  ;;  %vm1584_vm9 = vweird.f32 %v4193_v28 }
 0x42c   :  { %v1551_v3 = vsub.f32 1.0, %v1550_v62  ;;  %1962 = vmatpush.msra.mxu3 %v3930_v57  ;;  %1903 = vmatpush.msra.mxu0 %v3937_v58  ;;  %vm1571_vm4 = vmor %vm1569_vm2, %vm1570_vm0 }
 0x42d   :  { %v1566_v6 = vsub.f32 1.0, %v1565_v2  ;;  %1923 = vmatpush.msra.mxu1 %v3942_v34  ;;  %1943 = vmatpush.msra.mxu2 %v3947_v35 }
 0x42e   :  { %v1552_v20 = vmul.f32 %v2366_v41, %v1551_v3  ;;  %1963 = vmatpush.msra.mxu3 %v3954_v39  ;;  %1904 = vmatpush.msra.mxu0 %v3961_v46 }
 0x42f   :  { %v1567_v29 = vmul.f32 %v2368_v50, %v1566_v6  ;;  %1924 = vmatpush.msra.mxu1 %v3966_v51  ;;  %1944 = vmatpush.msra.mxu2 %v3971_v11 }
 0x430   :  { %v4219_v1 = vpop.eup %2369  ;;  %v1553_v4 = vadd.f32 %v2366_v41, %v1552_v20  ;;  %1964 = vmatpush.msra.mxu3 %v3978_v42  ;;  %1905 = vmatpush.msra.mxu0 %v3985_v9  ;;  %v1588_v42 = vand.u32 2147483647, %v4193_v28 }
 0x431   :  { %v1580_v33 = vmul.f32 %v4219_v1, %v4193_v28  ;;  %v1568_v37 = vadd.f32 %v2368_v50, %v1567_v29  ;;  %v2372_v44 = vpop.eup %2371  ;;  %1925 = vmatpush.msra.mxu1 %v3990_v27  ;;  %1945 = vmatpush.msra.mxu2 %v3995_v19  ;;  %vm1585_vm8 = vweird.f32 %v4219_v1  ;;  %v4477_v27 = vld [vmem:[#allocation53_spill] sm:$0xff] }
 0x432   :  { %v1557_v45 = vsel %vm1556_vm3, %v2366_v41, %v1553_v4  ;;  %1965 = vmatpush.msra.mxu3 %v4002_v12  ;;  %1906 = vmatpush.msra.mxu0 %v4009_v13  ;;  %vm1586_vm10 = vmor %vm1584_vm9, %vm1585_vm8  ;;  %v4478_v12 = vld [vmem:[#allocation34_spill] sm:$0xff]  ;;  %v4479_v13 = vld [vmem:[#allocation35_spill] sm:$0xff]  ;;  %vm1589_vm11 = vcmp.eq.f32.partialorder %v1588_v42, 8.507059e+37 }
 0x433   :  { %v1581_v21 = vsub.f32 1.0, %v1580_v33  ;;  %v1562_v57 = vsel %vm1559_vm5, %v1561_v47, %v1557_v45  ;;  %v1572_v58 = vsel %vm1571_vm4, %v2368_v50, %v1568_v37  ;;  %1926 = vmatpush.msra.mxu1 %v4014_v18  ;;  %1946 = vmatpush.msra.mxu2 %v4019_v8  ;;  %v4480_v18 = vld [vmem:[#allocation36_spill] sm:$0xff]  ;;  %v4481_v8 = vld [vmem:[#allocation37_spill] sm:$0xff]  ;;  %v4486_v41 = vld [vmem:[#allocation27_spill] sm:$0xff] }
 0x434   :  { %v1577_v34 = vsel %vm1574_vm6, %v1576_v63, %v1572_v58  ;;  %v1596_v35 = vmul.f32 %v2372_v44, %v1562_v57  ;;  %1966 = vmatpush.msra.mxu3 %v4026_v31  ;;  %1907 = vmatpush.msra.mxu0 %v4035_v55 }
 0x435   :  { %v1582_v39 = vmul.f32 %v4219_v1, %v1581_v21  ;;  %v1595_v46 = vmul.f32 %v1577_v34, %v3784_v61  ;;  %1927 = vmatpush.msra.mxu1 %v4040_v24  ;;  %1947 = vmatpush.msra.mxu2 %v4045_v56  ;;  %v1590_v61 = vand.u32 2147483648, %v4193_v28  ;;  %v4482_v24 = vld [vmem:[#allocation38_spill] sm:$0xff] }
 0x436   :  { %1967 = vmatpush.msra.mxu3 %v4052_v59  ;;  %1908 = vmatpush.msra.mxu0 %v4059_v5  ;;  %v4483_v5 = vld [vmem:[#allocation24_spill] sm:$0xff] }
 0x437   :  { %v4243_v51 = vadd.f32 %v1596_v35, %v1595_v46  ;;  %v1583_v11 = vadd.f32 %v4219_v1, %v1582_v39  ;;  %1928 = vmatpush.msra.mxu1 %v4064_v38  ;;  %1948 = vmatpush.msra.mxu2 %v4071_v48  ;;  %v1591_v19 = vor.u32 1.1754944e-38, %v1590_v61  ;;  %v4484_v48 = vld [vmem:[#allocation25_spill] sm:$0xff] }
 0x438   :  { %1968 = vmatpush.msra.mxu3 %v4076_v16  ;;  %1909 = vmatpush.msra.mxu0 %v4081_v40 }
 0x439   :  { %2373 = vtanh.f32 %v4243_v51  ;;  %1929 = vmatpush.msra.mxu1 %v4088_v23  ;;  %v1587_v9 = vsel %vm1586_vm10, %v4219_v1, %v1583_v11  ;;  %1949 = vmatpush.msra.mxu2 %v4093_v25  ;;  %v4485_v23 = vld [vmem:[#allocation26_spill] sm:$0xff] }
 0x43a   :  { %1969 = vmatpush.msra.mxu3 %v4477_v27  ;;  %1910 = vmatpush.msra.mxu0 %v4478_v12  ;;  %v4268_v55 = vsel %vm1589_vm11, %v1591_v19, %v1587_v9 }
 0x43b   :  { %1930 = vmatpush.msra.mxu1 %v4479_v13  ;;  %1950 = vmatpush.msra.mxu2 %v4480_v18 }
 0x43c   :  { %1970 = vmatpush.msra.mxu3 %v4481_v8  ;;  %1911 = vmatpush.msra.mxu0 %v4127_v15  ;;  %v4487_v8 = vld [vmem:[#allocation28_spill] sm:$0xff] }
 0x43d   :  { %1931 = vmatpush.msra.mxu1 %v4482_v24  ;;  %1951 = vmatpush.msra.mxu2 %v4140_v14  ;;  %v4488_v24 = vld [vmem:[#allocation29_spill] sm:$0xff] }
 0x43e   :  { %1971 = vmatpush.msra.mxu3 %v4145_v26  ;;  %1912 = vmatpush.msra.mxu0 %v4152_v17 }
 0x43f   :  { %v2374_v31 = vpop.eup %2373  ;;  %1932 = vmatpush.msra.mxu1 %v4157_v43  ;;  %1952 = vmatpush.msra.mxu2 %v4164_v52 }
 0x440   :  { %v1599_v56 = vmul.f32 %v2374_v31, %v4268_v55  ;;  %1972 = vmatpush.msra.mxu3 %v4169_v0 }
 0x442   :  { %1691 = vmatmul.f32.vlgmr.msrb.gmra.mxu0 %v1599_v56  ;;  %1711 = vmatmul.f32.vlgmr.msrb.gmra.mxu1 %v1599_v56 }
 0x443   :  { %1731 = vmatmul.f32.vlgmr.msrb.gmra.mxu2 %v1599_v56  ;;  %1751 = vmatmul.f32.vlgmr.msrb.gmra.mxu3 %v1599_v56 }
 0x4bf   :  { %v1692_v15 = vpop.f32.mrf.mxu0  ;;  %v1712_v59 = vpop.f32.mrf.mxu1 }
 0x4c0   :  { %v1755_v38 = vadd.f32 %v1692_v15, %v4483_v5  ;;  %v1756_v14 = vadd.f32 %v1712_v59, %v4484_v48 }
 0x4c2   :  { %v2266_v16 = vmul.f32 -1.442695, %v1755_v38  ;;  %v2267_v26 = vmul.f32 -1.442695, %v1756_v14  ;;  %v4489_v38 = vld [vmem:[#allocation30_spill] sm:$0xff] }
 0x4c4   :  { %2375 = vpow2.f32 %v2266_v16 }
 0x4c5   :  { %2377 = vpow2.f32 %v2267_v26 }
 0x4c6   :  { %v1732_v40 = vpop.f32.mrf.mxu2  ;;  %v1752_v0 = vpop.f32.mrf.mxu3 }
 0x4c7   :  { %v1757_v25 = vadd.f32 %v1732_v40, %v4485_v23  ;;  %v1758_v49 = vadd.f32 %v1752_v0, %v4486_v41 }
 0x4c9   :  { %v2268_v32 = vmul.f32 -1.442695, %v1757_v25 }
 0x4ca   :  { %v2376_v17 = vpop.eup %2375 }
 0x4cb   :  { %v2378_v43 = vpop.eup %2377  ;;  %v1768_v53 = vadd.f32 1.0, %v2376_v17  ;;  %2379 = vpow2.f32 %v2268_v32 }
 0x4cc   :  { %v1769_v52 = vadd.f32 1.0, %v2378_v43 }
 0x4cd   :  { %2381 = vrcp.f32 %v1768_v53  ;;  %v1782_v6 = vand.u32 2147483648, %v1768_v53  ;;  %v1780_v20 = vand.u32 2147483647, %v1768_v53  ;;  %vm1776_vm14 = vweird.f32 %v1768_v53 }
 0x4ce   :  { %2383 = vrcp.f32 %v1769_v52  ;;  %v1797_v7 = vand.u32 2147483648, %v1769_v52  ;;  %v1795_v29 = vand.u32 2147483647, %v1769_v52  ;;  %vm1791_vm15 = vweird.f32 %v1769_v52 }
 0x4cf   :  { %v1783_v33 = vor.u32 1.1754944e-38, %v1782_v6  ;;  %vm1781_vm2 = vcmp.eq.f32.partialorder %v1780_v20, 8.507059e+37  ;;  %v4491_v20 = vld [vmem:[#allocation52_spill] sm:$0xff] }
 0x4d0   :  { %v1798_v37 = vor.u32 1.1754944e-38, %v1797_v7  ;;  %vm1796_vm3 = vcmp.eq.f32.partialorder %v1795_v29, 8.507059e+37  ;;  %v2461_v7 = vmov 1934713408  }
 0x4d1   :  { %v2380_v36 = vpop.eup %2379 }
 0x4d2   :  { %v1770_v10 = vadd.f32 1.0, %v2380_v36 }
 0x4d3   :  { %v2382_v28 = vpop.eup %2381 }
 0x4d4   :  { %v2384_v54 = vpop.eup %2383  ;;  %v1772_v50 = vmul.f32 %v2382_v28, %v1768_v53  ;;  %2385 = vrcp.f32 %v1770_v10  ;;  %vm1777_vm12 = vweird.f32 %v2382_v28  ;;  %v1812_v61 = vand.u32 2147483648, %v1770_v10  ;;  %v4490_v53 = vld [vmem:[#allocation31_spill] sm:$0xff] }
 0x4d5   :  { %v1787_v62 = vmul.f32 %v2384_v54, %v1769_v52  ;;  %2387 = vtanh.f32 %v1758_v49  ;;  %vm1792_vm13 = vweird.f32 %v2384_v54  ;;  %vm1778_vm0 = vmor %vm1776_vm14, %vm1777_vm12  ;;  %vm1806_vm5 = vweird.f32 %v1770_v10 }
 0x4d6   :  { %v1773_v2 = vsub.f32 1.0, %v1772_v50  ;;  %vm1793_vm1 = vmor %vm1791_vm15, %vm1792_vm13  ;;  %v1810_v42 = vand.u32 2147483647, %v1770_v10  ;;  %v1813_v27 = vor.u32 1.1754944e-38, %v1812_v61 }
 0x4d7   :  { %v1788_v3 = vsub.f32 1.0, %v1787_v62 }
 0x4d8   :  { %v1774_v60 = vmul.f32 %v2382_v28, %v1773_v2  ;;  %vm1811_vm8 = vcmp.eq.f32.partialorder %v1810_v42, 8.507059e+37 }
 0x4d9   :  { %v1789_v22 = vmul.f32 %v2384_v54, %v1788_v3 }
 0x4da   :  { %v2386_v30 = vpop.eup %2385  ;;  %v1775_v1 = vadd.f32 %v2382_v28, %v1774_v60  ;;  %v2110_v60 = vunpack.c.l.s4 %v2461_v7 }
 0x4db   :  { %v1802_v4 = vmul.f32 %v2386_v30, %v1770_v10  ;;  %v1790_v47 = vadd.f32 %v2384_v54, %v1789_v22  ;;  %v2388_v45 = vpop.eup %2387  ;;  %vm1807_vm4 = vweird.f32 %v2386_v30  ;;  %v2083_v22 = vrot.slane %v4491_v20, 4 }
 0x4dc   :  { %v1779_v63 = vsel %vm1778_vm0, %v2382_v28, %v1775_v1  ;;  %vm1808_vm6 = vmor %vm1806_vm5, %vm1807_vm4  ;;  %v2111_v42 = vunpack.c.0.s8 %v2110_v60 }
 0x4dd   :  { %v1803_v44 = vsub.f32 1.0, %v1802_v4  ;;  %v1784_v21 = vsel %vm1781_vm2, %v1783_v33, %v1779_v63  ;;  %v1794_v57 = vsel %vm1793_vm1, %v2384_v54, %v1790_v47 }
 0x4de   :  { %v1799_v58 = vsel %vm1796_vm3, %v1798_v37, %v1794_v57  ;;  %v1818_v34 = vmul.f32 %v2388_v45, %v1784_v21 }
 0x4df   :  { %v1804_v35 = vmul.f32 %v2386_v30, %v1803_v44  ;;  %v1817_v39 = vmul.f32 %v1799_v58, %v4243_v51 }
 0x4e1   :  { %v4284_v46 = vadd.f32 %v1818_v34, %v1817_v39  ;;  %v1805_v11 = vadd.f32 %v2386_v30, %v1804_v35 }
 0x4e3   :  { %2389 = vtanh.f32 %v4284_v46  ;;  %v1809_v9 = vsel %vm1808_vm6, %v2386_v30, %v1805_v11 }
 0x4e4   :  { %v4287_v12 = vsel %vm1811_vm8, %v1813_v27, %v1809_v9 }
 0x4e5   :  { %v2081_v33 = vrot.slane %v4287_v12, 4  ;;  %v2084_v57 = vsel %vm2057_vm7, %v4287_v12, %v2083_v22 }
 0x4e7   :  { %v2082_v9 = vsel %vm2057_vm7, %v2081_v33, %v4491_v20 }
 0x4e9   :  { %v2390_v19 = vpop.eup %2389 }
 0x4ea   :  { %v1821_v13 = vmul.f32 %v2390_v19, %v4287_v12  ;;  %v2095_v12 = vrot.slane %v4268_v55, 4 }
 0x4ec   :  { %1913 = vmatmul.f32.vlgmr.msra.gmra.mxu0 %v1821_v13  ;;  %1933 = vmatmul.f32.vlgmr.msra.gmra.mxu1 %v1821_v13 }
 0x4ed   :  { %1953 = vmatmul.f32.vlgmr.msra.gmra.mxu2 %v1821_v13  ;;  %1973 = vmatmul.f32.vlgmr.msra.gmra.mxu3 %v1821_v13  ;;  %v4492_v13 = vld [vmem:[#allocation47_spill] sm:$0xff] }
 0x569   :  { %v1914_v51 = vpop.f32.mrf.mxu0  ;;  %v1934_v18 = vpop.f32.mrf.mxu1 }
 0x56a   :  { %v1977_v31 = vadd.f32 %v1914_v51, %v4487_v8  ;;  %v1978_v56 = vadd.f32 %v1934_v18, %v4488_v24  ;;  %v2092_v51 = vperm.slane %v2084_v57, %v4492_v13 }
 0x56c   :  { %v2269_v15 = vmul.f32 -1.442695, %v1977_v31  ;;  %v2270_v59 = vmul.f32 -1.442695, %v1978_v56  ;;  %v2088_v31 = vperm.slane %v2082_v9, %v4492_v13 }
 0x56e   :  { %2391 = vpow2.f32 %v2269_v15  ;;  %v4494_v15 = vld [vmem:[#allocation48_spill] sm:$0xff] }
 0x56f   :  { %2393 = vpow2.f32 %v2270_v59  ;;  %v2128_v59 = vperm.slane %v4494_v15, %v2111_v42 }
 0x570   :  { %v1954_v5 = vpop.f32.mrf.mxu2  ;;  %v1974_v25 = vpop.f32.mrf.mxu3 }
 0x571   :  { %v1979_v48 = vadd.f32 %v1954_v5, %v4489_v38  ;;  %v1980_v52 = vadd.f32 %v1974_v25, %v4490_v53 }
 0x573   :  { %v2271_v14 = vmul.f32 -1.442695, %v1979_v48  ;;  %v2143_v48 = vrot.slane %v2092_v51, 4 }
 0x574   :  { %v2392_v16 = vpop.eup %2391 }
 0x575   :  { %v2394_v26 = vpop.eup %2393  ;;  %v1990_v40 = vadd.f32 1.0, %v2392_v16  ;;  %2395 = vpow2.f32 %v2271_v14  ;;  %v4495_v16 = vld [vmem:[#allocation51_spill] sm:$0xff] }
 0x576   :  { %v1991_v23 = vadd.f32 1.0, %v2394_v26  ;;  %v2112_v26 = vperm.slane %v4495_v16, %v2111_v42 }
 0x577   :  { %2397 = vrcp.f32 %v1990_v40  ;;  %v2004_v49 = vand.u32 2147483648, %v1990_v40  ;;  %v2002_v62 = vand.u32 2147483647, %v1990_v40  ;;  %vm1998_vm11 = vweird.f32 %v1990_v40 }
 0x578   :  { %2399 = vrcp.f32 %v1991_v23  ;;  %v2019_v54 = vand.u32 2147483648, %v1991_v23  ;;  %v2017_v3 = vand.u32 2147483647, %v1991_v23  ;;  %vm2013_vm12 = vweird.f32 %v1991_v23 }
 0x579   :  { %v2005_v1 = vor.u32 1.1754944e-38, %v2004_v49  ;;  %vm2003_vm15 = vcmp.eq.f32.partialorder %v2002_v62, 8.507059e+37 }
 0x57a   :  { %v2020_v47 = vor.u32 1.1754944e-38, %v2019_v54  ;;  %vm2018_vm0 = vcmp.eq.f32.partialorder %v2017_v3, 8.507059e+37  ;;  %v2155_v3 = vrot.slane %v2112_v26, 4 }
 0x57b   :  { %v2396_v32 = vpop.eup %2395 }
 0x57c   :  { %v1992_v17 = vadd.f32 1.0, %v2396_v32  ;;  %v2131_v32 = vrot.slane %v2088_v31, 4 }
 0x57d   :  { %v2398_v43 = vpop.eup %2397 }
 0x57e   :  { %v2400_v0 = vpop.eup %2399  ;;  %v1994_v36 = vmul.f32 %v2398_v43, %v1990_v40  ;;  %2401 = vrcp.f32 %v1992_v17  ;;  %vm1999_vm9 = vweird.f32 %v2398_v43  ;;  %v2034_v58 = vand.u32 2147483648, %v1992_v17  ;;  %v4496_v40 = vld [vmem:[#allocation49_spill] sm:$0xff] }
 0x57f   :  { %v2009_v10 = vmul.f32 %v2400_v0, %v1991_v23  ;;  %2403 = vtanh.f32 %v1980_v52  ;;  %vm2014_vm10 = vweird.f32 %v2400_v0  ;;  %vm2000_vm13 = vmor %vm1998_vm11, %vm1999_vm9  ;;  %v2032_v11 = vand.u32 2147483647, %v1992_v17 }
 0x580   :  { %v1995_v28 = vsub.f32 1.0, %v1994_v36  ;;  %vm2015_vm14 = vmor %vm2013_vm12, %vm2014_vm10  ;;  %vm2028_vm2 = vweird.f32 %v1992_v17  ;;  %v2035_v18 = vor.u32 1.1754944e-38, %v2034_v58  ;;  %v2116_v23 = vperm.slane %v4496_v40, %v2111_v42 }
 0x581   :  { %v2010_v41 = vsub.f32 1.0, %v2009_v10  ;;  %vm2033_vm4 = vcmp.eq.f32.partialorder %v2032_v11, 8.507059e+37  ;;  %v2167_v36 = vrot.slane %v2128_v59, 4 }
 0x582   :  { %v1996_v50 = vmul.f32 %v2398_v43, %v1995_v28 }
 0x583   :  { %v2011_v2 = vmul.f32 %v2400_v0, %v2010_v41 }
 0x584   :  { %v2402_v6 = vpop.eup %2401  ;;  %v1997_v29 = vadd.f32 %v2398_v43, %v1996_v50 }
 0x585   :  { %v2024_v30 = vmul.f32 %v2402_v6, %v1992_v17  ;;  %v2012_v4 = vadd.f32 %v2400_v0, %v2011_v2  ;;  %v2404_v63 = vpop.eup %2403  ;;  %vm2029_vm1 = vweird.f32 %v2402_v6 }
 0x586   :  { %v2001_v37 = vsel %vm2000_vm13, %v2398_v43, %v1997_v29  ;;  %vm2030_vm3 = vmor %vm2028_vm2, %vm2029_vm1 }
 0x587   :  { %v2025_v45 = vsub.f32 1.0, %v2024_v30  ;;  %v2006_v44 = vsel %vm2003_vm15, %v2005_v1, %v2001_v37  ;;  %v2016_v21 = vsel %vm2015_vm14, %v2400_v0, %v2012_v4 }
 0x588   :  { %v2021_v34 = vsel %vm2018_vm0, %v2020_v47, %v2016_v21  ;;  %v2040_v35 = vmul.f32 %v2404_v63, %v2006_v44 }
 0x589   :  { %v2026_v39 = vmul.f32 %v2402_v6, %v2025_v45  ;;  %v2039_v61 = vmul.f32 %v2021_v34, %v4284_v46  ;;  %v4493_v46 = vld [vmem:[#allocation50_spill] sm:$0xff] }
 0x58a   :  { %v2124_v56 = vperm.slane %v4493_v46, %v2111_v42 }
 0x58b   :  { %v2027_v27 = vadd.f32 %v2402_v6, %v2026_v39  ;;  %v2041_v19 = vadd.f32 %v2040_v35, %v2039_v61 }
 0x58c   :  { %v2163_v0 = vrot.slane %v2124_v56, 4 }
 0x58d   :  { %v2031_v8 = vsel %vm2030_vm3, %v2402_v6, %v2027_v27  ;;  %2405 = vtanh.f32 %v2041_v19  ;;  %v2159_v6 = vrot.slane %v2116_v23, 4 }
 0x58e   :  { %v2036_v24 = vsel %vm2033_vm4, %v2035_v18, %v2031_v8 }
 0x58f   :  { %v2093_v5 = vrot.slane %v2036_v24, 4  ;;  %v2096_v38 = vsel %vm2057_vm7, %v2036_v24, %v2095_v12 }
 0x590   :  { %v2104_v14 = vperm.slane %v2096_v38, %v4492_v13 }
 0x591   :  { %v2094_v25 = vsel %vm2057_vm7, %v2093_v5, %v4268_v55 }
 0x592   :  { %v2100_v17 = vperm.slane %v2094_v25, %v4492_v13  ;;  %v2141_v43 = vrot.slane %v2104_v14, 4  ;;  %v2144_v53 = vsel %vm2057_vm7, %v2104_v14, %v2143_v48 }
 0x593   :  { %v2406_v52 = vpop.eup %2405  ;;  %v2152_v10 = vperm.slane %v2144_v53, %v2111_v42 }
 0x594   :  { %v2129_v28 = vrot.slane %v2100_v17, 4  ;;  %v2132_v55 = vsel %vm2057_vm7, %v2100_v17, %v2131_v32  ;;  %v2142_v41 = vsel %vm2057_vm7, %v2141_v43, %v2092_v51  ;;  %v2043_v49 = vmul.f32 %v2406_v52, %v2036_v24 }
 0x595   :  { %v2140_v54 = vperm.slane %v2132_v55, %v2111_v42  ;;  %v2148_v50 = vperm.slane %v2142_v41, %v2111_v42  ;;  %v2165_v62 = vrot.slane %v2152_v10, 4  ;;  %v2168_v2 = vsel %vm2057_vm7, %v2152_v10, %v2167_v36 }
 0x596   :  { %v2130_v7 = vsel %vm2057_vm7, %v2129_v28, %v2088_v31  ;;  %2176 = vst [vmem:[#allocation6 + $0x38] sm:$0xff] %v2168_v2 }
 0x597   :  { %v2136_v60 = vperm.slane %v2130_v7, %v2111_v42  ;;  %v2157_v20 = vrot.slane %v2140_v54, 4  ;;  %v2161_v22 = vrot.slane %v2148_v50, 4  ;;  %v2164_v29 = vsel %vm2057_vm7, %v2148_v50, %v2163_v0  ;;  %2181 = vst [vmem:[#allocation8] sm:$0xff] %v2043_v49 }
 0x598   :  { %v2166_v30 = vsel %vm2057_vm7, %v2165_v62, %v2128_v59  ;;  %2174 = vst [vmem:[#allocation6 + $0x28] sm:$0xff] %v2164_v29  ;;  %v2160_v1 = vsel %vm2057_vm7, %v2140_v54, %v2159_v6  ;;  %2205 = dma.vmem_to_hbm [thread:$0]  %s2201_s26, 128, %s2203_s29, [#allocation9]  }
 0x599   :  { %v2153_v4 = vrot.slane %v2136_v60, 4  ;;  %2175 = vst [vmem:[#allocation6 + $0x30] sm:$0xff] %v2166_v30  ;;  %v2156_v33 = vsel %vm2057_vm7, %v2136_v60, %v2155_v3  ;;  %v2158_v47 = vsel %vm2057_vm7, %v2157_v20, %v2116_v23  ;;  %v2162_v37 = vsel %vm2057_vm7, %v2161_v22, %v2124_v56 }
 0x59a   :  { %2170 = vst [vmem:[#allocation6 + $0x8] sm:$0xff] %v2156_v33 }
 0x59b   :  { %v2154_v63 = vsel %vm2057_vm7, %v2153_v4, %v2112_v26  ;;  %2171 = vst [vmem:[#allocation6 + $0x10] sm:$0xff] %v2158_v47 }
 0x59c   :  { %2169 = vst [vmem:[#allocation6] sm:$0xff] %v2154_v63 }
 0x59d   :  { %2172 = vst [vmem:[#allocation6 + $0x18] sm:$0xff] %v2160_v1 }
 0x59e   :  { %2173 = vst [vmem:[#allocation6 + $0x20] sm:$0xff] %v2162_v37 }
 0x59f   :  { %2194 = dma.vmem_to_hbm [thread:$0]  %s2187_s30, 1024, %s2189_s8, [#allocation7], %s2464_s4, %s2464_s4, %s2465_s9  }
 0x5a0   :  { %2455 = dma.done.wait [#allocation7], 1024  }
 0x5a1   :  { %2456 = vsyncadd [#allocation7], 4294966272 }
 0x5a2   :  { %2457 = dma.done.wait [#allocation9], 128  }
 0x5a3   :  { %2458 = vsyncadd [#allocation9], 4294967168 }
 0x5a4   :  { %2214 = vsyncpa [#allocation7], 1 }
 0x5a5   :  { %2215 = vsyncpa [#allocation9], 1 }

</bundles_post_ra>
